<compile_context>
chip_gen: v6e
topology: v6e:2x2x1
jax: 0.10.0
libtpu: 0.0.40
codegen_flags: <defaults>
</compile_context>

<pallas_src>
import functools

import jax
import jax.numpy as jnp
from jax import lax
from jax.experimental import pallas as pl
from jax.experimental.pallas import tpu as pltpu

F32 = jnp.float32
BF16 = jnp.bfloat16


def _round_up(x, m):
    return ((x + m - 1) // m) * m


# ----------------------------------------------------------------------------
# Tiled linear (matmul + bias + optional fused activation), bf16 MXU / f32 acc
# ----------------------------------------------------------------------------
def _linear_kernel(x_ref, w_ref, b_ref, o_ref, *, act):
    x = x_ref[...].astype(BF16)
    w = w_ref[...].astype(BF16)
    y = jnp.dot(x, w, preferred_element_type=jnp.float32)
    y = y + b_ref[...]
    if act == "sigmoid":
        y = jax.nn.sigmoid(y)
    elif act == "relu":
        y = jnp.maximum(y, 0.0)
    elif act == "tanh":
        y = jnp.tanh(y)
    o_ref[...] = y.astype(o_ref.dtype)


def linear(x, w, b=None, act=None, tile_m=512):
    """x: [..., K], w: [K, N], b: [N]/None -> [..., N]. Tiled over rows."""
    lead = x.shape[:-1]
    K = x.shape[-1]
    N = w.shape[-1]
    x2 = x.reshape(-1, K).astype(F32)
    M = x2.shape[0]
    tm = min(tile_m, _round_up(M, 8))
    Mp = _round_up(M, tm)
    if Mp != M:
        x2 = jnp.pad(x2, ((0, Mp - M), (0, 0)))
    if b is None:
        b = jnp.zeros((N,), F32)
    b2 = jnp.asarray(b, F32).reshape(1, N)
    out = pl.pallas_call(
        functools.partial(_linear_kernel, act=act),
        out_shape=jax.ShapeDtypeStruct((Mp, N), F32),
        grid=(Mp // tm,),
        in_specs=[
            pl.BlockSpec((tm, K), lambda i: (i, 0)),
            pl.BlockSpec((K, N), lambda i: (0, 0)),
            pl.BlockSpec((1, N), lambda i: (0, 0)),
        ],
        out_specs=pl.BlockSpec((tm, N), lambda i: (i, 0)),
        compiler_params=pltpu.CompilerParams(
            dimension_semantics=("parallel",)),
    )(x2, w.astype(F32), b2)
    if Mp != M:
        out = out[:M]
    return out.reshape(*lead, N)


# ----------------------------------------------------------------------------
# Lane-dense 1-logit head: pad the single output column to 128 lanes, slice out.
# ----------------------------------------------------------------------------
def logit_head(x, w, b, n_pad=128):
    K = w.shape[0]
    wpad = jnp.zeros((K, n_pad), F32).at[:, 0].set(w[:, 0].astype(F32))
    bpad = jnp.zeros((n_pad,), F32).at[0].set(jnp.asarray(b, F32).reshape(-1)[0])
    y = linear(x, wpad, bpad)
    return y[..., :1]


# ----------------------------------------------------------------------------
# Fused highway layer: one [H, 2H] matmul, gate/transform/mix all in-kernel.
# ----------------------------------------------------------------------------
def _highway_kernel(x_ref, w_ref, b_ref, o_ref):
    x = x_ref[...]
    y = jnp.dot(x.astype(BF16), w_ref[...].astype(BF16),
                preferred_element_type=jnp.float32) + b_ref[...]
    Hd = x.shape[-1]
    g = jax.nn.sigmoid(y[:, :Hd])
    t = jnp.maximum(y[:, Hd:], 0.0)
    o_ref[...] = (g * t + (1.0 - g) * x).astype(o_ref.dtype)


def highway_layer(x, w, b, tile_m=512):
    lead = x.shape[:-1]
    Hd = x.shape[-1]
    x2 = x.reshape(-1, Hd).astype(F32)
    M = x2.shape[0]
    tm = min(tile_m, _round_up(M, 8))
    Mp = _round_up(M, tm)
    if Mp != M:
        x2 = jnp.pad(x2, ((0, Mp - M), (0, 0)))
    out = pl.pallas_call(
        _highway_kernel,
        out_shape=jax.ShapeDtypeStruct((Mp, Hd), F32),
        grid=(Mp // tm,),
        in_specs=[
            pl.BlockSpec((tm, Hd), lambda i: (i, 0)),
            pl.BlockSpec((Hd, 2 * Hd), lambda i: (0, 0)),
            pl.BlockSpec((1, 2 * Hd), lambda i: (0, 0)),
        ],
        out_specs=pl.BlockSpec((tm, Hd), lambda i: (i, 0)),
        compiler_params=pltpu.CompilerParams(
            dimension_semantics=("parallel",)),
    )(x2, w.astype(F32), jnp.asarray(b, F32).reshape(1, 2 * Hd))
    if Mp != M:
        out = out[:M]
    return out.reshape(*lead, Hd)


# ----------------------------------------------------------------------------
# BiDAF trilinear attention (per-batch grid): out = [c ; a ; c*a ; c*b]  (4*D)
# q2c term re-associated to avoid an [Lc, Lc] intermediate.
# TODO(synk): tile the query-row (Lc) axis for very long contexts (>~1k) on v7x.
# ----------------------------------------------------------------------------
def _bidaf_att_kernel(c_ref, q_ref, cm_ref, qm_ref, wc_ref, wq_ref, wcq_ref,
                      b_ref, o_ref):
    c = c_ref[0]          # [Lc, D]
    q = q_ref[0]          # [Lq, D]
    cmask = cm_ref[0]     # [Lc, 1]
    qmask = qm_ref[0]     # [1, Lq]
    wc = wc_ref[...]      # [1, D]
    wq = wq_ref[...]      # [1, D]
    wcq = wcq_ref[...]    # [1, D]

    s0 = jnp.sum(c * wc, axis=-1, keepdims=True)                    # [Lc,1]
    s1 = jnp.sum(q * wq, axis=-1, keepdims=True)                    # [Lq,1]
    s2 = jnp.dot((c * wcq).astype(BF16), q.T.astype(BF16),
                 preferred_element_type=jnp.float32)                # [Lc,Lq]
    s = s0 + s1.T + s2 + b_ref[0, 0]

    neg = jnp.float32(-1e30)
    # softmax over query dim, masked by q_mask
    s1m = jnp.where(qmask > 0, s, neg)
    s1m = s1m - jnp.max(s1m, axis=-1, keepdims=True)
    e1 = jnp.exp(s1m)
    p1 = e1 * pl.reciprocal(jnp.sum(e1, axis=-1, keepdims=True), approx=True)
    # softmax over context dim, masked by c_mask
    s2m = jnp.where(cmask > 0, s, neg)
    s2m = s2m - jnp.max(s2m, axis=0, keepdims=True)
    e2 = jnp.exp(s2m)
    p2 = e2 * pl.reciprocal(jnp.sum(e2, axis=0, keepdims=True), approx=True)

    a = jnp.dot(p1.astype(BF16), q.astype(BF16),
                preferred_element_type=jnp.float32)                 # [Lc, D]
    qc = jnp.dot(p2.T.astype(BF16), c.astype(BF16),
                 preferred_element_type=jnp.float32)                # [Lq, D]
    bb = jnp.dot(p1.astype(BF16), qc.astype(BF16),
                 preferred_element_type=jnp.float32)                # [Lc, D]
    o_ref[0] = jnp.concatenate([c, a, c * a, c * bb], axis=-1).astype(o_ref.dtype)


def bidaf_attention(c, q, c_mask, q_mask, p):
    B, Lc, D = c.shape
    Lq = q.shape[1]
    cm = c_mask.astype(F32)[:, :, None]   # [B, Lc, 1]
    qm = q_mask.astype(F32)[:, None, :]   # [B, 1, Lq]
    return pl.pallas_call(
        _bidaf_att_kernel,
        out_shape=jax.ShapeDtypeStruct((B, Lc, 4 * D), F32),
        grid=(B,),
        in_specs=[
            pl.BlockSpec((1, Lc, D), lambda b: (b, 0, 0)),
            pl.BlockSpec((1, Lq, D), lambda b: (b, 0, 0)),
            pl.BlockSpec((1, Lc, 1), lambda b: (b, 0, 0)),
            pl.BlockSpec((1, 1, Lq), lambda b: (b, 0, 0)),
            pl.BlockSpec((1, D), lambda b: (0, 0)),
            pl.BlockSpec((1, D), lambda b: (0, 0)),
            pl.BlockSpec((1, D), lambda b: (0, 0)),
            pl.BlockSpec((1, 1), lambda b: (0, 0)),
        ],
        out_specs=pl.BlockSpec((1, Lc, 4 * D), lambda b: (b, 0, 0)),
        compiler_params=pltpu.CompilerParams(
            dimension_semantics=("parallel",)),
    )(c.astype(F32), q.astype(F32), cm, qm, p["wc"], p["wq"], p["wcq"], p["bias"])


# ----------------------------------------------------------------------------
# DocQA-style self attention (per-batch grid): out = [c ; a ; c*a ; c-a] (4*D)
# TODO(synk): exact SelfAttention formulation of the original `layers` module was
# not provided; reconstructed as trilinear self-match with diagonal masked out.
# TODO(synk): tile query rows for Lc > ~1k (keeps the [Lc,Lc] scores off v7x VMEM).
# ----------------------------------------------------------------------------
def _self_att_kernel(c_ref, m_ref, wc_ref, wq_ref, wcq_ref, b_ref, o_ref):
    c = c_ref[0]          # [L, D]
    kmask = m_ref[0]      # [1, L]
    wc = wc_ref[...]
    wq = wq_ref[...]
    wcq = wcq_ref[...]

    s0 = jnp.sum(c * wc, axis=-1, keepdims=True)                     # [L,1]
    s1 = jnp.sum(c * wq, axis=-1, keepdims=True)                     # [L,1]
    s2 = jnp.dot((c * wcq).astype(BF16), c.T.astype(BF16),
                 preferred_element_type=jnp.float32)                 # [L,L]
    s = s0 + s1.T + s2 + b_ref[0, 0]

    L = c.shape[0]
    row = lax.broadcasted_iota(jnp.int32, (L, L), 0)
    col = lax.broadcasted_iota(jnp.int32, (L, L), 1)
    valid = jnp.logical_and(kmask > 0, row != col)
    sm = jnp.where(valid, s, jnp.float32(-1e30))
    sm = sm - jnp.max(sm, axis=-1, keepdims=True)
    e = jnp.exp(sm)
    p = e * pl.reciprocal(jnp.sum(e, axis=-1, keepdims=True), approx=True)
    a = jnp.dot(p.astype(BF16), c.astype(BF16),
                preferred_element_type=jnp.float32)                  # [L, D]
    o_ref[0] = jnp.concatenate([c, a, c * a, c - a], axis=-1).astype(o_ref.dtype)


def self_attention(c, c_mask, p):
    B, L, D = c.shape
    km = c_mask.astype(F32)[:, None, :]   # [B, 1, L]
    return pl.pallas_call(
        _self_att_kernel,
        out_shape=jax.ShapeDtypeStruct((B, L, 4 * D), F32),
        grid=(B,),
        in_specs=[
            pl.BlockSpec((1, L, D), lambda b: (b, 0, 0)),
            pl.BlockSpec((1, 1, L), lambda b: (b, 0, 0)),
            pl.BlockSpec((1, D), lambda b: (0, 0)),
            pl.BlockSpec((1, D), lambda b: (0, 0)),
            pl.BlockSpec((1, D), lambda b: (0, 0)),
            pl.BlockSpec((1, 1), lambda b: (0, 0)),
        ],
        out_specs=pl.BlockSpec((1, L, 4 * D), lambda b: (b, 0, 0)),
        compiler_params=pltpu.CompilerParams(
            dimension_semantics=("parallel",)),
    )(c.astype(F32), km, p["wc"], p["wq"], p["wcq"], p["bias"])


# ----------------------------------------------------------------------------
# Bidirectional LSTM layer.
#   Input projections (x @ W_i + b) are precomputed outside with the tiled
#   linear; the kernel only runs the serial recurrence (h @ W_h per step) with
#   both directions fused into one fori_loop.
# Padded steps keep the previous state and emit zeros (emulates pack_padded).
# ----------------------------------------------------------------------------
def _bilstm_kernel(gf_ref, gb_ref, m_ref, whf_ref, whb_ref, of_ref, ob_ref):
    L, B, _ = gf_ref.shape
    H = whf_ref.shape[0]

    def cell(pre, h, cst, wh_ref):
        g = pre + jnp.dot(h, wh_ref[...], preferred_element_type=jnp.float32)
        i = jax.nn.sigmoid(g[:, 0:H])
        f = jax.nn.sigmoid(g[:, H:2 * H])
        gg = jnp.tanh(g[:, 2 * H:3 * H])
        o = jax.nn.sigmoid(g[:, 3 * H:4 * H])
        c_new = f * cst + i * gg
        h_new = o * jnp.tanh(c_new)
        return h_new, c_new

    zeros = jnp.zeros((B, H), jnp.float32)

    def body(t, carry):
        hf, cf, hb, cb = carry
        tb = (L - 1) - t
        # forward direction at t, backward direction at L-1-t (fused -> keeps
        # the MXU fed with two back-to-back [B,H]x[H,4H] matmuls per step).
        mf = m_ref[pl.ds(t, 1)][0]        # [B, 1]
        mb = m_ref[pl.ds(tb, 1)][0]       # [B, 1]
        pref = gf_ref[pl.ds(t, 1)][0]     # [B, 4H]
        preb = gb_ref[pl.ds(tb, 1)][0]    # [B, 4H]

        hf_new, cf_new = cell(pref, hf, cf, whf_ref)
        hb_new, cb_new = cell(preb, hb, cb, whb_ref)

        hf = mf * hf_new + (1.0 - mf) * hf
        cf = mf * cf_new + (1.0 - mf) * cf
        hb = mb * hb_new + (1.0 - mb) * hb
        cb = mb * cb_new + (1.0 - mb) * cb

        of_ref[pl.ds(t, 1)] = (mf * hf_new)[None].astype(of_ref.dtype)
        ob_ref[pl.ds(tb, 1)] = (mb * hb_new)[None].astype(ob_ref.dtype)
        return (hf, cf, hb, cb)

    lax.fori_loop(0, L, body, (zeros, zeros, zeros, zeros))


def bilstm_layer(x, mask, p):
    """x: [B, L, Din], mask: [B, L] float -> [B, L, 2H]."""
    B, L, Din = x.shape
    H = p["whf"].shape[0]
    # Hoisted input projections: one big tiled matmul per direction (MXU-friendly).
    gin_f = linear(x, p["wif"], p["bf"])                       # [B, L, 4H]
    gin_b = linear(x, p["wib"], p["bb"])                       # [B, L, 4H]
    gf = jnp.transpose(gin_f, (1, 0, 2))                       # [L, B, 4H]
    gb = jnp.transpose(gin_b, (1, 0, 2))                       # [L, B, 4H]
    mt = jnp.transpose(mask.astype(F32), (1, 0))[:, :, None]   # [L, B, 1]
    of, ob = pl.pallas_call(
        _bilstm_kernel,
        out_shape=(jax.ShapeDtypeStruct((L, B, H), F32),
                   jax.ShapeDtypeStruct((L, B, H), F32)),
        grid=(1,),
        in_specs=[
            pl.BlockSpec((L, B, 4 * H), lambda i: (0, 0, 0)),
            pl.BlockSpec((L, B, 4 * H), lambda i: (0, 0, 0)),
            pl.BlockSpec((L, B, 1), lambda i: (0, 0, 0)),
            pl.BlockSpec((H, 4 * H), lambda i: (0, 0)),
            pl.BlockSpec((H, 4 * H), lambda i: (0, 0)),
        ],
        out_specs=(pl.BlockSpec((L, B, H), lambda i: (0, 0, 0)),
                   pl.BlockSpec((L, B, H), lambda i: (0, 0, 0))),
        compiler_params=pltpu.CompilerParams(
            dimension_semantics=("arbitrary",)),
    )(gf, gb, mt, p["whf"], p["whb"])
    out = jnp.concatenate([of, ob], axis=-1)                   # [L, B, 2H]
    return jnp.transpose(out, (1, 0, 2))


def rnn_encoder(x, mask, layer_params_list):
    out = x
    for lp in layer_params_list:
        out = bilstm_layer(out, mask, lp)
    return out


# ----------------------------------------------------------------------------
# Embedding (word emb + char features -> proj -> highway)
# The char projection is folded into the char-embedding table once (gather +
# max-pool, no per-token matmul).
# TODO(synk): exact char-CNN / highway internals of `layers.BiDAFAttention` not
# provided; reconstructed with a per-char linear + max-pool and a 2-layer highway.
# ----------------------------------------------------------------------------
def embed(w_ids, c_ids, char_table, p):
    w = p["w_emb"][w_ids]                                    # [B, L, w_emb]
    ch = char_table[c_ids]                                   # [B, L, C, c_hid]
    ch = jnp.max(ch, axis=2)                                 # [B, L, c_hid]
    x = jnp.concatenate([w, ch], axis=-1)
    x = linear(x, p["emb_proj"])                             # [B, L, H]
    for lyr in p["highway"]:
        x = highway_layer(x, lyr["w"], lyr["b"])
    return x


# ----------------------------------------------------------------------------
# Full DocQA forward (mirrors the PyTorch forward; drop_prob = 0 -> dropout is id)
# ----------------------------------------------------------------------------
def docqa_forward(params, cw_ids, cc_ids, qw_ids, qc_ids):
    c_mask = (cw_ids != 0)
    q_mask = (qw_ids != 0)
    cm_f = c_mask.astype(F32)
    qm_f = q_mask.astype(F32)

    emb_p = params["emb"]
    # one-time projected char table: [c_vocab, c_hid]
    char_table = linear(emb_p["c_emb"], emb_p["char_w"], emb_p["char_b"], act="relu")

    # --- self.bidaf(...) : embed -> encode -> BiDAF attention -> [B, Lc, 8H] ---
    c_emb = embed(cw_ids, cc_ids, char_table, emb_p)
    q_emb = embed(qw_ids, qc_ids, char_table, emb_p)
    c_enc0 = rnn_encoder(c_emb, cm_f, params["enc_rnn"])     # [B, Lc, 2H]
    q_enc0 = rnn_encoder(q_emb, qm_f, params["enc_rnn"])     # [B, Lq, 2H]
    c_att8 = bidaf_attention(c_enc0, q_enc0, c_mask, q_mask, params["bidaf_att"])

    c_att = linear(c_att8, params["bidaf_proj"])             # [B, Lc, H]
    c_enc = rnn_encoder(c_att, cm_f, params["mod_rnn"])      # [B, Lc, 2H]
    c_s_att8 = self_attention(c_enc, c_mask, params["self_att"])   # [B, Lc, 8H]
    c_s_att = linear(c_s_att8, params["self_att_proj"])      # [B, Lc, H]
    c_final = c_att + c_s_att

    start_enc = rnn_encoder(c_final, cm_f, params["start_rnn"])    # [B, Lc, 2H]
    end_input = jnp.concatenate([start_enc, c_final], axis=-1)     # [B, Lc, 3H]
    start_logits = logit_head(start_enc, params["start_w"], params["start_b"])  # [B, Lc, 1]
    end_enc = rnn_encoder(end_input, cm_f, params["end_rnn"])      # [B, Lc, 2H]
    end_logits = logit_head(end_enc, params["end_w"], params["end_b"])          # [B, Lc, 1]
    return start_logits, end_logits


# ----------------------------------------------------------------------------
# Deterministic parameter init
# ----------------------------------------------------------------------------
def init_params(key, *, w_vocab, w_emb_size, c_vocab, c_emb_size, H, c_hid=16):
    keys = list(jax.random.split(key, 64))
    it = iter(keys)

    def nrm(shape, scale=0.1):
        return jax.random.normal(next(it), shape, F32) * scale

    def lstm_params(din):
        s = 1.0 / (H ** 0.5)
        def u(shape):
            return jax.random.uniform(next(it), shape, F32, -s, s)
        return dict(wif=u((din, 4 * H)), whf=u((H, 4 * H)), bf=u((4 * H,)),
                    wib=u((din, 4 * H)), whb=u((H, 4 * H)), bb=u((4 * H,)))

    def att_params(D):
        return dict(wc=nrm((1, D)), wq=nrm((1, D)), wcq=nrm((1, D)),
                    bias=nrm((1, 1)))

    w_emb = nrm((w_vocab, w_emb_size)).at[0].set(0.0)   # "pretrained" embedding
    c_emb = nrm((c_vocab, c_emb_size)).at[0].set(0.0)

    emb = dict(
        w_emb=w_emb,
        c_emb=c_emb,
        char_w=nrm((c_emb_size, c_hid)),
        char_b=nrm((c_hid,)),
        emb_proj=nrm((w_emb_size + c_hid, H)),
        # fused highway weights: [H, 2H] = [gate | transform]
        highway=[dict(w=nrm((H, 2 * H)), b=nrm((2 * H,))) for _ in range(2)],
    )

    return dict(
        emb=emb,
        enc_rnn=[lstm_params(H)],
        bidaf_att=att_params(2 * H),
        bidaf_proj=nrm((8 * H, H)),
        mod_rnn=[lstm_params(H), lstm_params(2 * H)],
        self_att=att_params(2 * H),
        self_att_proj=nrm((8 * H, H)),
        start_rnn=[lstm_params(H)],
        start_w=nrm((2 * H, 1)), start_b=nrm((1,)),
        end_rnn=[lstm_params(3 * H)],
        end_w=nrm((2 * H, 1)), end_b=nrm((1,)),
    )


if __name__ == "__main__":
    B, Lc, Lq, C = 2, 16, 8, 4
    w_vocab, c_vocab = 50, 30
    w_emb_size, c_emb_size, H = 16, 8, 32

    params = init_params(jax.random.PRNGKey(0),
                         w_vocab=w_vocab, w_emb_size=w_emb_size,
                         c_vocab=c_vocab, c_emb_size=c_emb_size, H=H)

    k1, k2, k3, k4 = jax.random.split(jax.random.PRNGKey(0), 4)
    cw_ids = jax.random.randint(k1, (B, Lc), 1, w_vocab, dtype=jnp.int32)
    qw_ids = jax.random.randint(k2, (B, Lq), 1, w_vocab, dtype=jnp.int32)
    cc_ids = jax.random.randint(k3, (B, Lc, C), 1, c_vocab, dtype=jnp.int32)
    qc_ids = jax.random.randint(k4, (B, Lq, C), 1, c_vocab, dtype=jnp.int32)
    # introduce trailing padding (id 0) so masking / lengths are exercised
    cw_ids = cw_ids.at[0, 12:].set(0)
    cc_ids = cc_ids.at[0, 12:].set(0)
    qw_ids = qw_ids.at[1, 6:].set(0)
    qc_ids = qc_ids.at[1, 6:].set(0)

    fwd = jax.jit(docqa_forward)
    start_logits, end_logits = fwd(params, cw_ids, cc_ids, qw_ids, qc_ids)
    jax.block_until_ready((start_logits, end_logits))

    assert start_logits.shape == (B, Lc, 1), start_logits.shape
    assert end_logits.shape == (B, Lc, 1), end_logits.shape
    assert bool(jnp.all(jnp.isfinite(start_logits))) and bool(jnp.all(jnp.isfinite(end_logits)))
    print("KERNEL_OK")
</pallas_src>

<mosaic_0001>
module attributes {stable_mosaic.version = 11 : i64} {
  func.func @_linear_kernel(%arg0: i32, %arg1: memref<32x8xf32, #tpu.memory_space<vmem>>, %arg2: memref<8x16xf32, #tpu.memory_space<vmem>>, %arg3: memref<1x16xf32, #tpu.memory_space<vmem>>, %arg4: memref<32x16xf32, #tpu.memory_space<vmem>>) attributes {dimension_semantics = [#tpu.dimension_semantics<parallel>], iteration_bounds = array<i64: 1>, scalar_prefetch = 0 : i64, scratch_operands = 0 : i64, tpu.core_type = #tpu.core_type<tc>, window_params = [{transform_indices = @transform_0, window_bounds = array<i64: 32, 8>}, {pipeline_mode = #tpu.pipeline_mode<synchronous>, transform_indices = @transform_1, window_bounds = array<i64: 8, 16>}, {pipeline_mode = #tpu.pipeline_mode<synchronous>, transform_indices = @transform_2, window_bounds = array<i64: 1, 16>}, {transform_indices = @transform_3, window_bounds = array<i64: 32, 16>}]} {
    %c0 = arith.constant 0 : index
    %c0_0 = arith.constant 0 : index
    %0 = vector.load %arg1[%c0, %c0_0] : memref<32x8xf32, #tpu.memory_space<vmem>>, vector<32x8xf32>
    %1 = arith.truncf %0 : vector<32x8xf32> to vector<32x8xbf16>
    %c0_1 = arith.constant 0 : index
    %c0_2 = arith.constant 0 : index
    %2 = vector.load %arg2[%c0_1, %c0_2] : memref<8x16xf32, #tpu.memory_space<vmem>>, vector<8x16xf32>
    %3 = arith.truncf %2 : vector<8x16xf32> to vector<8x16xbf16>
    %cst = arith.constant dense<0.000000e+00> : vector<32x16xf32>
    %4 = tpu.matmul %1, %3, %cst {dimension_numbers = #tpu.dot_dimension_numbers<[1], [0], [0], [1], [0, 0, 1, 1], [], []>} : vector<32x8xbf16>, vector<8x16xbf16>, vector<32x16xf32> -> vector<32x16xf32>
    %c0_3 = arith.constant 0 : index
    %c0_4 = arith.constant 0 : index
    %5 = vector.load %arg3[%c0_3, %c0_4] : memref<1x16xf32, #tpu.memory_space<vmem>>, vector<1x16xf32>
    %6 = vector.broadcast %5 : vector<1x16xf32> to vector<32x16xf32>
    %7 = arith.addf %4, %6 : vector<32x16xf32>
    %cst_5 = arith.constant 0.000000e+00 : f32
    %8 = vector.broadcast %cst_5 : f32 to vector<32x16xf32>
    %9 = arith.maximumf %7, %8 : vector<32x16xf32>
    %c0_6 = arith.constant 0 : index
    %c0_7 = arith.constant 0 : index
    %10 = vector.load %arg4[%c0_6, %c0_7] : memref<32x16xf32, #tpu.memory_space<vmem>>, vector<32x16xf32>
    tpu.vector_store %arg4[%c0_6, %c0_7], %9 {strides = array<i32>} : memref<32x16xf32, #tpu.memory_space<vmem>>, vector<32x16xf32>,
    return
  }
  func.func @transform_0(%arg0: i32) -> (i32, i32) {
    %c0_i32 = arith.constant 0 : i32
    %c0_i32_0 = arith.constant 0 : i32
    return %arg0, %c0_i32 : i32, i32
  }
  func.func @transform_1(%arg0: i32) -> (i32, i32) {
    %c0_i32 = arith.constant 0 : i32
    %c0_i32_0 = arith.constant 0 : i32
    %c0_i32_1 = arith.constant 0 : i32
    return %c0_i32, %c0_i32_0 : i32, i32
  }
  func.func @transform_2(%arg0: i32) -> (i32, i32) {
    %c0_i32 = arith.constant 0 : i32
    %c0_i32_0 = arith.constant 0 : i32
    %c0_i32_1 = arith.constant 0 : i32
    return %c0_i32, %c0_i32_0 : i32, i32
  }
  func.func @transform_3(%arg0: i32) -> (i32, i32) {
    %c0_i32 = arith.constant 0 : i32
    %c0_i32_0 = arith.constant 0 : i32
    return %arg0, %c0_i32 : i32, i32
  }
}

module attributes {stable_mosaic.version = 11 : i64} {
  func.func @_linear_kernel(%arg0: i32, %arg1: memref<32x32xf32, #tpu.memory_space<vmem>>, %arg2: memref<32x32xf32, #tpu.memory_space<vmem>>, %arg3: memref<1x32xf32, #tpu.memory_space<vmem>>, %arg4: memref<32x32xf32, #tpu.memory_space<vmem>>) attributes {dimension_semantics = [#tpu.dimension_semantics<parallel>], iteration_bounds = array<i64: 1>, scalar_prefetch = 0 : i64, scratch_operands = 0 : i64, tpu.core_type = #tpu.core_type<tc>, window_params = [{transform_indices = @transform_0, window_bounds = array<i64: 32, 32>}, {pipeline_mode = #tpu.pipeline_mode<synchronous>, transform_indices = @transform_1, window_bounds = array<i64: 32, 32>}, {pipeline_mode = #tpu.pipeline_mode<synchronous>, transform_indices = @transform_2, window_bounds = array<i64: 1, 32>}, {transform_indices = @transform_3, window_bounds = array<i64: 32, 32>}]} {
    %c0 = arith.constant 0 : index
    %c0_0 = arith.constant 0 : index
    %0 = vector.load %arg1[%c0, %c0_0] : memref<32x32xf32, #tpu.memory_space<vmem>>, vector<32x32xf32>
    %1 = arith.truncf %0 : vector<32x32xf32> to vector<32x32xbf16>
    %c0_1 = arith.constant 0 : index
    %c0_2 = arith.constant 0 : index
    %2 = vector.load %arg2[%c0_1, %c0_2] : memref<32x32xf32, #tpu.memory_space<vmem>>, vector<32x32xf32>
    %3 = arith.truncf %2 : vector<32x32xf32> to vector<32x32xbf16>
    %cst = arith.constant dense<0.000000e+00> : vector<32x32xf32>
    %4 = tpu.matmul %1, %3, %cst {dimension_numbers = #tpu.dot_dimension_numbers<[1], [0], [0], [1], [0, 0, 1, 1], [], []>} : vector<32x32xbf16>, vector<32x32xbf16>, vector<32x32xf32> -> vector<32x32xf32>
    %c0_3 = arith.constant 0 : index
    %c0_4 = arith.constant 0 : index
    %5 = vector.load %arg3[%c0_3, %c0_4] : memref<1x32xf32, #tpu.memory_space<vmem>>, vector<1x32xf32>
    %6 = vector.broadcast %5 : vector<1x32xf32> to vector<32x32xf32>
    %7 = arith.addf %4, %6 : vector<32x32xf32>
    %c0_5 = arith.constant 0 : index
    %c0_6 = arith.constant 0 : index
    %8 = vector.load %arg4[%c0_5, %c0_6] : memref<32x32xf32, #tpu.memory_space<vmem>>, vector<32x32xf32>
    tpu.vector_store %arg4[%c0_5, %c0_6], %7 {strides = array<i32>} : memref<32x32xf32, #tpu.memory_space<vmem>>, vector<32x32xf32>,
    return
  }
  func.func @transform_0(%arg0: i32) -> (i32, i32) {
    %c0_i32 = arith.constant 0 : i32
    %c0_i32_0 = arith.constant 0 : i32
    return %arg0, %c0_i32 : i32, i32
  }
  func.func @transform_1(%arg0: i32) -> (i32, i32) {
    %c0_i32 = arith.constant 0 : i32
    %c0_i32_0 = arith.constant 0 : i32
    %c0_i32_1 = arith.constant 0 : i32
    return %c0_i32, %c0_i32_0 : i32, i32
  }
  func.func @transform_2(%arg0: i32) -> (i32, i32) {
    %c0_i32 = arith.constant 0 : i32
    %c0_i32_0 = arith.constant 0 : i32
    %c0_i32_1 = arith.constant 0 : i32
    return %c0_i32, %c0_i32_0 : i32, i32
  }
  func.func @transform_3(%arg0: i32) -> (i32, i32) {
    %c0_i32 = arith.constant 0 : i32
    %c0_i32_0 = arith.constant 0 : i32
    return %arg0, %c0_i32 : i32, i32
  }
}

module attributes {stable_mosaic.version = 11 : i64} {
  func.func @_highway_kernel(%arg0: i32, %arg1: memref<32x32xf32, #tpu.memory_space<vmem>>, %arg2: memref<32x64xf32, #tpu.memory_space<vmem>>, %arg3: memref<1x64xf32, #tpu.memory_space<vmem>>, %arg4: memref<32x32xf32, #tpu.memory_space<vmem>>) attributes {dimension_semantics = [#tpu.dimension_semantics<parallel>], iteration_bounds = array<i64: 1>, scalar_prefetch = 0 : i64, scratch_operands = 0 : i64, tpu.core_type = #tpu.core_type<tc>, window_params = [{transform_indices = @transform_0, window_bounds = array<i64: 32, 32>}, {pipeline_mode = #tpu.pipeline_mode<synchronous>, transform_indices = @transform_1, window_bounds = array<i64: 32, 64>}, {pipeline_mode = #tpu.pipeline_mode<synchronous>, transform_indices = @transform_2, window_bounds = array<i64: 1, 64>}, {transform_indices = @transform_3, window_bounds = array<i64: 32, 32>}]} {
    %c0 = arith.constant 0 : index
    %c0_0 = arith.constant 0 : index
    %0 = vector.load %arg1[%c0, %c0_0] : memref<32x32xf32, #tpu.memory_space<vmem>>, vector<32x32xf32>
    %1 = arith.truncf %0 : vector<32x32xf32> to vector<32x32xbf16>
    %c0_1 = arith.constant 0 : index
    %c0_2 = arith.constant 0 : index
    %2 = vector.load %arg2[%c0_1, %c0_2] : memref<32x64xf32, #tpu.memory_space<vmem>>, vector<32x64xf32>
    %3 = arith.truncf %2 : vector<32x64xf32> to vector<32x64xbf16>
    %cst = arith.constant dense<0.000000e+00> : vector<32x64xf32>
    %4 = tpu.matmul %1, %3, %cst {dimension_numbers = #tpu.dot_dimension_numbers<[1], [0], [0], [1], [0, 0, 1, 1], [], []>} : vector<32x32xbf16>, vector<32x64xbf16>, vector<32x64xf32> -> vector<32x64xf32>
    %c0_3 = arith.constant 0 : index
    %c0_4 = arith.constant 0 : index
    %5 = vector.load %arg3[%c0_3, %c0_4] : memref<1x64xf32, #tpu.memory_space<vmem>>, vector<1x64xf32>
    %6 = vector.broadcast %5 : vector<1x64xf32> to vector<32x64xf32>
    %7 = arith.addf %4, %6 : vector<32x64xf32>
    %8 = vector.extract_strided_slice %7 {offsets = [0, 0], sizes = [32, 32], strides = [1, 1]} : vector<32x64xf32> to vector<32x32xf32>
    %9 = arith.negf %8 : vector<32x32xf32>
    %10 = math.exp %9 : vector<32x32xf32>
    %cst_5 = arith.constant 1.000000e+00 : f32
    %11 = vector.broadcast %cst_5 : f32 to vector<32x32xf32>
    %12 = arith.addf %11, %10 : vector<32x32xf32>
    %13 = arith.divf %11, %12 : vector<32x32xf32>
    %14 = vector.extract_strided_slice %7 {offsets = [0, 32], sizes = [32, 32], strides = [1, 1]} : vector<32x64xf32> to vector<32x32xf32>
    %cst_6 = arith.constant 0.000000e+00 : f32
    %15 = vector.broadcast %cst_6 : f32 to vector<32x32xf32>
    %16 = arith.maximumf %14, %15 : vector<32x32xf32>
    %17 = arith.mulf %13, %16 : vector<32x32xf32>
    %cst_7 = arith.constant 1.000000e+00 : f32
    %18 = vector.broadcast %cst_7 : f32 to vector<32x32xf32>
    %19 = arith.subf %18, %13 : vector<32x32xf32>
    %20 = arith.mulf %19, %0 : vector<32x32xf32>
    %21 = arith.addf %17, %20 : vector<32x32xf32>
    %c0_8 = arith.constant 0 : index
    %c0_9 = arith.constant 0 : index
    %22 = vector.load %arg4[%c0_8, %c0_9] : memref<32x32xf32, #tpu.memory_space<vmem>>, vector<32x32xf32>
    tpu.vector_store %arg4[%c0_8, %c0_9], %21 {strides = array<i32>} : memref<32x32xf32, #tpu.memory_space<vmem>>, vector<32x32xf32>,
    return
  }
  func.func @transform_0(%arg0: i32) -> (i32, i32) {
    %c0_i32 = arith.constant 0 : i32
    %c0_i32_0 = arith.constant 0 : i32
    return %arg0, %c0_i32 : i32, i32
  }
  func.func @transform_1(%arg0: i32) -> (i32, i32) {
    %c0_i32 = arith.constant 0 : i32
    %c0_i32_0 = arith.constant 0 : i32
    %c0_i32_1 = arith.constant 0 : i32
    return %c0_i32, %c0_i32_0 : i32, i32
  }
  func.func @transform_2(%arg0: i32) -> (i32, i32) {
    %c0_i32 = arith.constant 0 : i32
    %c0_i32_0 = arith.constant 0 : i32
    %c0_i32_1 = arith.constant 0 : i32
    return %c0_i32, %c0_i32_0 : i32, i32
  }
  func.func @transform_3(%arg0: i32) -> (i32, i32) {
    %c0_i32 = arith.constant 0 : i32
    %c0_i32_0 = arith.constant 0 : i32
    return %arg0, %c0_i32 : i32, i32
  }
}

module attributes {stable_mosaic.version = 11 : i64} {
  func.func @_linear_kernel(%arg0: i32, %arg1: memref<32x32xf32, #tpu.memory_space<vmem>>, %arg2: memref<32x128xf32, #tpu.memory_space<vmem>>, %arg3: memref<1x128xf32, #tpu.memory_space<vmem>>, %arg4: memref<32x128xf32, #tpu.memory_space<vmem>>) attributes {dimension_semantics = [#tpu.dimension_semantics<parallel>], iteration_bounds = array<i64: 1>, scalar_prefetch = 0 : i64, scratch_operands = 0 : i64, tpu.core_type = #tpu.core_type<tc>, window_params = [{transform_indices = @transform_0, window_bounds = array<i64: 32, 32>}, {pipeline_mode = #tpu.pipeline_mode<synchronous>, transform_indices = @transform_1, window_bounds = array<i64: 32, 128>}, {pipeline_mode = #tpu.pipeline_mode<synchronous>, transform_indices = @transform_2, window_bounds = array<i64: 1, 128>}, {transform_indices = @transform_3, window_bounds = array<i64: 32, 128>}]} {
    %c0 = arith.constant 0 : index
    %c0_0 = arith.constant 0 : index
    %0 = vector.load %arg1[%c0, %c0_0] : memref<32x32xf32, #tpu.memory_space<vmem>>, vector<32x32xf32>
    %1 = arith.truncf %0 : vector<32x32xf32> to vector<32x32xbf16>
    %c0_1 = arith.constant 0 : index
    %c0_2 = arith.constant 0 : index
    %2 = vector.load %arg2[%c0_1, %c0_2] : memref<32x128xf32, #tpu.memory_space<vmem>>, vector<32x128xf32>
    %3 = arith.truncf %2 : vector<32x128xf32> to vector<32x128xbf16>
    %cst = arith.constant dense<0.000000e+00> : vector<32x128xf32>
    %4 = tpu.matmul %1, %3, %cst {dimension_numbers = #tpu.dot_dimension_numbers<[1], [0], [0], [1], [0, 0, 1, 1], [], []>} : vector<32x32xbf16>, vector<32x128xbf16>, vector<32x128xf32> -> vector<32x128xf32>
    %c0_3 = arith.constant 0 : index
    %c0_4 = arith.constant 0 : index
    %5 = vector.load %arg3[%c0_3, %c0_4] : memref<1x128xf32, #tpu.memory_space<vmem>>, vector<1x128xf32>
    %6 = vector.broadcast %5 : vector<1x128xf32> to vector<32x128xf32>
    %7 = arith.addf %4, %6 : vector<32x128xf32>
    %c0_5 = arith.constant 0 : index
    %c0_6 = arith.constant 0 : index
    %8 = vector.load %arg4[%c0_5, %c0_6] : memref<32x128xf32, #tpu.memory_space<vmem>>, vector<32x128xf32>
    tpu.vector_store %arg4[%c0_5, %c0_6], %7 {strides = array<i32>} : memref<32x128xf32, #tpu.memory_space<vmem>>, vector<32x128xf32>,
    return
  }
  func.func @transform_0(%arg0: i32) -> (i32, i32) {
    %c0_i32 = arith.constant 0 : i32
    %c0_i32_0 = arith.constant 0 : i32
    return %arg0, %c0_i32 : i32, i32
  }
  func.func @transform_1(%arg0: i32) -> (i32, i32) {
    %c0_i32 = arith.constant 0 : i32
    %c0_i32_0 = arith.constant 0 : i32
    %c0_i32_1 = arith.constant 0 : i32
    return %c0_i32, %c0_i32_0 : i32, i32
  }
  func.func @transform_2(%arg0: i32) -> (i32, i32) {
    %c0_i32 = arith.constant 0 : i32
    %c0_i32_0 = arith.constant 0 : i32
    %c0_i32_1 = arith.constant 0 : i32
    return %c0_i32, %c0_i32_0 : i32, i32
  }
  func.func @transform_3(%arg0: i32) -> (i32, i32) {
    %c0_i32 = arith.constant 0 : i32
    %c0_i32_0 = arith.constant 0 : i32
    return %arg0, %c0_i32 : i32, i32
  }
}

module attributes {stable_mosaic.version = 11 : i64} {
  func.func @_bilstm_kernel(%arg0: i32, %arg1: memref<16x2x128xf32, #tpu.memory_space<vmem>>, %arg2: memref<16x2x128xf32, #tpu.memory_space<vmem>>, %arg3: memref<16x2x1xf32, #tpu.memory_space<vmem>>, %arg4: memref<32x128xf32, #tpu.memory_space<vmem>>, %arg5: memref<32x128xf32, #tpu.memory_space<vmem>>, %arg6: memref<16x2x32xf32, #tpu.memory_space<vmem>>, %arg7: memref<16x2x32xf32, #tpu.memory_space<vmem>>) attributes {dimension_semantics = [#tpu.dimension_semantics<arbitrary>], iteration_bounds = array<i64: 1>, scalar_prefetch = 0 : i64, scratch_operands = 0 : i64, tpu.core_type = #tpu.core_type<tc>, window_params = [{pipeline_mode = #tpu.pipeline_mode<synchronous>, transform_indices = @transform_0, window_bounds = array<i64: 16, 2, 128>}, {pipeline_mode = #tpu.pipeline_mode<synchronous>, transform_indices = @transform_1, window_bounds = array<i64: 16, 2, 128>}, {pipeline_mode = #tpu.pipeline_mode<synchronous>, transform_indices = @transform_2, window_bounds = array<i64: 16, 2, 1>}, {pipeline_mode = #tpu.pipeline_mode<synchronous>, transform_indices = @transform_3, window_bounds = array<i64: 32, 128>}, {pipeline_mode = #tpu.pipeline_mode<synchronous>, transform_indices = @transform_4, window_bounds = array<i64: 32, 128>}, {pipeline_mode = #tpu.pipeline_mode<synchronous>, transform_indices = @transform_5, window_bounds = array<i64: 16, 2, 32>}, {pipeline_mode = #tpu.pipeline_mode<synchronous>, transform_indices = @transform_6, window_bounds = array<i64: 16, 2, 32>}]} {
    %cst = arith.constant 0.000000e+00 : f32
    %0 = vector.broadcast %cst : f32 to vector<2x32xf32>
    %c0_i32 = arith.constant 0 : i32
    %c16_i32 = arith.constant 16 : i32
    %1 = arith.addi %c0_i32, %c16_i32 : i32
    %c1_i32 = arith.constant 1 : i32
    %2:4 = scf.for %arg8 = %c0_i32 to %1 step %c1_i32 iter_args(%arg9 = %0, %arg10 = %0, %arg11 = %0, %arg12 = %0) -> (vector<2x32xf32>, vector<2x32xf32>, vector<2x32xf32>, vector<2x32xf32>)  : i32 {
      %c15_i32 = arith.constant 15 : i32
      %3 = arith.subi %c15_i32, %arg8 : i32
      %4 = arith.index_cast %arg8 : i32 to index
      %c0 = arith.constant 0 : index
      %c0_1 = arith.constant 0 : index
      %5 = vector.load %arg3[%4, %c0, %c0_1] : memref<16x2x1xf32, #tpu.memory_space<vmem>>, vector<1x2x1xf32>
      %6 = vector.shape_cast %5 : vector<1x2x1xf32> to vector<2x1xf32>
      %7 = arith.index_cast %3 : i32 to index
      %c0_2 = arith.constant 0 : index
      %c0_3 = arith.constant 0 : index
      %8 = vector.load %arg3[%7, %c0_2, %c0_3] : memref<16x2x1xf32, #tpu.memory_space<vmem>>, vector<1x2x1xf32>
      %9 = vector.shape_cast %8 : vector<1x2x1xf32> to vector<2x1xf32>
      %10 = arith.index_cast %arg8 : i32 to index
      %c0_4 = arith.constant 0 : index
      %c0_5 = arith.constant 0 : index
      %11 = vector.load %arg1[%10, %c0_4, %c0_5] : memref<16x2x128xf32, #tpu.memory_space<vmem>>, vector<1x2x128xf32>
      %12 = vector.shape_cast %11 : vector<1x2x128xf32> to vector<2x128xf32>
      %13 = arith.index_cast %3 : i32 to index
      %c0_6 = arith.constant 0 : index
      %c0_7 = arith.constant 0 : index
      %14 = vector.load %arg2[%13, %c0_6, %c0_7] : memref<16x2x128xf32, #tpu.memory_space<vmem>>, vector<1x2x128xf32>
      %15 = vector.shape_cast %14 : vector<1x2x128xf32> to vector<2x128xf32>
      %c0_8 = arith.constant 0 : index
      %c0_9 = arith.constant 0 : index
      %16 = vector.load %arg4[%c0_8, %c0_9] : memref<32x128xf32, #tpu.memory_space<vmem>>, vector<32x128xf32>
      %cst_10 = arith.constant dense<0.000000e+00> : vector<2x128xf32>
      %17 = tpu.matmul %arg9, %16, %cst_10 {dimension_numbers = #tpu.dot_dimension_numbers<[1], [0], [0], [1], [0, 0, 1, 1], [], []>} : vector<2x32xf32>, vector<32x128xf32>, vector<2x128xf32> -> vector<2x128xf32>
      %18 = arith.addf %12, %17 : vector<2x128xf32>
      %19 = vector.extract_strided_slice %18 {offsets = [0, 0], sizes = [2, 32], strides = [1, 1]} : vector<2x128xf32> to vector<2x32xf32>
      %20 = arith.negf %19 : vector<2x32xf32>
      %21 = math.exp %20 : vector<2x32xf32>
      %cst_11 = arith.constant 1.000000e+00 : f32
      %22 = vector.broadcast %cst_11 : f32 to vector<2x32xf32>
      %23 = arith.addf %22, %21 : vector<2x32xf32>
      %24 = arith.divf %22, %23 : vector<2x32xf32>
      %25 = vector.extract_strided_slice %18 {offsets = [0, 32], sizes = [2, 32], strides = [1, 1]} : vector<2x128xf32> to vector<2x32xf32>
      %26 = arith.negf %25 : vector<2x32xf32>
      %27 = math.exp %26 : vector<2x32xf32>
      %cst_12 = arith.constant 1.000000e+00 : f32
      %28 = vector.broadcast %cst_12 : f32 to vector<2x32xf32>
      %29 = arith.addf %28, %27 : vector<2x32xf32>
      %30 = arith.divf %28, %29 : vector<2x32xf32>
      %31 = vector.extract_strided_slice %18 {offsets = [0, 64], sizes = [2, 32], strides = [1, 1]} : vector<2x128xf32> to vector<2x32xf32>
      %32 = math.tanh %31 : vector<2x32xf32>
      %33 = vector.extract_strided_slice %18 {offsets = [0, 96], sizes = [2, 32], strides = [1, 1]} : vector<2x128xf32> to vector<2x32xf32>
      %34 = arith.negf %33 : vector<2x32xf32>
      %35 = math.exp %34 : vector<2x32xf32>
      %cst_13 = arith.constant 1.000000e+00 : f32
      %36 = vector.broadcast %cst_13 : f32 to vector<2x32xf32>
      %37 = arith.addf %36, %35 : vector<2x32xf32>
      %38 = arith.divf %36, %37 : vector<2x32xf32>
      %39 = arith.mulf %30, %arg10 : vector<2x32xf32>
      %40 = arith.mulf %24, %32 : vector<2x32xf32>
      %41 = arith.addf %39, %40 : vector<2x32xf32>
      %42 = math.tanh %41 : vector<2x32xf32>
      %43 = arith.mulf %38, %42 : vector<2x32xf32>
      %c0_14 = arith.constant 0 : index
      %c0_15 = arith.constant 0 : index
      %44 = vector.load %arg5[%c0_14, %c0_15] : memref<32x128xf32, #tpu.memory_space<vmem>>, vector<32x128xf32>
      %cst_16 = arith.constant dense<0.000000e+00> : vector<2x128xf32>
      %45 = tpu.matmul %arg11, %44, %cst_16 {dimension_numbers = #tpu.dot_dimension_numbers<[1], [0], [0], [1], [0, 0, 1, 1], [], []>} : vector<2x32xf32>, vector<32x128xf32>, vector<2x128xf32> -> vector<2x128xf32>
      %46 = arith.addf %15, %45 : vector<2x128xf32>
      %47 = vector.extract_strided_slice %46 {offsets = [0, 0], sizes = [2, 32], strides = [1, 1]} : vector<2x128xf32> to vector<2x32xf32>
      %48 = arith.negf %47 : vector<2x32xf32>
      %49 = math.exp %48 : vector<2x32xf32>
      %cst_17 = arith.constant 1.000000e+00 : f32
      %50 = vector.broadcast %cst_17 : f32 to vector<2x32xf32>
      %51 = arith.addf %50, %49 : vector<2x32xf32>
      %52 = arith.divf %50, %51 : vector<2x32xf32>
      %53 = vector.extract_strided_slice %46 {offsets = [0, 32], sizes = [2, 32], strides = [1, 1]} : vector<2x128xf32> to vector<2x32xf32>
      %54 = arith.negf %53 : vector<2x32xf32>
      %55 = math.exp %54 : vector<2x32xf32>
      %cst_18 = arith.constant 1.000000e+00 : f32
      %56 = vector.broadcast %cst_18 : f32 to vector<2x32xf32>
      %57 = arith.addf %56, %55 : vector<2x32xf32>
      %58 = arith.divf %56, %57 : vector<2x32xf32>
      %59 = vector.extract_strided_slice %46 {offsets = [0, 64], sizes = [2, 32], strides = [1, 1]} : vector<2x128xf32> to vector<2x32xf32>
      %60 = math.tanh %59 : vector<2x32xf32>
      %61 = vector.extract_strided_slice %46 {offsets = [0, 96], sizes = [2, 32], strides = [1, 1]} : vector<2x128xf32> to vector<2x32xf32>
      %62 = arith.negf %61 : vector<2x32xf32>
      %63 = math.exp %62 : vector<2x32xf32>
      %cst_19 = arith.constant 1.000000e+00 : f32
      %64 = vector.broadcast %cst_19 : f32 to vector<2x32xf32>
      %65 = arith.addf %64, %63 : vector<2x32xf32>
      %66 = arith.divf %64, %65 : vector<2x32xf32>
      %67 = arith.mulf %58, %arg12 : vector<2x32xf32>
      %68 = arith.mulf %52, %60 : vector<2x32xf32>
      %69 = arith.addf %67, %68 : vector<2x32xf32>
      %70 = math.tanh %69 : vector<2x32xf32>
      %71 = arith.mulf %66, %70 : vector<2x32xf32>
      %72 = vector.broadcast %6 : vector<2x1xf32> to vector<2x32xf32>
      %73 = arith.mulf %72, %43 : vector<2x32xf32>
      %cst_20 = arith.constant 1.000000e+00 : f32
      %74 = vector.broadcast %cst_20 : f32 to vector<2x1xf32>
      %75 = arith.subf %74, %6 : vector<2x1xf32>
      %76 = vector.broadcast %75 : vector<2x1xf32> to vector<2x32xf32>
      %77 = arith.mulf %76, %arg9 : vector<2x32xf32>
      %78 = arith.addf %73, %77 : vector<2x32xf32>
      %79 = vector.broadcast %6 : vector<2x1xf32> to vector<2x32xf32>
      %80 = arith.mulf %79, %41 : vector<2x32xf32>
      %cst_21 = arith.constant 1.000000e+00 : f32
      %81 = vector.broadcast %cst_21 : f32 to vector<2x1xf32>
      %82 = arith.subf %81, %6 : vector<2x1xf32>
      %83 = vector.broadcast %82 : vector<2x1xf32> to vector<2x32xf32>
      %84 = arith.mulf %83, %arg10 : vector<2x32xf32>
      %85 = arith.addf %80, %84 : vector<2x32xf32>
      %86 = vector.broadcast %9 : vector<2x1xf32> to vector<2x32xf32>
      %87 = arith.mulf %86, %71 : vector<2x32xf32>
      %cst_22 = arith.constant 1.000000e+00 : f32
      %88 = vector.broadcast %cst_22 : f32 to vector<2x1xf32>
      %89 = arith.subf %88, %9 : vector<2x1xf32>
      %90 = vector.broadcast %89 : vector<2x1xf32> to vector<2x32xf32>
      %91 = arith.mulf %90, %arg11 : vector<2x32xf32>
      %92 = arith.addf %87, %91 : vector<2x32xf32>
      %93 = vector.broadcast %9 : vector<2x1xf32> to vector<2x32xf32>
      %94 = arith.mulf %93, %69 : vector<2x32xf32>
      %cst_23 = arith.constant 1.000000e+00 : f32
      %95 = vector.broadcast %cst_23 : f32 to vector<2x1xf32>
      %96 = arith.subf %95, %9 : vector<2x1xf32>
      %97 = vector.broadcast %96 : vector<2x1xf32> to vector<2x32xf32>
      %98 = arith.mulf %97, %arg12 : vector<2x32xf32>
      %99 = arith.addf %94, %98 : vector<2x32xf32>
      %100 = vector.broadcast %6 : vector<2x1xf32> to vector<2x32xf32>
      %101 = arith.mulf %100, %43 : vector<2x32xf32>
      %102 = vector.shape_cast %101 : vector<2x32xf32> to vector<1x2x32xf32>
      %103 = arith.index_cast %arg8 : i32 to index
      %c0_24 = arith.constant 0 : index
      %c0_25 = arith.constant 0 : index
      %104 = vector.load %arg6[%103, %c0_24, %c0_25] : memref<16x2x32xf32, #tpu.memory_space<vmem>>, vector<1x2x32xf32>
      tpu.vector_store %arg6[%103, %c0_24, %c0_25], %102 {strides = array<i32>} : memref<16x2x32xf32, #tpu.memory_space<vmem>>, vector<1x2x32xf32>,
      %105 = vector.broadcast %9 : vector<2x1xf32> to vector<2x32xf32>
      %106 = arith.mulf %105, %71 : vector<2x32xf32>
      %107 = vector.shape_cast %106 : vector<2x32xf32> to vector<1x2x32xf32>
      %108 = arith.index_cast %3 : i32 to index
      %c0_26 = arith.constant 0 : index
      %c0_27 = arith.constant 0 : index
      %109 = vector.load %arg7[%108, %c0_26, %c0_27] : memref<16x2x32xf32, #tpu.memory_space<vmem>>, vector<1x2x32xf32>
      tpu.vector_store %arg7[%108, %c0_26, %c0_27], %107 {strides = array<i32>} : memref<16x2x32xf32, #tpu.memory_space<vmem>>, vector<1x2x32xf32>,
      scf.yield %78, %85, %92, %99 : vector<2x32xf32>, vector<2x32xf32>, vector<2x32xf32>, vector<2x32xf32>
    }
    %c16_i32_0 = arith.constant 16 : i32
    return
  }
  func.func @transform_0(%arg0: i32) -> (i32, i32, i32) {
    %c0_i32 = arith.constant 0 : i32
    %c0_i32_0 = arith.constant 0 : i32
    %c0_i32_1 = arith.constant 0 : i32
    %c0_i32_2 = arith.constant 0 : i32
    return %c0_i32, %c0_i32_0, %c0_i32_1 : i32, i32, i32
  }
  func.func @transform_1(%arg0: i32) -> (i32, i32, i32) {
    %c0_i32 = arith.constant 0 : i32
    %c0_i32_0 = arith.constant 0 : i32
    %c0_i32_1 = arith.constant 0 : i32
    %c0_i32_2 = arith.constant 0 : i32
    return %c0_i32, %c0_i32_0, %c0_i32_1 : i32, i32, i32
  }
  func.func @transform_2(%arg0: i32) -> (i32, i32, i32) {
    %c0_i32 = arith.constant 0 : i32
    %c0_i32_0 = arith.constant 0 : i32
    %c0_i32_1 = arith.constant 0 : i32
    %c0_i32_2 = arith.constant 0 : i32
    return %c0_i32, %c0_i32_0, %c0_i32_1 : i32, i32, i32
  }
  func.func @transform_3(%arg0: i32) -> (i32, i32) {
    %c0_i32 = arith.constant 0 : i32
    %c0_i32_0 = arith.constant 0 : i32
    %c0_i32_1 = arith.constant 0 : i32
    return %c0_i32, %c0_i32_0 : i32, i32
  }
  func.func @transform_4(%arg0: i32) -> (i32, i32) {
    %c0_i32 = arith.constant 0 : i32
    %c0_i32_0 = arith.constant 0 : i32
    %c0_i32_1 = arith.constant 0 : i32
    return %c0_i32, %c0_i32_0 : i32, i32
  }
  func.func @transform_5(%arg0: i32) -> (i32, i32, i32) {
    %c0_i32 = arith.constant 0 : i32
    %c0_i32_0 = arith.constant 0 : i32
    %c0_i32_1 = arith.constant 0 : i32
    %c0_i32_2 = arith.constant 0 : i32
    return %c0_i32, %c0_i32_0, %c0_i32_1 : i32, i32, i32
  }
  func.func @transform_6(%arg0: i32) -> (i32, i32, i32) {
    %c0_i32 = arith.constant 0 : i32
    %c0_i32_0 = arith.constant 0 : i32
    %c0_i32_1 = arith.constant 0 : i32
    %c0_i32_2 = arith.constant 0 : i32
    return %c0_i32, %c0_i32_0, %c0_i32_1 : i32, i32, i32
  }
}

module attributes {stable_mosaic.version = 11 : i64} {
  func.func @_linear_kernel(%arg0: i32, %arg1: memref<16x32xf32, #tpu.memory_space<vmem>>, %arg2: memref<32x32xf32, #tpu.memory_space<vmem>>, %arg3: memref<1x32xf32, #tpu.memory_space<vmem>>, %arg4: memref<16x32xf32, #tpu.memory_space<vmem>>) attributes {dimension_semantics = [#tpu.dimension_semantics<parallel>], iteration_bounds = array<i64: 1>, scalar_prefetch = 0 : i64, scratch_operands = 0 : i64, tpu.core_type = #tpu.core_type<tc>, window_params = [{transform_indices = @transform_0, window_bounds = array<i64: 16, 32>}, {pipeline_mode = #tpu.pipeline_mode<synchronous>, transform_indices = @transform_1, window_bounds = array<i64: 32, 32>}, {pipeline_mode = #tpu.pipeline_mode<synchronous>, transform_indices = @transform_2, window_bounds = array<i64: 1, 32>}, {transform_indices = @transform_3, window_bounds = array<i64: 16, 32>}]} {
    %c0 = arith.constant 0 : index
    %c0_0 = arith.constant 0 : index
    %0 = vector.load %arg1[%c0, %c0_0] : memref<16x32xf32, #tpu.memory_space<vmem>>, vector<16x32xf32>
    %1 = arith.truncf %0 : vector<16x32xf32> to vector<16x32xbf16>
    %c0_1 = arith.constant 0 : index
    %c0_2 = arith.constant 0 : index
    %2 = vector.load %arg2[%c0_1, %c0_2] : memref<32x32xf32, #tpu.memory_space<vmem>>, vector<32x32xf32>
    %3 = arith.truncf %2 : vector<32x32xf32> to vector<32x32xbf16>
    %cst = arith.constant dense<0.000000e+00> : vector<16x32xf32>
    %4 = tpu.matmul %1, %3, %cst {dimension_numbers = #tpu.dot_dimension_numbers<[1], [0], [0], [1], [0, 0, 1, 1], [], []>} : vector<16x32xbf16>, vector<32x32xbf16>, vector<16x32xf32> -> vector<16x32xf32>
    %c0_3 = arith.constant 0 : index
    %c0_4 = arith.constant 0 : index
    %5 = vector.load %arg3[%c0_3, %c0_4] : memref<1x32xf32, #tpu.memory_space<vmem>>, vector<1x32xf32>
    %6 = vector.broadcast %5 : vector<1x32xf32> to vector<16x32xf32>
    %7 = arith.addf %4, %6 : vector<16x32xf32>
    %c0_5 = arith.constant 0 : index
    %c0_6 = arith.constant 0 : index
    %8 = vector.load %arg4[%c0_5, %c0_6] : memref<16x32xf32, #tpu.memory_space<vmem>>, vector<16x32xf32>
    tpu.vector_store %arg4[%c0_5, %c0_6], %7 {strides = array<i32>} : memref<16x32xf32, #tpu.memory_space<vmem>>, vector<16x32xf32>,
    return
  }
  func.func @transform_0(%arg0: i32) -> (i32, i32) {
    %c0_i32 = arith.constant 0 : i32
    %c0_i32_0 = arith.constant 0 : i32
    return %arg0, %c0_i32 : i32, i32
  }
  func.func @transform_1(%arg0: i32) -> (i32, i32) {
    %c0_i32 = arith.constant 0 : i32
    %c0_i32_0 = arith.constant 0 : i32
    %c0_i32_1 = arith.constant 0 : i32
    return %c0_i32, %c0_i32_0 : i32, i32
  }
  func.func @transform_2(%arg0: i32) -> (i32, i32) {
    %c0_i32 = arith.constant 0 : i32
    %c0_i32_0 = arith.constant 0 : i32
    %c0_i32_1 = arith.constant 0 : i32
    return %c0_i32, %c0_i32_0 : i32, i32
  }
  func.func @transform_3(%arg0: i32) -> (i32, i32) {
    %c0_i32 = arith.constant 0 : i32
    %c0_i32_0 = arith.constant 0 : i32
    return %arg0, %c0_i32 : i32, i32
  }
}

module attributes {stable_mosaic.version = 11 : i64} {
  func.func @_highway_kernel(%arg0: i32, %arg1: memref<16x32xf32, #tpu.memory_space<vmem>>, %arg2: memref<32x64xf32, #tpu.memory_space<vmem>>, %arg3: memref<1x64xf32, #tpu.memory_space<vmem>>, %arg4: memref<16x32xf32, #tpu.memory_space<vmem>>) attributes {dimension_semantics = [#tpu.dimension_semantics<parallel>], iteration_bounds = array<i64: 1>, scalar_prefetch = 0 : i64, scratch_operands = 0 : i64, tpu.core_type = #tpu.core_type<tc>, window_params = [{transform_indices = @transform_0, window_bounds = array<i64: 16, 32>}, {pipeline_mode = #tpu.pipeline_mode<synchronous>, transform_indices = @transform_1, window_bounds = array<i64: 32, 64>}, {pipeline_mode = #tpu.pipeline_mode<synchronous>, transform_indices = @transform_2, window_bounds = array<i64: 1, 64>}, {transform_indices = @transform_3, window_bounds = array<i64: 16, 32>}]} {
    %c0 = arith.constant 0 : index
    %c0_0 = arith.constant 0 : index
    %0 = vector.load %arg1[%c0, %c0_0] : memref<16x32xf32, #tpu.memory_space<vmem>>, vector<16x32xf32>
    %1 = arith.truncf %0 : vector<16x32xf32> to vector<16x32xbf16>
    %c0_1 = arith.constant 0 : index
    %c0_2 = arith.constant 0 : index
    %2 = vector.load %arg2[%c0_1, %c0_2] : memref<32x64xf32, #tpu.memory_space<vmem>>, vector<32x64xf32>
    %3 = arith.truncf %2 : vector<32x64xf32> to vector<32x64xbf16>
    %cst = arith.constant dense<0.000000e+00> : vector<16x64xf32>
    %4 = tpu.matmul %1, %3, %cst {dimension_numbers = #tpu.dot_dimension_numbers<[1], [0], [0], [1], [0, 0, 1, 1], [], []>} : vector<16x32xbf16>, vector<32x64xbf16>, vector<16x64xf32> -> vector<16x64xf32>
    %c0_3 = arith.constant 0 : index
    %c0_4 = arith.constant 0 : index
    %5 = vector.load %arg3[%c0_3, %c0_4] : memref<1x64xf32, #tpu.memory_space<vmem>>, vector<1x64xf32>
    %6 = vector.broadcast %5 : vector<1x64xf32> to vector<16x64xf32>
    %7 = arith.addf %4, %6 : vector<16x64xf32>
    %8 = vector.extract_strided_slice %7 {offsets = [0, 0], sizes = [16, 32], strides = [1, 1]} : vector<16x64xf32> to vector<16x32xf32>
    %9 = arith.negf %8 : vector<16x32xf32>
    %10 = math.exp %9 : vector<16x32xf32>
    %cst_5 = arith.constant 1.000000e+00 : f32
    %11 = vector.broadcast %cst_5 : f32 to vector<16x32xf32>
    %12 = arith.addf %11, %10 : vector<16x32xf32>
    %13 = arith.divf %11, %12 : vector<16x32xf32>
    %14 = vector.extract_strided_slice %7 {offsets = [0, 32], sizes = [16, 32], strides = [1, 1]} : vector<16x64xf32> to vector<16x32xf32>
    %cst_6 = arith.constant 0.000000e+00 : f32
    %15 = vector.broadcast %cst_6 : f32 to vector<16x32xf32>
    %16 = arith.maximumf %14, %15 : vector<16x32xf32>
    %17 = arith.mulf %13, %16 : vector<16x32xf32>
    %cst_7 = arith.constant 1.000000e+00 : f32
    %18 = vector.broadcast %cst_7 : f32 to vector<16x32xf32>
    %19 = arith.subf %18, %13 : vector<16x32xf32>
    %20 = arith.mulf %19, %0 : vector<16x32xf32>
    %21 = arith.addf %17, %20 : vector<16x32xf32>
    %c0_8 = arith.constant 0 : index
    %c0_9 = arith.constant 0 : index
    %22 = vector.load %arg4[%c0_8, %c0_9] : memref<16x32xf32, #tpu.memory_space<vmem>>, vector<16x32xf32>
    tpu.vector_store %arg4[%c0_8, %c0_9], %21 {strides = array<i32>} : memref<16x32xf32, #tpu.memory_space<vmem>>, vector<16x32xf32>,
    return
  }
  func.func @transform_0(%arg0: i32) -> (i32, i32) {
    %c0_i32 = arith.constant 0 : i32
    %c0_i32_0 = arith.constant 0 : i32
    return %arg0, %c0_i32 : i32, i32
  }
  func.func @transform_1(%arg0: i32) -> (i32, i32) {
    %c0_i32 = arith.constant 0 : i32
    %c0_i32_0 = arith.constant 0 : i32
    %c0_i32_1 = arith.constant 0 : i32
    return %c0_i32, %c0_i32_0 : i32, i32
  }
  func.func @transform_2(%arg0: i32) -> (i32, i32) {
    %c0_i32 = arith.constant 0 : i32
    %c0_i32_0 = arith.constant 0 : i32
    %c0_i32_1 = arith.constant 0 : i32
    return %c0_i32, %c0_i32_0 : i32, i32
  }
  func.func @transform_3(%arg0: i32) -> (i32, i32) {
    %c0_i32 = arith.constant 0 : i32
    %c0_i32_0 = arith.constant 0 : i32
    return %arg0, %c0_i32 : i32, i32
  }
}

module attributes {stable_mosaic.version = 11 : i64} {
  func.func @_linear_kernel(%arg0: i32, %arg1: memref<16x32xf32, #tpu.memory_space<vmem>>, %arg2: memref<32x128xf32, #tpu.memory_space<vmem>>, %arg3: memref<1x128xf32, #tpu.memory_space<vmem>>, %arg4: memref<16x128xf32, #tpu.memory_space<vmem>>) attributes {dimension_semantics = [#tpu.dimension_semantics<parallel>], iteration_bounds = array<i64: 1>, scalar_prefetch = 0 : i64, scratch_operands = 0 : i64, tpu.core_type = #tpu.core_type<tc>, window_params = [{transform_indices = @transform_0, window_bounds = array<i64: 16, 32>}, {pipeline_mode = #tpu.pipeline_mode<synchronous>, transform_indices = @transform_1, window_bounds = array<i64: 32, 128>}, {pipeline_mode = #tpu.pipeline_mode<synchronous>, transform_indices = @transform_2, window_bounds = array<i64: 1, 128>}, {transform_indices = @transform_3, window_bounds = array<i64: 16, 128>}]} {
    %c0 = arith.constant 0 : index
    %c0_0 = arith.constant 0 : index
    %0 = vector.load %arg1[%c0, %c0_0] : memref<16x32xf32, #tpu.memory_space<vmem>>, vector<16x32xf32>
    %1 = arith.truncf %0 : vector<16x32xf32> to vector<16x32xbf16>
    %c0_1 = arith.constant 0 : index
    %c0_2 = arith.constant 0 : index
    %2 = vector.load %arg2[%c0_1, %c0_2] : memref<32x128xf32, #tpu.memory_space<vmem>>, vector<32x128xf32>
    %3 = arith.truncf %2 : vector<32x128xf32> to vector<32x128xbf16>
    %cst = arith.constant dense<0.000000e+00> : vector<16x128xf32>
    %4 = tpu.matmul %1, %3, %cst {dimension_numbers = #tpu.dot_dimension_numbers<[1], [0], [0], [1], [0, 0, 1, 1], [], []>} : vector<16x32xbf16>, vector<32x128xbf16>, vector<16x128xf32> -> vector<16x128xf32>
    %c0_3 = arith.constant 0 : index
    %c0_4 = arith.constant 0 : index
    %5 = vector.load %arg3[%c0_3, %c0_4] : memref<1x128xf32, #tpu.memory_space<vmem>>, vector<1x128xf32>
    %6 = vector.broadcast %5 : vector<1x128xf32> to vector<16x128xf32>
    %7 = arith.addf %4, %6 : vector<16x128xf32>
    %c0_5 = arith.constant 0 : index
    %c0_6 = arith.constant 0 : index
    %8 = vector.load %arg4[%c0_5, %c0_6] : memref<16x128xf32, #tpu.memory_space<vmem>>, vector<16x128xf32>
    tpu.vector_store %arg4[%c0_5, %c0_6], %7 {strides = array<i32>} : memref<16x128xf32, #tpu.memory_space<vmem>>, vector<16x128xf32>,
    return
  }
  func.func @transform_0(%arg0: i32) -> (i32, i32) {
    %c0_i32 = arith.constant 0 : i32
    %c0_i32_0 = arith.constant 0 : i32
    return %arg0, %c0_i32 : i32, i32
  }
  func.func @transform_1(%arg0: i32) -> (i32, i32) {
    %c0_i32 = arith.constant 0 : i32
    %c0_i32_0 = arith.constant 0 : i32
    %c0_i32_1 = arith.constant 0 : i32
    return %c0_i32, %c0_i32_0 : i32, i32
  }
  func.func @transform_2(%arg0: i32) -> (i32, i32) {
    %c0_i32 = arith.constant 0 : i32
    %c0_i32_0 = arith.constant 0 : i32
    %c0_i32_1 = arith.constant 0 : i32
    return %c0_i32, %c0_i32_0 : i32, i32
  }
  func.func @transform_3(%arg0: i32) -> (i32, i32) {
    %c0_i32 = arith.constant 0 : i32
    %c0_i32_0 = arith.constant 0 : i32
    return %arg0, %c0_i32 : i32, i32
  }
}

module attributes {stable_mosaic.version = 11 : i64} {
  func.func @_bilstm_kernel(%arg0: i32, %arg1: memref<8x2x128xf32, #tpu.memory_space<vmem>>, %arg2: memref<8x2x128xf32, #tpu.memory_space<vmem>>, %arg3: memref<8x2x1xf32, #tpu.memory_space<vmem>>, %arg4: memref<32x128xf32, #tpu.memory_space<vmem>>, %arg5: memref<32x128xf32, #tpu.memory_space<vmem>>, %arg6: memref<8x2x32xf32, #tpu.memory_space<vmem>>, %arg7: memref<8x2x32xf32, #tpu.memory_space<vmem>>) attributes {dimension_semantics = [#tpu.dimension_semantics<arbitrary>], iteration_bounds = array<i64: 1>, scalar_prefetch = 0 : i64, scratch_operands = 0 : i64, tpu.core_type = #tpu.core_type<tc>, window_params = [{pipeline_mode = #tpu.pipeline_mode<synchronous>, transform_indices = @transform_0, window_bounds = array<i64: 8, 2, 128>}, {pipeline_mode = #tpu.pipeline_mode<synchronous>, transform_indices = @transform_1, window_bounds = array<i64: 8, 2, 128>}, {pipeline_mode = #tpu.pipeline_mode<synchronous>, transform_indices = @transform_2, window_bounds = array<i64: 8, 2, 1>}, {pipeline_mode = #tpu.pipeline_mode<synchronous>, transform_indices = @transform_3, window_bounds = array<i64: 32, 128>}, {pipeline_mode = #tpu.pipeline_mode<synchronous>, transform_indices = @transform_4, window_bounds = array<i64: 32, 128>}, {pipeline_mode = #tpu.pipeline_mode<synchronous>, transform_indices = @transform_5, window_bounds = array<i64: 8, 2, 32>}, {pipeline_mode = #tpu.pipeline_mode<synchronous>, transform_indices = @transform_6, window_bounds = array<i64: 8, 2, 32>}]} {
    %cst = arith.constant 0.000000e+00 : f32
    %0 = vector.broadcast %cst : f32 to vector<2x32xf32>
    %c0_i32 = arith.constant 0 : i32
    %c8_i32 = arith.constant 8 : i32
    %1 = arith.addi %c0_i32, %c8_i32 : i32
    %c1_i32 = arith.constant 1 : i32
    %2:4 = scf.for %arg8 = %c0_i32 to %1 step %c1_i32 iter_args(%arg9 = %0, %arg10 = %0, %arg11 = %0, %arg12 = %0) -> (vector<2x32xf32>, vector<2x32xf32>, vector<2x32xf32>, vector<2x32xf32>)  : i32 {
      %c7_i32 = arith.constant 7 : i32
      %3 = arith.subi %c7_i32, %arg8 : i32
      %4 = arith.index_cast %arg8 : i32 to index
      %c0 = arith.constant 0 : index
      %c0_1 = arith.constant 0 : index
      %5 = vector.load %arg3[%4, %c0, %c0_1] : memref<8x2x1xf32, #tpu.memory_space<vmem>>, vector<1x2x1xf32>
      %6 = vector.shape_cast %5 : vector<1x2x1xf32> to vector<2x1xf32>
      %7 = arith.index_cast %3 : i32 to index
      %c0_2 = arith.constant 0 : index
      %c0_3 = arith.constant 0 : index
      %8 = vector.load %arg3[%7, %c0_2, %c0_3] : memref<8x2x1xf32, #tpu.memory_space<vmem>>, vector<1x2x1xf32>
      %9 = vector.shape_cast %8 : vector<1x2x1xf32> to vector<2x1xf32>
      %10 = arith.index_cast %arg8 : i32 to index
      %c0_4 = arith.constant 0 : index
      %c0_5 = arith.constant 0 : index
      %11 = vector.load %arg1[%10, %c0_4, %c0_5] : memref<8x2x128xf32, #tpu.memory_space<vmem>>, vector<1x2x128xf32>
      %12 = vector.shape_cast %11 : vector<1x2x128xf32> to vector<2x128xf32>
      %13 = arith.index_cast %3 : i32 to index
      %c0_6 = arith.constant 0 : index
      %c0_7 = arith.constant 0 : index
      %14 = vector.load %arg2[%13, %c0_6, %c0_7] : memref<8x2x128xf32, #tpu.memory_space<vmem>>, vector<1x2x128xf32>
      %15 = vector.shape_cast %14 : vector<1x2x128xf32> to vector<2x128xf32>
      %c0_8 = arith.constant 0 : index
      %c0_9 = arith.constant 0 : index
      %16 = vector.load %arg4[%c0_8, %c0_9] : memref<32x128xf32, #tpu.memory_space<vmem>>, vector<32x128xf32>
      %cst_10 = arith.constant dense<0.000000e+00> : vector<2x128xf32>
      %17 = tpu.matmul %arg9, %16, %cst_10 {dimension_numbers = #tpu.dot_dimension_numbers<[1], [0], [0], [1], [0, 0, 1, 1], [], []>} : vector<2x32xf32>, vector<32x128xf32>, vector<2x128xf32> -> vector<2x128xf32>
      %18 = arith.addf %12, %17 : vector<2x128xf32>
      %19 = vector.extract_strided_slice %18 {offsets = [0, 0], sizes = [2, 32], strides = [1, 1]} : vector<2x128xf32> to vector<2x32xf32>
      %20 = arith.negf %19 : vector<2x32xf32>
      %21 = math.exp %20 : vector<2x32xf32>
      %cst_11 = arith.constant 1.000000e+00 : f32
      %22 = vector.broadcast %cst_11 : f32 to vector<2x32xf32>
      %23 = arith.addf %22, %21 : vector<2x32xf32>
      %24 = arith.divf %22, %23 : vector<2x32xf32>
      %25 = vector.extract_strided_slice %18 {offsets = [0, 32], sizes = [2, 32], strides = [1, 1]} : vector<2x128xf32> to vector<2x32xf32>
      %26 = arith.negf %25 : vector<2x32xf32>
      %27 = math.exp %26 : vector<2x32xf32>
      %cst_12 = arith.constant 1.000000e+00 : f32
      %28 = vector.broadcast %cst_12 : f32 to vector<2x32xf32>
      %29 = arith.addf %28, %27 : vector<2x32xf32>
      %30 = arith.divf %28, %29 : vector<2x32xf32>
      %31 = vector.extract_strided_slice %18 {offsets = [0, 64], sizes = [2, 32], strides = [1, 1]} : vector<2x128xf32> to vector<2x32xf32>
      %32 = math.tanh %31 : vector<2x32xf32>
      %33 = vector.extract_strided_slice %18 {offsets = [0, 96], sizes = [2, 32], strides = [1, 1]} : vector<2x128xf32> to vector<2x32xf32>
      %34 = arith.negf %33 : vector<2x32xf32>
      %35 = math.exp %34 : vector<2x32xf32>
      %cst_13 = arith.constant 1.000000e+00 : f32
      %36 = vector.broadcast %cst_13 : f32 to vector<2x32xf32>
      %37 = arith.addf %36, %35 : vector<2x32xf32>
      %38 = arith.divf %36, %37 : vector<2x32xf32>
      %39 = arith.mulf %30, %arg10 : vector<2x32xf32>
      %40 = arith.mulf %24, %32 : vector<2x32xf32>
      %41 = arith.addf %39, %40 : vector<2x32xf32>
      %42 = math.tanh %41 : vector<2x32xf32>
      %43 = arith.mulf %38, %42 : vector<2x32xf32>
      %c0_14 = arith.constant 0 : index
      %c0_15 = arith.constant 0 : index
      %44 = vector.load %arg5[%c0_14, %c0_15] : memref<32x128xf32, #tpu.memory_space<vmem>>, vector<32x128xf32>
      %cst_16 = arith.constant dense<0.000000e+00> : vector<2x128xf32>
      %45 = tpu.matmul %arg11, %44, %cst_16 {dimension_numbers = #tpu.dot_dimension_numbers<[1], [0], [0], [1], [0, 0, 1, 1], [], []>} : vector<2x32xf32>, vector<32x128xf32>, vector<2x128xf32> -> vector<2x128xf32>
      %46 = arith.addf %15, %45 : vector<2x128xf32>
      %47 = vector.extract_strided_slice %46 {offsets = [0, 0], sizes = [2, 32], strides = [1, 1]} : vector<2x128xf32> to vector<2x32xf32>
      %48 = arith.negf %47 : vector<2x32xf32>
      %49 = math.exp %48 : vector<2x32xf32>
      %cst_17 = arith.constant 1.000000e+00 : f32
      %50 = vector.broadcast %cst_17 : f32 to vector<2x32xf32>
      %51 = arith.addf %50, %49 : vector<2x32xf32>
      %52 = arith.divf %50, %51 : vector<2x32xf32>
      %53 = vector.extract_strided_slice %46 {offsets = [0, 32], sizes = [2, 32], strides = [1, 1]} : vector<2x128xf32> to vector<2x32xf32>
      %54 = arith.negf %53 : vector<2x32xf32>
      %55 = math.exp %54 : vector<2x32xf32>
      %cst_18 = arith.constant 1.000000e+00 : f32
      %56 = vector.broadcast %cst_18 : f32 to vector<2x32xf32>
      %57 = arith.addf %56, %55 : vector<2x32xf32>
      %58 = arith.divf %56, %57 : vector<2x32xf32>
      %59 = vector.extract_strided_slice %46 {offsets = [0, 64], sizes = [2, 32], strides = [1, 1]} : vector<2x128xf32> to vector<2x32xf32>
      %60 = math.tanh %59 : vector<2x32xf32>
      %61 = vector.extract_strided_slice %46 {offsets = [0, 96], sizes = [2, 32], strides = [1, 1]} : vector<2x128xf32> to vector<2x32xf32>
      %62 = arith.negf %61 : vector<2x32xf32>
      %63 = math.exp %62 : vector<2x32xf32>
      %cst_19 = arith.constant 1.000000e+00 : f32
      %64 = vector.broadcast %cst_19 : f32 to vector<2x32xf32>
      %65 = arith.addf %64, %63 : vector<2x32xf32>
      %66 = arith.divf %64, %65 : vector<2x32xf32>
      %67 = arith.mulf %58, %arg12 : vector<2x32xf32>
      %68 = arith.mulf %52, %60 : vector<2x32xf32>
      %69 = arith.addf %67, %68 : vector<2x32xf32>
      %70 = math.tanh %69 : vector<2x32xf32>
      %71 = arith.mulf %66, %70 : vector<2x32xf32>
      %72 = vector.broadcast %6 : vector<2x1xf32> to vector<2x32xf32>
      %73 = arith.mulf %72, %43 : vector<2x32xf32>
      %cst_20 = arith.constant 1.000000e+00 : f32
      %74 = vector.broadcast %cst_20 : f32 to vector<2x1xf32>
      %75 = arith.subf %74, %6 : vector<2x1xf32>
      %76 = vector.broadcast %75 : vector<2x1xf32> to vector<2x32xf32>
      %77 = arith.mulf %76, %arg9 : vector<2x32xf32>
      %78 = arith.addf %73, %77 : vector<2x32xf32>
      %79 = vector.broadcast %6 : vector<2x1xf32> to vector<2x32xf32>
      %80 = arith.mulf %79, %41 : vector<2x32xf32>
      %cst_21 = arith.constant 1.000000e+00 : f32
      %81 = vector.broadcast %cst_21 : f32 to vector<2x1xf32>
      %82 = arith.subf %81, %6 : vector<2x1xf32>
      %83 = vector.broadcast %82 : vector<2x1xf32> to vector<2x32xf32>
      %84 = arith.mulf %83, %arg10 : vector<2x32xf32>
      %85 = arith.addf %80, %84 : vector<2x32xf32>
      %86 = vector.broadcast %9 : vector<2x1xf32> to vector<2x32xf32>
      %87 = arith.mulf %86, %71 : vector<2x32xf32>
      %cst_22 = arith.constant 1.000000e+00 : f32
      %88 = vector.broadcast %cst_22 : f32 to vector<2x1xf32>
      %89 = arith.subf %88, %9 : vector<2x1xf32>
      %90 = vector.broadcast %89 : vector<2x1xf32> to vector<2x32xf32>
      %91 = arith.mulf %90, %arg11 : vector<2x32xf32>
      %92 = arith.addf %87, %91 : vector<2x32xf32>
      %93 = vector.broadcast %9 : vector<2x1xf32> to vector<2x32xf32>
      %94 = arith.mulf %93, %69 : vector<2x32xf32>
      %cst_23 = arith.constant 1.000000e+00 : f32
      %95 = vector.broadcast %cst_23 : f32 to vector<2x1xf32>
      %96 = arith.subf %95, %9 : vector<2x1xf32>
      %97 = vector.broadcast %96 : vector<2x1xf32> to vector<2x32xf32>
      %98 = arith.mulf %97, %arg12 : vector<2x32xf32>
      %99 = arith.addf %94, %98 : vector<2x32xf32>
      %100 = vector.broadcast %6 : vector<2x1xf32> to vector<2x32xf32>
      %101 = arith.mulf %100, %43 : vector<2x32xf32>
      %102 = vector.shape_cast %101 : vector<2x32xf32> to vector<1x2x32xf32>
      %103 = arith.index_cast %arg8 : i32 to index
      %c0_24 = arith.constant 0 : index
      %c0_25 = arith.constant 0 : index
      %104 = vector.load %arg6[%103, %c0_24, %c0_25] : memref<8x2x32xf32, #tpu.memory_space<vmem>>, vector<1x2x32xf32>
      tpu.vector_store %arg6[%103, %c0_24, %c0_25], %102 {strides = array<i32>} : memref<8x2x32xf32, #tpu.memory_space<vmem>>, vector<1x2x32xf32>,
      %105 = vector.broadcast %9 : vector<2x1xf32> to vector<2x32xf32>
      %106 = arith.mulf %105, %71 : vector<2x32xf32>
      %107 = vector.shape_cast %106 : vector<2x32xf32> to vector<1x2x32xf32>
      %108 = arith.index_cast %3 : i32 to index
      %c0_26 = arith.constant 0 : index
      %c0_27 = arith.constant 0 : index
      %109 = vector.load %arg7[%108, %c0_26, %c0_27] : memref<8x2x32xf32, #tpu.memory_space<vmem>>, vector<1x2x32xf32>
      tpu.vector_store %arg7[%108, %c0_26, %c0_27], %107 {strides = array<i32>} : memref<8x2x32xf32, #tpu.memory_space<vmem>>, vector<1x2x32xf32>,
      scf.yield %78, %85, %92, %99 : vector<2x32xf32>, vector<2x32xf32>, vector<2x32xf32>, vector<2x32xf32>
    }
    %c8_i32_0 = arith.constant 8 : i32
    return
  }
  func.func @transform_0(%arg0: i32) -> (i32, i32, i32) {
    %c0_i32 = arith.constant 0 : i32
    %c0_i32_0 = arith.constant 0 : i32
    %c0_i32_1 = arith.constant 0 : i32
    %c0_i32_2 = arith.constant 0 : i32
    return %c0_i32, %c0_i32_0, %c0_i32_1 : i32, i32, i32
  }
  func.func @transform_1(%arg0: i32) -> (i32, i32, i32) {
    %c0_i32 = arith.constant 0 : i32
    %c0_i32_0 = arith.constant 0 : i32
    %c0_i32_1 = arith.constant 0 : i32
    %c0_i32_2 = arith.constant 0 : i32
    return %c0_i32, %c0_i32_0, %c0_i32_1 : i32, i32, i32
  }
  func.func @transform_2(%arg0: i32) -> (i32, i32, i32) {
    %c0_i32 = arith.constant 0 : i32
    %c0_i32_0 = arith.constant 0 : i32
    %c0_i32_1 = arith.constant 0 : i32
    %c0_i32_2 = arith.constant 0 : i32
    return %c0_i32, %c0_i32_0, %c0_i32_1 : i32, i32, i32
  }
  func.func @transform_3(%arg0: i32) -> (i32, i32) {
    %c0_i32 = arith.constant 0 : i32
    %c0_i32_0 = arith.constant 0 : i32
    %c0_i32_1 = arith.constant 0 : i32
    return %c0_i32, %c0_i32_0 : i32, i32
  }
  func.func @transform_4(%arg0: i32) -> (i32, i32) {
    %c0_i32 = arith.constant 0 : i32
    %c0_i32_0 = arith.constant 0 : i32
    %c0_i32_1 = arith.constant 0 : i32
    return %c0_i32, %c0_i32_0 : i32, i32
  }
  func.func @transform_5(%arg0: i32) -> (i32, i32, i32) {
    %c0_i32 = arith.constant 0 : i32
    %c0_i32_0 = arith.constant 0 : i32
    %c0_i32_1 = arith.constant 0 : i32
    %c0_i32_2 = arith.constant 0 : i32
    return %c0_i32, %c0_i32_0, %c0_i32_1 : i32, i32, i32
  }
  func.func @transform_6(%arg0: i32) -> (i32, i32, i32) {
    %c0_i32 = arith.constant 0 : i32
    %c0_i32_0 = arith.constant 0 : i32
    %c0_i32_1 = arith.constant 0 : i32
    %c0_i32_2 = arith.constant 0 : i32
    return %c0_i32, %c0_i32_0, %c0_i32_1 : i32, i32, i32
  }
}

module attributes {stable_mosaic.version = 11 : i64} {
  func.func @_bidaf_att_kernel(%arg0: i32, %arg1: memref<1x16x64xf32, #tpu.memory_space<vmem>>, %arg2: memref<1x8x64xf32, #tpu.memory_space<vmem>>, %arg3: memref<1x16x1xf32, #tpu.memory_space<vmem>>, %arg4: memref<1x1x8xf32, #tpu.memory_space<vmem>>, %arg5: memref<1x64xf32, #tpu.memory_space<vmem>>, %arg6: memref<1x64xf32, #tpu.memory_space<vmem>>, %arg7: memref<1x64xf32, #tpu.memory_space<vmem>>, %arg8: memref<1x1xf32, #tpu.memory_space<vmem>>, %arg9: memref<1x16x256xf32, #tpu.memory_space<vmem>>) attributes {dimension_semantics = [#tpu.dimension_semantics<parallel>], iteration_bounds = array<i64: 2>, scalar_prefetch = 0 : i64, scratch_operands = 0 : i64, tpu.core_type = #tpu.core_type<tc>, window_params = [{transform_indices = @transform_0, window_bounds = array<i64: 1, 16, 64>}, {transform_indices = @transform_1, window_bounds = array<i64: 1, 8, 64>}, {transform_indices = @transform_2, window_bounds = array<i64: 1, 16, 1>}, {transform_indices = @transform_3, window_bounds = array<i64: 1, 1, 8>}, {pipeline_mode = #tpu.pipeline_mode<synchronous>, transform_indices = @transform_4, window_bounds = array<i64: 1, 64>}, {pipeline_mode = #tpu.pipeline_mode<synchronous>, transform_indices = @transform_5, window_bounds = array<i64: 1, 64>}, {pipeline_mode = #tpu.pipeline_mode<synchronous>, transform_indices = @transform_6, window_bounds = array<i64: 1, 64>}, {pipeline_mode = #tpu.pipeline_mode<synchronous>, transform_indices = @transform_7, window_bounds = array<i64: 1, 1>}, {transform_indices = @transform_8, window_bounds = array<i64: 1, 16, 256>}]} {
    %c0 = arith.constant 0 : index
    %c0_0 = arith.constant 0 : index
    %c0_1 = arith.constant 0 : index
    %0 = vector.load %arg1[%c0, %c0_0, %c0_1] : memref<1x16x64xf32, #tpu.memory_space<vmem>>, vector<1x16x64xf32>
    %1 = vector.shape_cast %0 : vector<1x16x64xf32> to vector<16x64xf32>
    %c0_2 = arith.constant 0 : index
    %c0_3 = arith.constant 0 : index
    %c0_4 = arith.constant 0 : index
    %2 = vector.load %arg2[%c0_2, %c0_3, %c0_4] : memref<1x8x64xf32, #tpu.memory_space<vmem>>, vector<1x8x64xf32>
    %3 = vector.shape_cast %2 : vector<1x8x64xf32> to vector<8x64xf32>
    %c0_5 = arith.constant 0 : index
    %c0_6 = arith.constant 0 : index
    %c0_7 = arith.constant 0 : index
    %4 = vector.load %arg3[%c0_5, %c0_6, %c0_7] : memref<1x16x1xf32, #tpu.memory_space<vmem>>, vector<1x16x1xf32>
    %5 = vector.shape_cast %4 : vector<1x16x1xf32> to vector<16x1xf32>
    %c0_8 = arith.constant 0 : index
    %c0_9 = arith.constant 0 : index
    %c0_10 = arith.constant 0 : index
    %6 = vector.load %arg4[%c0_8, %c0_9, %c0_10] : memref<1x1x8xf32, #tpu.memory_space<vmem>>, vector<1x1x8xf32>
    %7 = vector.shape_cast %6 : vector<1x1x8xf32> to vector<1x8xf32>
    %c0_11 = arith.constant 0 : index
    %c0_12 = arith.constant 0 : index
    %8 = vector.load %arg5[%c0_11, %c0_12] : memref<1x64xf32, #tpu.memory_space<vmem>>, vector<1x64xf32>
    %c0_13 = arith.constant 0 : index
    %c0_14 = arith.constant 0 : index
    %9 = vector.load %arg6[%c0_13, %c0_14] : memref<1x64xf32, #tpu.memory_space<vmem>>, vector<1x64xf32>
    %c0_15 = arith.constant 0 : index
    %c0_16 = arith.constant 0 : index
    %10 = vector.load %arg7[%c0_15, %c0_16] : memref<1x64xf32, #tpu.memory_space<vmem>>, vector<1x64xf32>
    %11 = vector.broadcast %8 : vector<1x64xf32> to vector<16x64xf32>
    %12 = arith.mulf %1, %11 : vector<16x64xf32>
    %cst = arith.constant dense<0.000000e+00> : vector<16xf32>
    %13 = vector.multi_reduction <add>, %12, %cst [1] : vector<16x64xf32> to vector<16xf32>
    %14 = vector.shape_cast %13 : vector<16xf32> to vector<16x1xf32>
    %15 = vector.broadcast %9 : vector<1x64xf32> to vector<8x64xf32>
    %16 = arith.mulf %3, %15 : vector<8x64xf32>
    %cst_17 = arith.constant dense<0.000000e+00> : vector<8xf32>
    %17 = vector.multi_reduction <add>, %16, %cst_17 [1] : vector<8x64xf32> to vector<8xf32>
    %18 = vector.shape_cast %17 : vector<8xf32> to vector<8x1xf32>
    %19 = vector.broadcast %10 : vector<1x64xf32> to vector<16x64xf32>
    %20 = arith.mulf %1, %19 : vector<16x64xf32>
    %21 = arith.truncf %20 : vector<16x64xf32> to vector<16x64xbf16>
    %22 = tpu.transpose %3, [1, 0] : vector<8x64xf32> -> vector<64x8xf32>
    %23 = arith.truncf %22 : vector<64x8xf32> to vector<64x8xbf16>
    %cst_18 = arith.constant dense<0.000000e+00> : vector<16x8xf32>
    %24 = tpu.matmul %21, %23, %cst_18 {dimension_numbers = #tpu.dot_dimension_numbers<[1], [0], [0], [1], [0, 0, 1, 1], [], []>} : vector<16x64xbf16>, vector<64x8xbf16>, vector<16x8xf32> -> vector<16x8xf32>
    %25 = tpu.transpose %18, [1, 0] : vector<8x1xf32> -> vector<1x8xf32>
    %26 = vector.broadcast %14 : vector<16x1xf32> to vector<16x8xf32>
    %27 = vector.broadcast %25 : vector<1x8xf32> to vector<16x8xf32>
    %28 = arith.addf %26, %27 : vector<16x8xf32>
    %29 = arith.addf %28, %24 : vector<16x8xf32>
    %c0_19 = arith.constant 0 : index
    %c0_20 = arith.constant 0 : index
    %30 = vector.load %arg8[%c0_19, %c0_20] : memref<1x1xf32, #tpu.memory_space<vmem>>, vector<1x1xf32>
    %31 = vector.extract %30[0, 0] : f32 from vector<1x1xf32>
    %32 = vector.broadcast %31 : f32 to vector<16x8xf32>
    %33 = arith.addf %29, %32 : vector<16x8xf32>
    %cst_21 = arith.constant 0.000000e+00 : f32
    %34 = vector.broadcast %cst_21 : f32 to vector<1x8xf32>
    %35 = arith.cmpf ogt, %7, %34 : vector<1x8xf32>
    %cst_22 = arith.constant -1.000000e+30 : f32
    %36 = vector.shape_cast %35 : vector<1x8xi1> to vector<1x8xi1>
    %37 = vector.broadcast %36 : vector<1x8xi1> to vector<16x8xi1>
    %38 = vector.broadcast %cst_22 : f32 to vector<16x8xf32>
    %39 = arith.select %37, %33, %38 : vector<16x8xi1>, vector<16x8xf32>
    %cst_23 = arith.constant dense<0xFF800000> : vector<16xf32>
    %40 = vector.multi_reduction <maximumf>, %39, %cst_23 [1] : vector<16x8xf32> to vector<16xf32>
    %41 = vector.shape_cast %40 : vector<16xf32> to vector<16x1xf32>
    %42 = vector.broadcast %41 : vector<16x1xf32> to vector<16x8xf32>
    %43 = arith.subf %39, %42 : vector<16x8xf32>
    %44 = math.exp %43 : vector<16x8xf32>
    %cst_24 = arith.constant dense<0.000000e+00> : vector<16xf32>
    %45 = vector.multi_reduction <add>, %44, %cst_24 [1] : vector<16x8xf32> to vector<16xf32>
    %46 = vector.shape_cast %45 : vector<16xf32> to vector<16x1xf32>
    %47 = tpu.reciprocal %46 {approx = true} : vector<16x1xf32> -> vector<16x1xf32>
    %48 = vector.broadcast %47 : vector<16x1xf32> to vector<16x8xf32>
    %49 = arith.mulf %44, %48 : vector<16x8xf32>
    %cst_25 = arith.constant 0.000000e+00 : f32
    %50 = vector.broadcast %cst_25 : f32 to vector<16x1xf32>
    %51 = arith.cmpf ogt, %5, %50 : vector<16x1xf32>
    %cst_26 = arith.constant -1.000000e+30 : f32
    %52 = vector.shape_cast %51 : vector<16x1xi1> to vector<16x1xi1>
    %53 = vector.broadcast %52 : vector<16x1xi1> to vector<16x8xi1>
    %54 = vector.broadcast %cst_26 : f32 to vector<16x8xf32>
    %55 = arith.select %53, %33, %54 : vector<16x8xi1>, vector<16x8xf32>
    %cst_27 = arith.constant dense<0xFF800000> : vector<8xf32>
    %56 = vector.multi_reduction <maximumf>, %55, %cst_27 [0] : vector<16x8xf32> to vector<8xf32>
    %57 = vector.shape_cast %56 : vector<8xf32> to vector<1x8xf32>
    %58 = vector.broadcast %57 : vector<1x8xf32> to vector<16x8xf32>
    %59 = arith.subf %55, %58 : vector<16x8xf32>
    %60 = math.exp %59 : vector<16x8xf32>
    %cst_28 = arith.constant dense<0.000000e+00> : vector<8xf32>
    %61 = vector.multi_reduction <add>, %60, %cst_28 [0] : vector<16x8xf32> to vector<8xf32>
    %62 = vector.shape_cast %61 : vector<8xf32> to vector<1x8xf32>
    %63 = tpu.reciprocal %62 {approx = true} : vector<1x8xf32> -> vector<1x8xf32>
    %64 = vector.broadcast %63 : vector<1x8xf32> to vector<16x8xf32>
    %65 = arith.mulf %60, %64 : vector<16x8xf32>
    %66 = arith.truncf %49 : vector<16x8xf32> to vector<16x8xbf16>
    %67 = arith.truncf %3 : vector<8x64xf32> to vector<8x64xbf16>
    %cst_29 = arith.constant dense<0.000000e+00> : vector<16x64xf32>
    %68 = tpu.matmul %66, %67, %cst_29 {dimension_numbers = #tpu.dot_dimension_numbers<[1], [0], [0], [1], [0, 0, 1, 1], [], []>} : vector<16x8xbf16>, vector<8x64xbf16>, vector<16x64xf32> -> vector<16x64xf32>
    %69 = tpu.transpose %65, [1, 0] : vector<16x8xf32> -> vector<8x16xf32>
    %70 = arith.truncf %69 : vector<8x16xf32> to vector<8x16xbf16>
    %71 = arith.truncf %1 : vector<16x64xf32> to vector<16x64xbf16>
    %cst_30 = arith.constant dense<0.000000e+00> : vector<8x64xf32>
    %72 = tpu.matmul %70, %71, %cst_30 {dimension_numbers = #tpu.dot_dimension_numbers<[1], [0], [0], [1], [0, 0, 1, 1], [], []>} : vector<8x16xbf16>, vector<16x64xbf16>, vector<8x64xf32> -> vector<8x64xf32>
    %73 = arith.truncf %49 : vector<16x8xf32> to vector<16x8xbf16>
    %74 = arith.truncf %72 : vector<8x64xf32> to vector<8x64xbf16>
    %cst_31 = arith.constant dense<0.000000e+00> : vector<16x64xf32>
    %75 = tpu.matmul %73, %74, %cst_31 {dimension_numbers = #tpu.dot_dimension_numbers<[1], [0], [0], [1], [0, 0, 1, 1], [], []>} : vector<16x8xbf16>, vector<8x64xbf16>, vector<16x64xf32> -> vector<16x64xf32>
    %76 = arith.mulf %1, %68 : vector<16x64xf32>
    %77 = arith.mulf %1, %75 : vector<16x64xf32>
    %78 = tpu.concatenate %1, %68, %76, %77 in 1 : vector<16x64xf32>, vector<16x64xf32>, vector<16x64xf32>, vector<16x64xf32> -> vector<16x256xf32>
    %c0_32 = arith.constant 0 : index
    %c0_33 = arith.constant 0 : index
    %c0_34 = arith.constant 0 : index
    %79 = vector.load %arg9[%c0_32, %c0_33, %c0_34] : memref<1x16x256xf32, #tpu.memory_space<vmem>>, vector<1x16x256xf32>
    %80 = vector.shape_cast %79 : vector<1x16x256xf32> to vector<16x256xf32>
    %81 = vector.shape_cast %78 : vector<16x256xf32> to vector<1x16x256xf32>
    tpu.vector_store %arg9[%c0_32, %c0_33, %c0_34], %81 {strides = array<i32>} : memref<1x16x256xf32, #tpu.memory_space<vmem>>, vector<1x16x256xf32>,
    return
  }
  func.func @transform_0(%arg0: i32) -> (i32, i32, i32) {
    %c0_i32 = arith.constant 0 : i32
    %c0_i32_0 = arith.constant 0 : i32
    %c0_i32_1 = arith.constant 0 : i32
    return %arg0, %c0_i32, %c0_i32_0 : i32, i32, i32
  }
  func.func @transform_1(%arg0: i32) -> (i32, i32, i32) {
    %c0_i32 = arith.constant 0 : i32
    %c0_i32_0 = arith.constant 0 : i32
    %c0_i32_1 = arith.constant 0 : i32
    return %arg0, %c0_i32, %c0_i32_0 : i32, i32, i32
  }
  func.func @transform_2(%arg0: i32) -> (i32, i32, i32) {
    %c0_i32 = arith.constant 0 : i32
    %c0_i32_0 = arith.constant 0 : i32
    %c0_i32_1 = arith.constant 0 : i32
    return %arg0, %c0_i32, %c0_i32_0 : i32, i32, i32
  }
  func.func @transform_3(%arg0: i32) -> (i32, i32, i32) {
    %c0_i32 = arith.constant 0 : i32
    %c0_i32_0 = arith.constant 0 : i32
    %c0_i32_1 = arith.constant 0 : i32
    return %arg0, %c0_i32, %c0_i32_0 : i32, i32, i32
  }
  func.func @transform_4(%arg0: i32) -> (i32, i32) {
    %c0_i32 = arith.constant 0 : i32
    %c0_i32_0 = arith.constant 0 : i32
    %c0_i32_1 = arith.constant 0 : i32
    return %c0_i32, %c0_i32_0 : i32, i32
  }
  func.func @transform_5(%arg0: i32) -> (i32, i32) {
    %c0_i32 = arith.constant 0 : i32
    %c0_i32_0 = arith.constant 0 : i32
    %c0_i32_1 = arith.constant 0 : i32
    return %c0_i32, %c0_i32_0 : i32, i32
  }
  func.func @transform_6(%arg0: i32) -> (i32, i32) {
    %c0_i32 = arith.constant 0 : i32
    %c0_i32_0 = arith.constant 0 : i32
    %c0_i32_1 = arith.constant 0 : i32
    return %c0_i32, %c0_i32_0 : i32, i32
  }
  func.func @transform_7(%arg0: i32) -> (i32, i32) {
    %c0_i32 = arith.constant 0 : i32
    %c0_i32_0 = arith.constant 0 : i32
    %c0_i32_1 = arith.constant 0 : i32
    return %c0_i32, %c0_i32_0 : i32, i32
  }
  func.func @transform_8(%arg0: i32) -> (i32, i32, i32) {
    %c0_i32 = arith.constant 0 : i32
    %c0_i32_0 = arith.constant 0 : i32
    %c0_i32_1 = arith.constant 0 : i32
    return %arg0, %c0_i32, %c0_i32_0 : i32, i32, i32
  }
}

module attributes {stable_mosaic.version = 11 : i64} {
  func.func @_linear_kernel(%arg0: i32, %arg1: memref<32x256xf32, #tpu.memory_space<vmem>>, %arg2: memref<256x32xf32, #tpu.memory_space<vmem>>, %arg3: memref<1x32xf32, #tpu.memory_space<vmem>>, %arg4: memref<32x32xf32, #tpu.memory_space<vmem>>) attributes {dimension_semantics = [#tpu.dimension_semantics<parallel>], iteration_bounds = array<i64: 1>, scalar_prefetch = 0 : i64, scratch_operands = 0 : i64, tpu.core_type = #tpu.core_type<tc>, window_params = [{transform_indices = @transform_0, window_bounds = array<i64: 32, 256>}, {pipeline_mode = #tpu.pipeline_mode<synchronous>, transform_indices = @transform_1, window_bounds = array<i64: 256, 32>}, {pipeline_mode = #tpu.pipeline_mode<synchronous>, transform_indices = @transform_2, window_bounds = array<i64: 1, 32>}, {transform_indices = @transform_3, window_bounds = array<i64: 32, 32>}]} {
    %c0 = arith.constant 0 : index
    %c0_0 = arith.constant 0 : index
    %0 = vector.load %arg1[%c0, %c0_0] : memref<32x256xf32, #tpu.memory_space<vmem>>, vector<32x256xf32>
    %1 = arith.truncf %0 : vector<32x256xf32> to vector<32x256xbf16>
    %c0_1 = arith.constant 0 : index
    %c0_2 = arith.constant 0 : index
    %2 = vector.load %arg2[%c0_1, %c0_2] : memref<256x32xf32, #tpu.memory_space<vmem>>, vector<256x32xf32>
    %3 = arith.truncf %2 : vector<256x32xf32> to vector<256x32xbf16>
    %cst = arith.constant dense<0.000000e+00> : vector<32x32xf32>
    %4 = tpu.matmul %1, %3, %cst {dimension_numbers = #tpu.dot_dimension_numbers<[1], [0], [0], [1], [0, 0, 1, 1], [], []>} : vector<32x256xbf16>, vector<256x32xbf16>, vector<32x32xf32> -> vector<32x32xf32>
    %c0_3 = arith.constant 0 : index
    %c0_4 = arith.constant 0 : index
    %5 = vector.load %arg3[%c0_3, %c0_4] : memref<1x32xf32, #tpu.memory_space<vmem>>, vector<1x32xf32>
    %6 = vector.broadcast %5 : vector<1x32xf32> to vector<32x32xf32>
    %7 = arith.addf %4, %6 : vector<32x32xf32>
    %c0_5 = arith.constant 0 : index
    %c0_6 = arith.constant 0 : index
    %8 = vector.load %arg4[%c0_5, %c0_6] : memref<32x32xf32, #tpu.memory_space<vmem>>, vector<32x32xf32>
    tpu.vector_store %arg4[%c0_5, %c0_6], %7 {strides = array<i32>} : memref<32x32xf32, #tpu.memory_space<vmem>>, vector<32x32xf32>,
    return
  }
  func.func @transform_0(%arg0: i32) -> (i32, i32) {
    %c0_i32 = arith.constant 0 : i32
    %c0_i32_0 = arith.constant 0 : i32
    return %arg0, %c0_i32 : i32, i32
  }
  func.func @transform_1(%arg0: i32) -> (i32, i32) {
    %c0_i32 = arith.constant 0 : i32
    %c0_i32_0 = arith.constant 0 : i32
    %c0_i32_1 = arith.constant 0 : i32
    return %c0_i32, %c0_i32_0 : i32, i32
  }
  func.func @transform_2(%arg0: i32) -> (i32, i32) {
    %c0_i32 = arith.constant 0 : i32
    %c0_i32_0 = arith.constant 0 : i32
    %c0_i32_1 = arith.constant 0 : i32
    return %c0_i32, %c0_i32_0 : i32, i32
  }
  func.func @transform_3(%arg0: i32) -> (i32, i32) {
    %c0_i32 = arith.constant 0 : i32
    %c0_i32_0 = arith.constant 0 : i32
    return %arg0, %c0_i32 : i32, i32
  }
}

module attributes {stable_mosaic.version = 11 : i64} {
  func.func @_linear_kernel(%arg0: i32, %arg1: memref<32x64xf32, #tpu.memory_space<vmem>>, %arg2: memref<64x128xf32, #tpu.memory_space<vmem>>, %arg3: memref<1x128xf32, #tpu.memory_space<vmem>>, %arg4: memref<32x128xf32, #tpu.memory_space<vmem>>) attributes {dimension_semantics = [#tpu.dimension_semantics<parallel>], iteration_bounds = array<i64: 1>, scalar_prefetch = 0 : i64, scratch_operands = 0 : i64, tpu.core_type = #tpu.core_type<tc>, window_params = [{transform_indices = @transform_0, window_bounds = array<i64: 32, 64>}, {pipeline_mode = #tpu.pipeline_mode<synchronous>, transform_indices = @transform_1, window_bounds = array<i64: 64, 128>}, {pipeline_mode = #tpu.pipeline_mode<synchronous>, transform_indices = @transform_2, window_bounds = array<i64: 1, 128>}, {transform_indices = @transform_3, window_bounds = array<i64: 32, 128>}]} {
    %c0 = arith.constant 0 : index
    %c0_0 = arith.constant 0 : index
    %0 = vector.load %arg1[%c0, %c0_0] : memref<32x64xf32, #tpu.memory_space<vmem>>, vector<32x64xf32>
    %1 = arith.truncf %0 : vector<32x64xf32> to vector<32x64xbf16>
    %c0_1 = arith.constant 0 : index
    %c0_2 = arith.constant 0 : index
    %2 = vector.load %arg2[%c0_1, %c0_2] : memref<64x128xf32, #tpu.memory_space<vmem>>, vector<64x128xf32>
    %3 = arith.truncf %2 : vector<64x128xf32> to vector<64x128xbf16>
    %cst = arith.constant dense<0.000000e+00> : vector<32x128xf32>
    %4 = tpu.matmul %1, %3, %cst {dimension_numbers = #tpu.dot_dimension_numbers<[1], [0], [0], [1], [0, 0, 1, 1], [], []>} : vector<32x64xbf16>, vector<64x128xbf16>, vector<32x128xf32> -> vector<32x128xf32>
    %c0_3 = arith.constant 0 : index
    %c0_4 = arith.constant 0 : index
    %5 = vector.load %arg3[%c0_3, %c0_4] : memref<1x128xf32, #tpu.memory_space<vmem>>, vector<1x128xf32>
    %6 = vector.broadcast %5 : vector<1x128xf32> to vector<32x128xf32>
    %7 = arith.addf %4, %6 : vector<32x128xf32>
    %c0_5 = arith.constant 0 : index
    %c0_6 = arith.constant 0 : index
    %8 = vector.load %arg4[%c0_5, %c0_6] : memref<32x128xf32, #tpu.memory_space<vmem>>, vector<32x128xf32>
    tpu.vector_store %arg4[%c0_5, %c0_6], %7 {strides = array<i32>} : memref<32x128xf32, #tpu.memory_space<vmem>>, vector<32x128xf32>,
    return
  }
  func.func @transform_0(%arg0: i32) -> (i32, i32) {
    %c0_i32 = arith.constant 0 : i32
    %c0_i32_0 = arith.constant 0 : i32
    return %arg0, %c0_i32 : i32, i32
  }
  func.func @transform_1(%arg0: i32) -> (i32, i32) {
    %c0_i32 = arith.constant 0 : i32
    %c0_i32_0 = arith.constant 0 : i32
    %c0_i32_1 = arith.constant 0 : i32
    return %c0_i32, %c0_i32_0 : i32, i32
  }
  func.func @transform_2(%arg0: i32) -> (i32, i32) {
    %c0_i32 = arith.constant 0 : i32
    %c0_i32_0 = arith.constant 0 : i32
    %c0_i32_1 = arith.constant 0 : i32
    return %c0_i32, %c0_i32_0 : i32, i32
  }
  func.func @transform_3(%arg0: i32) -> (i32, i32) {
    %c0_i32 = arith.constant 0 : i32
    %c0_i32_0 = arith.constant 0 : i32
    return %arg0, %c0_i32 : i32, i32
  }
}

module attributes {stable_mosaic.version = 11 : i64} {
  func.func @_self_att_kernel(%arg0: i32, %arg1: memref<1x16x64xf32, #tpu.memory_space<vmem>>, %arg2: memref<1x1x16xf32, #tpu.memory_space<vmem>>, %arg3: memref<1x64xf32, #tpu.memory_space<vmem>>, %arg4: memref<1x64xf32, #tpu.memory_space<vmem>>, %arg5: memref<1x64xf32, #tpu.memory_space<vmem>>, %arg6: memref<1x1xf32, #tpu.memory_space<vmem>>, %arg7: memref<1x16x256xf32, #tpu.memory_space<vmem>>) attributes {dimension_semantics = [#tpu.dimension_semantics<parallel>], iteration_bounds = array<i64: 2>, scalar_prefetch = 0 : i64, scratch_operands = 0 : i64, tpu.core_type = #tpu.core_type<tc>, window_params = [{transform_indices = @transform_0, window_bounds = array<i64: 1, 16, 64>}, {transform_indices = @transform_1, window_bounds = array<i64: 1, 1, 16>}, {pipeline_mode = #tpu.pipeline_mode<synchronous>, transform_indices = @transform_2, window_bounds = array<i64: 1, 64>}, {pipeline_mode = #tpu.pipeline_mode<synchronous>, transform_indices = @transform_3, window_bounds = array<i64: 1, 64>}, {pipeline_mode = #tpu.pipeline_mode<synchronous>, transform_indices = @transform_4, window_bounds = array<i64: 1, 64>}, {pipeline_mode = #tpu.pipeline_mode<synchronous>, transform_indices = @transform_5, window_bounds = array<i64: 1, 1>}, {transform_indices = @transform_6, window_bounds = array<i64: 1, 16, 256>}]} {
    %c0 = arith.constant 0 : index
    %c0_0 = arith.constant 0 : index
    %c0_1 = arith.constant 0 : index
    %0 = vector.load %arg1[%c0, %c0_0, %c0_1] : memref<1x16x64xf32, #tpu.memory_space<vmem>>, vector<1x16x64xf32>
    %1 = vector.shape_cast %0 : vector<1x16x64xf32> to vector<16x64xf32>
    %c0_2 = arith.constant 0 : index
    %c0_3 = arith.constant 0 : index
    %c0_4 = arith.constant 0 : index
    %2 = vector.load %arg2[%c0_2, %c0_3, %c0_4] : memref<1x1x16xf32, #tpu.memory_space<vmem>>, vector<1x1x16xf32>
    %3 = vector.shape_cast %2 : vector<1x1x16xf32> to vector<1x16xf32>
    %c0_5 = arith.constant 0 : index
    %c0_6 = arith.constant 0 : index
    %4 = vector.load %arg3[%c0_5, %c0_6] : memref<1x64xf32, #tpu.memory_space<vmem>>, vector<1x64xf32>
    %c0_7 = arith.constant 0 : index
    %c0_8 = arith.constant 0 : index
    %5 = vector.load %arg4[%c0_7, %c0_8] : memref<1x64xf32, #tpu.memory_space<vmem>>, vector<1x64xf32>
    %c0_9 = arith.constant 0 : index
    %c0_10 = arith.constant 0 : index
    %6 = vector.load %arg5[%c0_9, %c0_10] : memref<1x64xf32, #tpu.memory_space<vmem>>, vector<1x64xf32>
    %7 = vector.broadcast %4 : vector<1x64xf32> to vector<16x64xf32>
    %8 = arith.mulf %1, %7 : vector<16x64xf32>
    %cst = arith.constant dense<0.000000e+00> : vector<16xf32>
    %9 = vector.multi_reduction <add>, %8, %cst [1] : vector<16x64xf32> to vector<16xf32>
    %10 = vector.shape_cast %9 : vector<16xf32> to vector<16x1xf32>
    %11 = vector.broadcast %5 : vector<1x64xf32> to vector<16x64xf32>
    %12 = arith.mulf %1, %11 : vector<16x64xf32>
    %cst_11 = arith.constant dense<0.000000e+00> : vector<16xf32>
    %13 = vector.multi_reduction <add>, %12, %cst_11 [1] : vector<16x64xf32> to vector<16xf32>
    %14 = vector.shape_cast %13 : vector<16xf32> to vector<16x1xf32>
    %15 = vector.broadcast %6 : vector<1x64xf32> to vector<16x64xf32>
    %16 = arith.mulf %1, %15 : vector<16x64xf32>
    %17 = arith.truncf %16 : vector<16x64xf32> to vector<16x64xbf16>
    %18 = tpu.transpose %1, [1, 0] : vector<16x64xf32> -> vector<64x16xf32>
    %19 = arith.truncf %18 : vector<64x16xf32> to vector<64x16xbf16>
    %cst_12 = arith.constant dense<0.000000e+00> : vector<16x16xf32>
    %20 = tpu.matmul %17, %19, %cst_12 {dimension_numbers = #tpu.dot_dimension_numbers<[1], [0], [0], [1], [0, 0, 1, 1], [], []>} : vector<16x64xbf16>, vector<64x16xbf16>, vector<16x16xf32> -> vector<16x16xf32>
    %21 = tpu.transpose %14, [1, 0] : vector<16x1xf32> -> vector<1x16xf32>
    %22 = vector.broadcast %10 : vector<16x1xf32> to vector<16x16xf32>
    %23 = vector.broadcast %21 : vector<1x16xf32> to vector<16x16xf32>
    %24 = arith.addf %22, %23 : vector<16x16xf32>
    %25 = arith.addf %24, %20 : vector<16x16xf32>
    %c0_13 = arith.constant 0 : index
    %c0_14 = arith.constant 0 : index
    %26 = vector.load %arg6[%c0_13, %c0_14] : memref<1x1xf32, #tpu.memory_space<vmem>>, vector<1x1xf32>
    %27 = vector.extract %26[0, 0] : f32 from vector<1x1xf32>
    %28 = vector.broadcast %27 : f32 to vector<16x16xf32>
    %29 = arith.addf %25, %28 : vector<16x16xf32>
    %30 = tpu.iota {dimensions = array<i32: 0>} : vector<16x16xi32>
    %31 = tpu.iota {dimensions = array<i32: 1>} : vector<16x16xi32>
    %cst_15 = arith.constant 0.000000e+00 : f32
    %32 = vector.broadcast %cst_15 : f32 to vector<1x16xf32>
    %33 = arith.cmpf ogt, %3, %32 : vector<1x16xf32>
    %34 = arith.cmpi ne, %30, %31 : vector<16x16xi32>
    %35 = vector.broadcast %33 : vector<1x16xi1> to vector<16x16xi1>
    %36 = arith.andi %35, %34 : vector<16x16xi1>
    %cst_16 = arith.constant -1.000000e+30 : f32
    %37 = vector.broadcast %cst_16 : f32 to vector<16x16xf32>
    %38 = arith.select %36, %29, %37 : vector<16x16xi1>, vector<16x16xf32>
    %cst_17 = arith.constant dense<0xFF800000> : vector<16xf32>
    %39 = vector.multi_reduction <maximumf>, %38, %cst_17 [1] : vector<16x16xf32> to vector<16xf32>
    %40 = vector.shape_cast %39 : vector<16xf32> to vector<16x1xf32>
    %41 = vector.broadcast %40 : vector<16x1xf32> to vector<16x16xf32>
    %42 = arith.subf %38, %41 : vector<16x16xf32>
    %43 = math.exp %42 : vector<16x16xf32>
    %cst_18 = arith.constant dense<0.000000e+00> : vector<16xf32>
    %44 = vector.multi_reduction <add>, %43, %cst_18 [1] : vector<16x16xf32> to vector<16xf32>
    %45 = vector.shape_cast %44 : vector<16xf32> to vector<16x1xf32>
    %46 = tpu.reciprocal %45 {approx = true} : vector<16x1xf32> -> vector<16x1xf32>
    %47 = vector.broadcast %46 : vector<16x1xf32> to vector<16x16xf32>
    %48 = arith.mulf %43, %47 : vector<16x16xf32>
    %49 = arith.truncf %48 : vector<16x16xf32> to vector<16x16xbf16>
    %50 = arith.truncf %1 : vector<16x64xf32> to vector<16x64xbf16>
    %cst_19 = arith.constant dense<0.000000e+00> : vector<16x64xf32>
    %51 = tpu.matmul %49, %50, %cst_19 {dimension_numbers = #tpu.dot_dimension_numbers<[1], [0], [0], [1], [0, 0, 1, 1], [], []>} : vector<16x16xbf16>, vector<16x64xbf16>, vector<16x64xf32> -> vector<16x64xf32>
    %52 = arith.mulf %1, %51 : vector<16x64xf32>
    %53 = arith.subf %1, %51 : vector<16x64xf32>
    %54 = tpu.concatenate %1, %51, %52, %53 in 1 : vector<16x64xf32>, vector<16x64xf32>, vector<16x64xf32>, vector<16x64xf32> -> vector<16x256xf32>
    %c0_20 = arith.constant 0 : index
    %c0_21 = arith.constant 0 : index
    %c0_22 = arith.constant 0 : index
    %55 = vector.load %arg7[%c0_20, %c0_21, %c0_22] : memref<1x16x256xf32, #tpu.memory_space<vmem>>, vector<1x16x256xf32>
    %56 = vector.shape_cast %55 : vector<1x16x256xf32> to vector<16x256xf32>
    %57 = vector.shape_cast %54 : vector<16x256xf32> to vector<1x16x256xf32>
    tpu.vector_store %arg7[%c0_20, %c0_21, %c0_22], %57 {strides = array<i32>} : memref<1x16x256xf32, #tpu.memory_space<vmem>>, vector<1x16x256xf32>,
    return
  }
  func.func @transform_0(%arg0: i32) -> (i32, i32, i32) {
    %c0_i32 = arith.constant 0 : i32
    %c0_i32_0 = arith.constant 0 : i32
    %c0_i32_1 = arith.constant 0 : i32
    return %arg0, %c0_i32, %c0_i32_0 : i32, i32, i32
  }
  func.func @transform_1(%arg0: i32) -> (i32, i32, i32) {
    %c0_i32 = arith.constant 0 : i32
    %c0_i32_0 = arith.constant 0 : i32
    %c0_i32_1 = arith.constant 0 : i32
    return %arg0, %c0_i32, %c0_i32_0 : i32, i32, i32
  }
  func.func @transform_2(%arg0: i32) -> (i32, i32) {
    %c0_i32 = arith.constant 0 : i32
    %c0_i32_0 = arith.constant 0 : i32
    %c0_i32_1 = arith.constant 0 : i32
    return %c0_i32, %c0_i32_0 : i32, i32
  }
  func.func @transform_3(%arg0: i32) -> (i32, i32) {
    %c0_i32 = arith.constant 0 : i32
    %c0_i32_0 = arith.constant 0 : i32
    %c0_i32_1 = arith.constant 0 : i32
    return %c0_i32, %c0_i32_0 : i32, i32
  }
  func.func @transform_4(%arg0: i32) -> (i32, i32) {
    %c0_i32 = arith.constant 0 : i32
    %c0_i32_0 = arith.constant 0 : i32
    %c0_i32_1 = arith.constant 0 : i32
    return %c0_i32, %c0_i32_0 : i32, i32
  }
  func.func @transform_5(%arg0: i32) -> (i32, i32) {
    %c0_i32 = arith.constant 0 : i32
    %c0_i32_0 = arith.constant 0 : i32
    %c0_i32_1 = arith.constant 0 : i32
    return %c0_i32, %c0_i32_0 : i32, i32
  }
  func.func @transform_6(%arg0: i32) -> (i32, i32, i32) {
    %c0_i32 = arith.constant 0 : i32
    %c0_i32_0 = arith.constant 0 : i32
    %c0_i32_1 = arith.constant 0 : i32
    return %arg0, %c0_i32, %c0_i32_0 : i32, i32, i32
  }
}

module attributes {stable_mosaic.version = 11 : i64} {
  func.func @_linear_kernel(%arg0: i32, %arg1: memref<32x96xf32, #tpu.memory_space<vmem>>, %arg2: memref<96x128xf32, #tpu.memory_space<vmem>>, %arg3: memref<1x128xf32, #tpu.memory_space<vmem>>, %arg4: memref<32x128xf32, #tpu.memory_space<vmem>>) attributes {dimension_semantics = [#tpu.dimension_semantics<parallel>], iteration_bounds = array<i64: 1>, scalar_prefetch = 0 : i64, scratch_operands = 0 : i64, tpu.core_type = #tpu.core_type<tc>, window_params = [{transform_indices = @transform_0, window_bounds = array<i64: 32, 96>}, {pipeline_mode = #tpu.pipeline_mode<synchronous>, transform_indices = @transform_1, window_bounds = array<i64: 96, 128>}, {pipeline_mode = #tpu.pipeline_mode<synchronous>, transform_indices = @transform_2, window_bounds = array<i64: 1, 128>}, {transform_indices = @transform_3, window_bounds = array<i64: 32, 128>}]} {
    %c0 = arith.constant 0 : index
    %c0_0 = arith.constant 0 : index
    %0 = vector.load %arg1[%c0, %c0_0] : memref<32x96xf32, #tpu.memory_space<vmem>>, vector<32x96xf32>
    %1 = arith.truncf %0 : vector<32x96xf32> to vector<32x96xbf16>
    %c0_1 = arith.constant 0 : index
    %c0_2 = arith.constant 0 : index
    %2 = vector.load %arg2[%c0_1, %c0_2] : memref<96x128xf32, #tpu.memory_space<vmem>>, vector<96x128xf32>
    %3 = arith.truncf %2 : vector<96x128xf32> to vector<96x128xbf16>
    %cst = arith.constant dense<0.000000e+00> : vector<32x128xf32>
    %4 = tpu.matmul %1, %3, %cst {dimension_numbers = #tpu.dot_dimension_numbers<[1], [0], [0], [1], [0, 0, 1, 1], [], []>} : vector<32x96xbf16>, vector<96x128xbf16>, vector<32x128xf32> -> vector<32x128xf32>
    %c0_3 = arith.constant 0 : index
    %c0_4 = arith.constant 0 : index
    %5 = vector.load %arg3[%c0_3, %c0_4] : memref<1x128xf32, #tpu.memory_space<vmem>>, vector<1x128xf32>
    %6 = vector.broadcast %5 : vector<1x128xf32> to vector<32x128xf32>
    %7 = arith.addf %4, %6 : vector<32x128xf32>
    %c0_5 = arith.constant 0 : index
    %c0_6 = arith.constant 0 : index
    %8 = vector.load %arg4[%c0_5, %c0_6] : memref<32x128xf32, #tpu.memory_space<vmem>>, vector<32x128xf32>
    tpu.vector_store %arg4[%c0_5, %c0_6], %7 {strides = array<i32>} : memref<32x128xf32, #tpu.memory_space<vmem>>, vector<32x128xf32>,
    return
  }
  func.func @transform_0(%arg0: i32) -> (i32, i32) {
    %c0_i32 = arith.constant 0 : i32
    %c0_i32_0 = arith.constant 0 : i32
    return %arg0, %c0_i32 : i32, i32
  }
  func.func @transform_1(%arg0: i32) -> (i32, i32) {
    %c0_i32 = arith.constant 0 : i32
    %c0_i32_0 = arith.constant 0 : i32
    %c0_i32_1 = arith.constant 0 : i32
    return %c0_i32, %c0_i32_0 : i32, i32
  }
  func.func @transform_2(%arg0: i32) -> (i32, i32) {
    %c0_i32 = arith.constant 0 : i32
    %c0_i32_0 = arith.constant 0 : i32
    %c0_i32_1 = arith.constant 0 : i32
    return %c0_i32, %c0_i32_0 : i32, i32
  }
  func.func @transform_3(%arg0: i32) -> (i32, i32) {
    %c0_i32 = arith.constant 0 : i32
    %c0_i32_0 = arith.constant 0 : i32
    return %arg0, %c0_i32 : i32, i32
  }
}

</mosaic_0001>

<bundles_post_ra>
// kernel: docqa_forward.31
= control target key start
LH: loop header
LB: loop body
LE: loop exit
PB: predicated region body
PF: predicated region fallthrough
CT: control target
= control target key end

     0   :  { %vm37_vm0 = vcmask 1043456   ;;  %vm30_vm1 = vcmask 64512   ;;  %vm94_vm2 = vcmask 130048   ;;  %s166_s1 = inlined_call_operand.vmem [shape: f32[8,16], index: 1, kind: input, shape index: {}]   ;;  %s167_s0 = inlined_call_operand.vmem [shape: f32[32,8], index: 0, kind: input, shape index: {}]   ;;  %s168_s2 = inlined_call_operand.vmem [shape: f32[1,16], index: 2, kind: input, shape index: {}]   ;;  %s169_s3 = inlined_call_operand.vmem [shape: f32[32,16], index: 3, kind: output, shape index: {}]  }
   0x1   :  { %v21_v0 = vld [vmem:[%s166_s1] sm:$0xff]  ;;  %v16_v2 = vld [vmem:[%s167_s0 + $0x8] sm:$0xff]  ;;  %v17_v5 = vld [vmem:[%s167_s0 + $0x10] sm:$0xff] }
   0x2   :  { %v15_v1 = vld [vmem:[%s167_s0] sm:$0xff]  ;;  %v22_v3 = vpack.c.bf16 %v21_v0, %v21_v0  ;;  %v18_v6 = vld [vmem:[%s167_s0 + $0x18] sm:$0xff] }
   0x3   :  { %v19_v4 = vpack.c.bf16 %v16_v2, %v15_v1  ;;  %v20_v8 = vpack.c.bf16 %v18_v6, %v17_v5  ;;  %v103_v9 = vld [vmem:[%s168_s2] ss:$0 sm:$0xff] }
   0x4   :  { %115 = vmatprep.subr.msk.bf16.mxu0 %vm37_vm0, %v22_v3  ;;  %v39_v7 = vsel %vm37_vm0, %v22_v3, 0 }
   0x5   :  { %111 = vmatprep.mubr.msk.bf16.mxu0 %vm30_vm1, %v19_v4  ;;  %110 = vmatpush3.bf16.msra.mxu0 %v39_v7 }
   0x8   :  { %112 = vmatmul.mubr.msk.bf16.vlgmr.msra.gmra.mxu0 %vm30_vm1, %v20_v8 }
  0xc8   :  { %v113_v10 = vpop.f32.mrf.mxu0 }
  0xc9   :  { %v84_v11 = vadd.f32 %v113_v10, %v103_v9 }
  0xca   :  { %v75_v12 = vpop.f32.mrf.mxu0 }
  0xcb   :  { %v92_v13 = vmax.f32 %v84_v11, 0.0  ;;  %v76_v14 = vadd.f32 %v103_v9, %v75_v12 }
  0xcc   :  { %v114_v15 = vpop.f32.mrf.mxu0 }
  0xcd   :  { %97 = vst.msk [vmem:[%s169_s3 + $0x10] sm:$0xff] %vm94_vm2, %v92_v13  ;;  %v90_v16 = vmax.f32 %v76_v14, 0.0  ;;  %v87_v17 = vadd.f32 %v114_v15, %v103_v9 }
  0xce   :  { %v78_v18 = vpop.f32.mrf.mxu0 }
  0xcf   :  { %95 = vst.msk [vmem:[%s169_s3] sm:$0xff] %vm94_vm2, %v90_v16  ;;  %v93_v19 = vmax.f32 %v87_v17, 0.0  ;;  %v79_v20 = vadd.f32 %v103_v9, %v78_v18 }
  0xd1   :  { %98 = vst.msk [vmem:[%s169_s3 + $0x18] sm:$0xff] %vm94_vm2, %v93_v19  ;;  %v91_v21 = vmax.f32 %v79_v20, 0.0 }
  0xd3   :  { %96 = vst.msk [vmem:[%s169_s3 + $0x8] sm:$0xff] %vm94_vm2, %v91_v21 }

// kernel: docqa_forward.32
= control target key start
LH: loop header
LB: loop body
LE: loop exit
PB: predicated region body
PF: predicated region fallthrough
CT: control target
= control target key end

     0   :  { %vm34_vm0 = vcmask 261120   ;;  %s178_s1 = inlined_call_operand.vmem [shape: f32[32,32], index: 1, kind: input, shape index: {}]   ;;  %s179_s0 = inlined_call_operand.vmem [shape: f32[32,32], index: 0, kind: input, shape index: {}]   ;;  %s180_s2 = inlined_call_operand.vmem [shape: f32[1,32], index: 2, kind: input, shape index: {}]   ;;  %s181_s3 = inlined_call_operand.vmem [shape: f32[32,32], index: 3, kind: output, shape index: {}]  }
   0x1   :  { %v23_v0 = vld [vmem:[%s178_s1 + $0x10] sm:$0xff]  ;;  %v24_v1 = vld [vmem:[%s178_s1 + $0x18] sm:$0xff]  ;;  %v21_v2 = vld [vmem:[%s178_s1] sm:$0xff] }
   0x2   :  { %v26_v3 = vpack.c.bf16 %v24_v1, %v23_v0  ;;  %v22_v4 = vld [vmem:[%s178_s1 + $0x8] sm:$0xff]  ;;  %v15_v5 = vld [vmem:[%s179_s0] sm:$0xff]  ;;  %v17_v9 = vld [vmem:[%s179_s0 + $0x10] sm:$0xff] }
   0x3   :  { %v16_v6 = vld [vmem:[%s179_s0 + $0x8] sm:$0xff]  ;;  %v25_v7 = vpack.c.bf16 %v22_v4, %v21_v2  ;;  %v18_v10 = vld [vmem:[%s179_s0 + $0x18] sm:$0xff]  ;;  %v98_v12 = vld [vmem:[%s180_s2] ss:$0 sm:$0xff] }
   0x4   :  { %v19_v8 = vpack.c.bf16 %v16_v6, %v15_v5  ;;  %105 = vmatprep.subr.bf16.mxu0 %v26_v3  ;;  %v20_v11 = vpack.c.bf16 %v18_v10, %v17_v9 }
   0x5   :  { %106 = vmatpush3.bf16.msra.mxu0 %v26_v3 }
   0x6   :  { %109 = vmatprep.mubr.msk.bf16.mxu0 %vm34_vm0, %v19_v8  ;;  %107 = vmatprep.subr.bf16.mxu0 %v25_v7 }
   0x9   :  { %108 = vmatpush3.bf16.msra.mxu0 %v25_v7 }
   0xc   :  { %110 = vmatmul.mubr.msk.bf16.vlgmr.msra.gmra.mxu0 %vm34_vm0, %v20_v11 }
  0xcc   :  { %v111_v13 = vpop.f32.mrf.mxu0 }
  0xcd   :  { %v84_v14 = vadd.f32 %v111_v13, %v98_v12 }
  0xce   :  { %v75_v15 = vpop.f32.mrf.mxu0 }
  0xcf   :  { %92 = vst.msk [vmem:[%s181_s3 + $0x10] sm:$0xff] %vm34_vm0, %v84_v14  ;;  %v76_v16 = vadd.f32 %v98_v12, %v75_v15 }
  0xd0   :  { %v112_v17 = vpop.f32.mrf.mxu0 }
  0xd1   :  { %90 = vst.msk [vmem:[%s181_s3] sm:$0xff] %vm34_vm0, %v76_v16  ;;  %v87_v18 = vadd.f32 %v112_v17, %v98_v12 }
  0xd2   :  { %v78_v19 = vpop.f32.mrf.mxu0 }
  0xd3   :  { %93 = vst.msk [vmem:[%s181_s3 + $0x18] sm:$0xff] %vm34_vm0, %v87_v18  ;;  %v79_v20 = vadd.f32 %v98_v12, %v78_v19 }
  0xd5   :  { %91 = vst.msk [vmem:[%s181_s3 + $0x8] sm:$0xff] %vm34_vm0, %v79_v20 }

// kernel: docqa_forward.33
= control target key start
LH: loop header
LB: loop body
LE: loop exit
PB: predicated region body
PF: predicated region fallthrough
CT: control target
= control target key end

     0   :  { %vm34_vm0 = vcmask 261120   ;;  %s194_s29 = smov 96   ;;  %s272_s1 = inlined_call_operand.vmem [shape: f32[32,64], index: 1, kind: input, shape index: {}]   ;;  %s273_s0 = inlined_call_operand.vmem [shape: f32[32,32], index: 0, kind: input, shape index: {}]   ;;  %s274_s2 = inlined_call_operand.vmem [shape: f32[1,64], index: 2, kind: input, shape index: {}]   ;;  %s275_s3 = inlined_call_operand.vmem [shape: f32[32,32], index: 3, kind: output, shape index: {}]  }
   0x1   :  { %v23_v0 = vld [vmem:[%s272_s1 + $0x10] sm:$0xff]  ;;  %v24_v1 = vld [vmem:[%s272_s1 + $0x18] sm:$0xff]  ;;  %v21_v2 = vld [vmem:[%s272_s1] sm:$0xff] }
   0x2   :  { %v26_v3 = vpack.c.bf16 %v24_v1, %v23_v0  ;;  %v22_v4 = vld [vmem:[%s272_s1 + $0x8] sm:$0xff]  ;;  %v230_v5 = vld [vmem:[%s273_s0] sm:$0xff]  ;;  %v17_v9 = vld [vmem:[%s273_s0 + $0x10] sm:$0xff] }
   0x3   :  { %v235_v6 = vld [vmem:[%s273_s0 + $0x8] sm:$0xff]  ;;  %v25_v7 = vpack.c.bf16 %v22_v4, %v21_v2  ;;  %v246_v10 = vld [vmem:[%s273_s0 + $0x18] sm:$0xff]  ;;  %v158_v12 = vld [vmem:[%s274_s2] ss:$0 sm:$0xff] }
   0x4   :  { %v19_v8 = vpack.c.bf16 %v235_v6, %v230_v5  ;;  %169 = vmatprep.subr.bf16.mxu0 %v26_v3  ;;  %v20_v11 = vpack.c.bf16 %v246_v10, %v17_v9 }
   0x5   :  { %170 = vmatpush3.bf16.msra.mxu0 %v26_v3 }
   0x6   :  { %173 = vmatprep.mubr.msk.bf16.mxu0 %vm34_vm0, %v19_v8  ;;  %171 = vmatprep.subr.bf16.mxu0 %v25_v7 }
   0x9   :  { %172 = vmatpush3.bf16.msra.mxu0 %v25_v7 }
   0xc   :  { %174 = vmatmul.mubr.msk.bf16.vlgmr.msra.gmra.mxu0 %vm34_vm0, %v20_v11 }
  0xcc   :  { %v175_v13 = vpop.f32.mrf.mxu0 }
  0xcd   :  { %v84_v14 = vadd.f32 %v175_v13, %v158_v12 }
  0xce   :  { %v75_v15 = vpop.f32.mrf.mxu0 }
  0xcf   :  { %v76_v16 = vadd.f32 %v158_v12, %v75_v15  ;;  %v116_v17 = vmax.f32 %v84_v14, 0.0  ;;  %v163_v25 = vmul.f32 -1.442695, %v84_v14 }
  0xd0   :  { %v176_v18 = vpop.f32.mrf.mxu0 }
  0xd1   :  { %v87_v19 = vadd.f32 %v176_v18, %v158_v12  ;;  %126 = vrot.lane.b32.xlu1 %v116_v17, %s194_s29  ;;  %v114_v20 = vmax.f32 %v76_v16, 0.0  ;;  %v161_v26 = vmul.f32 -1.442695, %v76_v16  ;;  %178 = vpow2.f32 %v163_v25 }
  0xd2   :  { %v78_v21 = vpop.f32.mrf.mxu0 }
  0xd3   :  { %v117_v22 = vmax.f32 %v87_v19, 0.0  ;;  %v79_v23 = vadd.f32 %v158_v12, %v78_v21  ;;  %122 = vrot.lane.b32.xlu0 %v114_v20, %s194_s29  ;;  %v164_v27 = vmul.f32 -1.442695, %v87_v19  ;;  %180 = vpow2.f32 %v161_v26 }
  0xd5   :  { %v115_v24 = vmax.f32 %v79_v23, 0.0  ;;  %128 = vrot.lane.b32.xlu1 %v117_v22, %s194_s29  ;;  %v162_v28 = vmul.f32 -1.442695, %v79_v23  ;;  %182 = vpow2.f32 %v164_v27 }
  0xd7   :  { %124 = vrot.lane.b32.xlu0 %v115_v24, %s194_s29  ;;  %184 = vpow2.f32 %v162_v28 }
  0xde   :  { %v179_v29 = vpop.eup %178 }
  0xdf   :  { %v104_v31 = vadd.f32 1.0, %v179_v29 }
  0xe0   :  { %v181_v30 = vpop.eup %180 }
  0xe1   :  { %v102_v33 = vadd.f32 1.0, %v181_v30  ;;  %186 = vrcp.f32 %v104_v31 }
  0xe2   :  { %v183_v32 = vpop.eup %182 }
  0xe3   :  { %v105_v35 = vadd.f32 1.0, %v183_v32  ;;  %188 = vrcp.f32 %v102_v33 }
  0xe4   :  { %v185_v34 = vpop.eup %184 }
  0xe5   :  { %v103_v36 = vadd.f32 1.0, %v185_v34  ;;  %190 = vrcp.f32 %v105_v35 }
  0xe7   :  { %192 = vrcp.f32 %v103_v36 }
  0xee   :  { %v187_v37 = vpop.eup %186 }
  0xef   :  { %v140_v39 = vsub.f32 1.0, %v187_v37 }
  0xf0   :  { %v189_v38 = vpop.eup %188 }
  0xf1   :  { %v138_v41 = vsub.f32 1.0, %v189_v38  ;;  %v144_v45 = vmul.f32 %v140_v39, %v17_v9 }
  0xf2   :  { %v191_v40 = vpop.eup %190 }
  0xf3   :  { %v141_v46 = vsub.f32 1.0, %v191_v40  ;;  %v142_v50 = vmul.f32 %v138_v41, %v230_v5 }
  0xf4   :  { %v193_v42 = vpop.eup %192 }
  0xf5   :  { %v139_v51 = vsub.f32 1.0, %v193_v42  ;;  %v145_v55 = vmul.f32 %v141_v46, %v246_v10 }
  0xf7   :  { %v143_v58 = vmul.f32 %v139_v51, %v235_v6 }
 0x143   :  { %v127_v43 = vpop.permute.xlu1 %126 }
 0x144   :  { %v136_v44 = vmul.f32 %v187_v37, %v127_v43 }
 0x145   :  { %v123_v47 = vpop.permute.xlu0 %122 }
 0x146   :  { %v148_v48 = vadd.f32 %v144_v45, %v136_v44  ;;  %v134_v49 = vmul.f32 %v189_v38, %v123_v47 }
 0x147   :  { %v129_v52 = vpop.permute.xlu1 %128 }
 0x148   :  { %152 = vst.msk [vmem:[%s275_s3 + $0x10] sm:$0xff] %vm34_vm0, %v148_v48  ;;  %v146_v53 = vadd.f32 %v142_v50, %v134_v49  ;;  %v137_v54 = vmul.f32 %v191_v40, %v129_v52 }
 0x149   :  { %v125_v56 = vpop.permute.xlu0 %124 }
 0x14a   :  { %150 = vst.msk [vmem:[%s275_s3] sm:$0xff] %vm34_vm0, %v146_v53  ;;  %v149_v57 = vadd.f32 %v145_v55, %v137_v54  ;;  %v135_v59 = vmul.f32 %v193_v42, %v125_v56 }
 0x14c   :  { %153 = vst.msk [vmem:[%s275_s3 + $0x18] sm:$0xff] %vm34_vm0, %v149_v57  ;;  %v147_v60 = vadd.f32 %v143_v58, %v135_v59 }
 0x14e   :  { %151 = vst.msk [vmem:[%s275_s3 + $0x8] sm:$0xff] %vm34_vm0, %v147_v60 }

// kernel: docqa_forward.39
= control target key start
LH: loop header
LB: loop body
LE: loop exit
PB: predicated region body
PF: predicated region fallthrough
CT: control target
= control target key end

     0   :  { %vm34_vm0 = vcmask 261120   ;;  %s172_s1 = inlined_call_operand.vmem [shape: f32[32,128], index: 1, kind: input, shape index: {}]   ;;  %s173_s0 = inlined_call_operand.vmem [shape: f32[32,32], index: 0, kind: input, shape index: {}]   ;;  %s174_s2 = inlined_call_operand.vmem [shape: f32[1,128], index: 2, kind: input, shape index: {}]   ;;  %s175_s3 = inlined_call_operand.vmem [shape: f32[32,128], index: 3, kind: output, shape index: {}]  }
   0x1   :  { %v23_v0 = vld [vmem:[%s172_s1 + $0x10] sm:$0xff]  ;;  %v24_v1 = vld [vmem:[%s172_s1 + $0x18] sm:$0xff]  ;;  %v21_v2 = vld [vmem:[%s172_s1] sm:$0xff] }
   0x2   :  { %v26_v3 = vpack.c.bf16 %v24_v1, %v23_v0  ;;  %v22_v4 = vld [vmem:[%s172_s1 + $0x8] sm:$0xff]  ;;  %v15_v5 = vld [vmem:[%s173_s0] sm:$0xff]  ;;  %v17_v9 = vld [vmem:[%s173_s0 + $0x10] sm:$0xff] }
   0x3   :  { %v16_v6 = vld [vmem:[%s173_s0 + $0x8] sm:$0xff]  ;;  %v25_v7 = vpack.c.bf16 %v22_v4, %v21_v2  ;;  %v18_v10 = vld [vmem:[%s173_s0 + $0x18] sm:$0xff]  ;;  %v98_v12 = vld [vmem:[%s174_s2] ss:$0 sm:$0xff] }
   0x4   :  { %v19_v8 = vpack.c.bf16 %v16_v6, %v15_v5  ;;  %105 = vmatprep.subr.bf16.mxu0 %v26_v3  ;;  %v20_v11 = vpack.c.bf16 %v18_v10, %v17_v9 }
   0x5   :  { %106 = vmatpush3.bf16.msra.mxu0 %v26_v3 }
   0x6   :  { %109 = vmatprep.mubr.msk.bf16.mxu0 %vm34_vm0, %v19_v8  ;;  %107 = vmatprep.subr.bf16.mxu0 %v25_v7 }
   0x9   :  { %108 = vmatpush3.bf16.msra.mxu0 %v25_v7 }
   0xc   :  { %110 = vmatmul.mubr.msk.bf16.vlgmr.msra.gmra.mxu0 %vm34_vm0, %v20_v11 }
  0xcc   :  { %v111_v13 = vpop.f32.mrf.mxu0 }
  0xcd   :  { %v84_v14 = vadd.f32 %v111_v13, %v98_v12 }
  0xce   :  { %v75_v15 = vpop.f32.mrf.mxu0 }
  0xcf   :  { %92 = vst [vmem:[%s175_s3 + $0x10] sm:$0xff] %v84_v14  ;;  %v76_v16 = vadd.f32 %v98_v12, %v75_v15 }
  0xd0   :  { %v112_v17 = vpop.f32.mrf.mxu0 }
  0xd1   :  { %90 = vst [vmem:[%s175_s3] sm:$0xff] %v76_v16  ;;  %v87_v18 = vadd.f32 %v112_v17, %v98_v12 }
  0xd2   :  { %v78_v19 = vpop.f32.mrf.mxu0 }
  0xd3   :  { %93 = vst [vmem:[%s175_s3 + $0x18] sm:$0xff] %v87_v18  ;;  %v79_v20 = vadd.f32 %v98_v12, %v78_v19 }
  0xd5   :  { %91 = vst [vmem:[%s175_s3 + $0x8] sm:$0xff] %v79_v20 }

// kernel: docqa_forward.40
= control target key start
LH: loop header
LB: loop body
LE: loop exit
PB: predicated region body
PF: predicated region fallthrough
CT: control target
= control target key end

     0   :  { %v517_v0 = vmov 0.0   ;;  %v519_v1 = vmov 0.0   ;;  %v521_v2 = vmov 0.0   ;;  %v523_v3 = vmov 0.0   ;;  %s525_s21 = smov 0   ;;  %s625_s0 = inlined_call_operand.vmem [shape: f32[16,2,128], index: 0, kind: input, shape index: {}]   ;;  %s626_s1 = inlined_call_operand.vmem [shape: f32[16,2,128], index: 1, kind: input, shape index: {}]   ;;  %s627_s2 = inlined_call_operand.vmem [shape: f32[16,2,1], index: 2, kind: input, shape index: {}]   ;;  %s628_s3 = inlined_call_operand.vmem [shape: f32[32,128], index: 3, kind: input, shape index: {}]   ;;  %s629_s4 = inlined_call_operand.vmem [shape: f32[32,128], index: 4, kind: input, shape index: {}]   ;;  %s630_s5 = inlined_call_operand.vmem [shape: f32[16,2,32], index: 5, kind: output, shape index: {0}]   ;;  %s631_s6 = inlined_call_operand.vmem [shape: f32[16,2,32], index: 6, kind: output, shape index: {1}]  }
   0x1 LB: > { %v46_v4 = vld [vmem:[%s628_s3 + $0x18] sm:$0xff]  ;;  %v477_v5 = vmov 0.0   ;;  %v45_v6 = vld [vmem:[%s628_s3 + $0x10] sm:$0xff]  ;;  %s478_s28 = smov 32   ;;  %v44_v8 = vld [vmem:[%s628_s3 + $0x8] sm:$0xff]  ;;  %vm479_vm0 = vmmov 0   ;;  %s475_s21 = sphi %s525_s21, %s27_s21   ;;  %v471_v3 = vphi %v523_v3, %v265_v3   ;;  %v467_v2 = vphi %v521_v2, %v268_v2   ;;  %v463_v1 = vphi %v519_v1, %v282_v1   ;;  %v459_v0 = vphi %v517_v0, %v285_v0  }
   0x2   : > { %352 = vmatprep.subr.mxu0 %v477_v5  ;;  %363 = vmatprep.subr.mxu1 %v477_v5  ;;  %v151_v7 = vld [vmem:[%s629_s4 + $0x18] sm:$0xff]  ;;  %v150_v9 = vld [vmem:[%s629_s4 + $0x10] sm:$0xff]  ;;  %v43_v10 = vld [vmem:[%s628_s3] sm:$0xff]  ;;  %vm50_vm1 = vcmask 261120   ;;  %s571_s15 = sshll.u32 %s475_s21, 1  ;;  %s32_s16 = ssub.s32 15, %s475_s21 }
   0x3   : > { %48 = vrot.lane.b32.xlu0 %v471_v3, %s478_s28  ;;  %353 = vmatpush3.msra.mxu0 %v46_v4  ;;  %v149_v11 = vld [vmem:[%s629_s4 + $0x8] sm:$0xff]  ;;  %v148_v12 = vld [vmem:[%s629_s4] sm:$0xff]  ;;  %s39_s19 = scalar_lea.vmem %s625_s0, %s571_s15  ;;  %s578_s20 = sshll.u32 %s32_s16, 1  ;;  %v480_v23 = vmov 0   ;;  %vm291_vm2 = vcmask 254976  }
   0x4   : > { %354 = vmatprep.subr.mxu0 %v477_v5  ;;  %364 = vmatpush3.msra.mxu1 %v151_v7  ;;  %v40_v15 = vld [vmem:[%s39_s19] sm:$0x3]  ;;  %s41_s24 = scalar_lea.vmem %s626_s1, %s578_s20  ;;  %s481_s25 = smov 64  }
   0x5   : > { %355 = vmatpush3.msra.mxu0 %v45_v6  ;;  %365 = vmatprep.subr.mxu1 %v477_v5  ;;  %v42_v19 = vld [vmem:[%s41_s24] sm:$0x3]  ;;  %s34_s29 = scalar_lea.vmem %s627_s2, %s571_s15  ;;  %s37_s8 = scalar_lea.vmem %s627_s2, %s578_s20 }
   0x6   : > { %356 = vmatprep.subr.mxu0 %v477_v5  ;;  %360 = vmatprep.mubr.msk.f32.mxu0 %vm479_vm0, %v477_v5  ;;  %v35_v37 = vld [vmem:[%s34_s29] sm:$0x3]  ;;  %s297_s13 = scalar_lea.vmem %s631_s6, %s578_s20  ;;  %s27_s21 = sadd.s32 1, %s475_s21  }
   0x7   : > { %153 = vrot.lane.b32.xlu0 %v463_v1, %s478_s28  ;;  %357 = vmatpush3.msra.mxu0 %v44_v8  ;;  %v38_v39 = vld [vmem:[%s37_s8] sm:$0x3]  ;;  %v258_v47 = vsub.f32 1.0, %v35_v37  ;;  %p24_p0 = scmp.ge.s32.totalorder %s27_s21, 16  }
   0x8   : > { %358 = vmatprep.subr.mxu0 %v477_v5  ;;  %366 = vmatpush3.msra.mxu1 %v150_v9  ;;  %v275_v49 = vsub.f32 1.0, %v38_v39 }
   0x9   : > { %359 = vmatpush3.msra.mxu0 %v43_v10  ;;  %367 = vmatprep.subr.mxu1 %v477_v5 }
   0xa   : > { %368 = vmatpush3.msra.mxu1 %v149_v11  ;;  %371 = vmatprep.mubr.msk.f32.mxu1 %vm479_vm0, %v477_v5 }
   0xb   : > { %369 = vmatprep.subr.mxu1 %v477_v5  ;;  %419 = vset.pattern.permute.xlu0 %v480_v23 }
   0xc   : > { %370 = vmatpush3.msra.mxu1 %v148_v12  ;;  %420 = vset.pattern.permute.xlu1 %v480_v23 }
  0x75   : > { %v49_v13 = vpop.permute.xlu0 %48 }
  0x76   : > { %361 = vmatmul.mubr.msk.f32.vlgmr.msra.gmra.mxu0 %vm50_vm1, %v49_v13 }
  0x79   : > { %v154_v14 = vpop.permute.xlu0 %153 }
  0x7a   : > { %372 = vmatmul.mubr.msk.f32.vlgmr.msra.gmra.mxu1 %vm50_vm1, %v154_v14 }
 0x136   : > { %v119_v16 = vpop.f32.mrf.mxu0 }
 0x137   : > { %v123_v17 = vadd.f32 %v119_v16, %v40_v15 }
 0x138   : > { %v362_v18 = vpop.f32.mrf.mxu0 }
 0x139   : > { %421 = vtanh.f32 %v123_v17  ;;  %v339_v26 = vmul.f32 -1.442695, %v123_v17 }
 0x13a   : > { %v223_v20 = vpop.f32.mrf.mxu1 }
 0x13b   : > { %v227_v21 = vadd.f32 %v223_v20, %v42_v19 }
 0x13c   : > { %v373_v22 = vpop.f32.mrf.mxu1 }
 0x13d   : > { %423 = vtanh.f32 %v227_v21  ;;  %v341_v27 = vmul.f32 -1.442695, %v227_v21 }
 0x13e   : > { %425 = vpow2.f32 %v339_v26 }
 0x13f   : > { %427 = vpow2.f32 %v341_v27 }
 0x146   : > { %v422_v24 = vpop.eup %421 }
 0x147   : > { %133 = vrot.lane.b32.xlu1 %v422_v24, %s481_s25 }
 0x14a   : > { %v424_v25 = vpop.eup %423 }
 0x14b   : > { %237 = vrot.lane.b32.xlu1 %v424_v25, %s481_s25  ;;  %v426_v28 = vpop.eup %425 }
 0x14c   : > { %v127_v29 = vadd.f32 1.0, %v426_v28  ;;  %v428_v30 = vpop.eup %427 }
 0x14d   : > { %v231_v31 = vadd.f32 1.0, %v428_v30 }
 0x14e   : > { %429 = vrcp.f32 %v127_v29 }
 0x14f   : > { %431 = vrcp.f32 %v231_v31 }
 0x15b   : > { %v430_v32 = vpop.eup %429 }
 0x15c   : > { %v432_v35 = vpop.eup %431  ;;  %v131_v40 = vmul.f32 %v467_v2, %v430_v32 }
 0x15d   : > { %v235_v43 = vmul.f32 %v459_v0, %v432_v35 }
 0x1b9   : > { %v134_v33 = vpop.permute.xlu1 %133 }
 0x1ba   : > { %v136_v34 = vmul.f32 %v430_v32, %v134_v33 }
 0x1bc   : > { %138 = vrot.lane.b32.xlu0 %v136_v34, %s478_s28 }
 0x1bd   : > { %v238_v36 = vpop.permute.xlu1 %237 }
 0x1be   : > { %v240_v38 = vmul.f32 %v432_v35, %v238_v36 }
 0x1c0   : > { %254 = vperm.xlu0 %419, %v35_v37   ;;  %242 = vrot.lane.b32.xlu1 %v240_v38, %s478_s28 }
 0x1c4   : > { %271 = vperm.xlu1 %420, %v38_v39  }
 0x22e   : > { %v139_v41 = vpop.permute.xlu0 %138 }
 0x22f   : > { %v141_v42 = vadd.f32 %v139_v41, %v131_v40 }
 0x231   : > { %433 = vtanh.f32 %v141_v42 }
 0x232   : > { %v243_v44 = vpop.permute.xlu1 %242 }
 0x233   : > { %v245_v45 = vadd.f32 %v243_v44, %v235_v43 }
 0x235   : > { %435 = vtanh.f32 %v245_v45 }
 0x23b   : > { %v255_v51 = vpop.permute.xlu0 %254 }
 0x23c   : > { %v266_v59 = vmul.f32 %v255_v51, %v141_v42 }
 0x23e   : > { %v434_v46 = vpop.eup %433 }
 0x23f   : > { %144 = vrot.lane.b32.xlu1 %v434_v46, %s481_s25  ;;  %v272_v50 = vpop.permute.xlu1 %271 }
 0x240   : > { %v283_v63 = vmul.f32 %v272_v50, %v245_v45 }
 0x242   : > { %v436_v48 = vpop.eup %435 }
 0x243   : > { %261 = vperm.xlu1 %420, %v258_v47   ;;  %248 = vrot.lane.b32.xlu0 %v436_v48, %s481_s25 }
 0x247   : > { %278 = vperm.xlu0 %419, %v275_v49  }
 0x2b1   : > { %v145_v52 = vpop.permute.xlu1 %144 }
 0x2b2   : > { %v147_v53 = vmul.f32 %v430_v32, %v145_v52 }
 0x2b4   : > { %v257_v54 = vmul.f32 %v255_v51, %v147_v53 }
 0x2b5   : > { %v249_v55 = vpop.permute.xlu0 %248 }
 0x2b6   : > { %v251_v56 = vmul.f32 %v432_v35, %v249_v55  ;;  %287 = vrot.lane.b32.xlu1 %v257_v54, %s478_s28 }
 0x2b8   : > { %v274_v57 = vmul.f32 %v272_v50, %v251_v56 }
 0x2ba   : > { %294 = vrot.lane.b32.xlu0 %v274_v57, %s478_s28  ;;  %s290_s28 = scalar_lea.vmem %s630_s5, %s571_s15 }
 0x2be   : > { %v262_v58 = vpop.permute.xlu1 %261 }
 0x2bf   : > { %v264_v60 = vmul.f32 %v471_v3, %v262_v58  ;;  %v267_v61 = vmul.f32 %v467_v2, %v262_v58 }
 0x2c1   : > { %v265_v3 = vadd.f32 %v264_v60, %v257_v54   ;;  %v268_v2 = vadd.f32 %v267_v61, %v266_v59  }
 0x2c2   : > { %v279_v62 = vpop.permute.xlu0 %278 }
 0x2c3   : > { %v281_v4 = vmul.f32 %v463_v1, %v279_v62  ;;  %v284_v5 = vmul.f32 %v459_v0, %v279_v62 }
 0x2c5   : > { %v282_v1 = vadd.f32 %v281_v4, %v274_v57   ;;  %v285_v0 = vadd.f32 %v284_v5, %v283_v63  }
 0x328   : > { %v288_v6 = vpop.permute.xlu1 %287 }
 0x329   : > { %292 = vst.msk [vmem:[%s290_s28] sm:$0x3] %vm291_vm2, %v288_v6  ;;  %26 = sbr.rel (!%p24_p0) target bundleno = 1 (0x1), region = 61 }
 0x32c   : > { %v295_v7 = vpop.permute.xlu0 %294 }
 0x32d   : > { %298 = vst.msk [vmem:[%s297_s13] sm:$0x3] %vm291_vm2, %v295_v7 }

// kernel: docqa_forward.35
= control target key start
LH: loop header
LB: loop body
LE: loop exit
PB: predicated region body
PF: predicated region fallthrough
CT: control target
= control target key end

     0   :  { %v97_v0 = vmov 0.0   ;;  %vm98_vm0 = vmmov 0   ;;  %vm31_vm1 = vcmask 261120   ;;  %s146_s1 = inlined_call_operand.vmem [shape: f32[32,32], index: 1, kind: input, shape index: {}]   ;;  %s147_s0 = inlined_call_operand.vmem [shape: f32[16,32], index: 0, kind: input, shape index: {}]   ;;  %s148_s2 = inlined_call_operand.vmem [shape: f32[1,32], index: 2, kind: input, shape index: {}]   ;;  %s149_s3 = inlined_call_operand.vmem [shape: f32[16,32], index: 3, kind: output, shape index: {}]  }
   0x1   :  { %87 = vmatprep.subr.bf16.mxu0 %v97_v0  ;;  %v20_v1 = vld [vmem:[%s146_s1 + $0x10] sm:$0xff]  ;;  %v21_v2 = vld [vmem:[%s146_s1 + $0x18] sm:$0xff]  ;;  %v18_v3 = vld [vmem:[%s146_s1] sm:$0xff]  ;;  %91 = vmatprep.mubr.msk.bf16.mxu0 %vm98_vm0, %v97_v0 }
   0x2   :  { %v23_v4 = vpack.c.bf16 %v21_v2, %v20_v1  ;;  %v19_v5 = vld [vmem:[%s146_s1 + $0x8] sm:$0xff]  ;;  %v15_v7 = vld [vmem:[%s147_s0] sm:$0xff] }
   0x3   :  { %v22_v6 = vpack.c.bf16 %v19_v5, %v18_v3  ;;  %v16_v8 = vld [vmem:[%s147_s0 + $0x8] sm:$0xff]  ;;  %v82_v10 = vld [vmem:[%s148_s2] ss:$0 sm:$0xff] }
   0x4   :  { %88 = vmatpush3.bf16.msra.mxu0 %v23_v4  ;;  %v17_v9 = vpack.c.bf16 %v16_v8, %v15_v7 }
   0x5   :  { %89 = vmatprep.subr.bf16.mxu0 %v97_v0 }
   0x8   :  { %90 = vmatpush3.bf16.msra.mxu0 %v22_v6 }
   0xb   :  { %92 = vmatmul.mubr.msk.bf16.vlgmr.msra.gmra.mxu0 %vm31_vm1, %v17_v9 }
  0xcb   :  { %v69_v11 = vpop.f32.mrf.mxu0 }
  0xcc   :  { %v70_v12 = vadd.f32 %v82_v10, %v69_v11 }
  0xcd   :  { %v93_v13 = vpop.f32.mrf.mxu0 }
  0xce   :  { %76 = vst.msk [vmem:[%s149_s3] sm:$0xff] %vm31_vm1, %v70_v12 }
  0xcf   :  { %v72_v14 = vpop.f32.mrf.mxu0 }
  0xd0   :  { %v73_v15 = vadd.f32 %v82_v10, %v72_v14 }
  0xd1   :  { %v94_v16 = vpop.f32.mrf.mxu0 }
  0xd2   :  { %77 = vst.msk [vmem:[%s149_s3 + $0x8] sm:$0xff] %vm31_vm1, %v73_v15 }

// kernel: docqa_forward.36
= control target key start
LH: loop header
LB: loop body
LE: loop exit
PB: predicated region body
PF: predicated region fallthrough
CT: control target
= control target key end

     0   :  { %v138_v0 = vmov 0.0   ;;  %vm139_vm0 = vmmov 0   ;;  %vm31_vm1 = vcmask 261120   ;;  %s191_s1 = inlined_call_operand.vmem [shape: f32[32,64], index: 1, kind: input, shape index: {}]   ;;  %s192_s0 = inlined_call_operand.vmem [shape: f32[16,32], index: 0, kind: input, shape index: {}]   ;;  %s193_s2 = inlined_call_operand.vmem [shape: f32[1,64], index: 2, kind: input, shape index: {}]   ;;  %s194_s3 = inlined_call_operand.vmem [shape: f32[16,32], index: 3, kind: output, shape index: {}]  }
   0x1   :  { %119 = vmatprep.subr.bf16.mxu0 %v138_v0  ;;  %v20_v1 = vld [vmem:[%s191_s1 + $0x10] sm:$0xff]  ;;  %v21_v2 = vld [vmem:[%s191_s1 + $0x18] sm:$0xff]  ;;  %v18_v3 = vld [vmem:[%s191_s1] sm:$0xff]  ;;  %123 = vmatprep.mubr.msk.bf16.mxu0 %vm139_vm0, %v138_v0 }
   0x2   :  { %v23_v4 = vpack.c.bf16 %v21_v2, %v20_v1  ;;  %v19_v5 = vld [vmem:[%s191_s1 + $0x8] sm:$0xff]  ;;  %v15_v7 = vld [vmem:[%s192_s0] sm:$0xff]  ;;  %s140_s1 = smov 96  }
   0x3   :  { %v22_v6 = vpack.c.bf16 %v19_v5, %v18_v3  ;;  %v16_v8 = vld [vmem:[%s192_s0 + $0x8] sm:$0xff]  ;;  %v112_v10 = vld [vmem:[%s193_s2] ss:$0 sm:$0xff] }
   0x4   :  { %120 = vmatpush3.bf16.msra.mxu0 %v23_v4  ;;  %v17_v9 = vpack.c.bf16 %v16_v8, %v15_v7 }
   0x5   :  { %121 = vmatprep.subr.bf16.mxu0 %v138_v0 }
   0x8   :  { %122 = vmatpush3.bf16.msra.mxu0 %v22_v6 }
   0xb   :  { %124 = vmatmul.mubr.msk.bf16.vlgmr.msra.gmra.mxu0 %vm31_vm1, %v17_v9 }
  0xcb   :  { %v69_v11 = vpop.f32.mrf.mxu0 }
  0xcc   :  { %v70_v12 = vadd.f32 %v112_v10, %v69_v11 }
  0xcd   :  { %v125_v13 = vpop.f32.mrf.mxu0 }
  0xce   :  { %v88_v14 = vmax.f32 %v70_v12, 0.0  ;;  %v114_v19 = vmul.f32 -1.442695, %v70_v12 }
  0xcf   :  { %v72_v15 = vpop.f32.mrf.mxu0 }
  0xd0   :  { %v73_v16 = vadd.f32 %v112_v10, %v72_v15  ;;  %92 = vrot.lane.b32.xlu0 %v88_v14, %s140_s1  ;;  %130 = vpow2.f32 %v114_v19 }
  0xd1   :  { %v126_v17 = vpop.f32.mrf.mxu0 }
  0xd2   :  { %v89_v18 = vmax.f32 %v73_v16, 0.0  ;;  %v115_v20 = vmul.f32 -1.442695, %v73_v16 }
  0xd4   :  { %94 = vrot.lane.b32.xlu0 %v89_v18, %s140_s1  ;;  %132 = vpow2.f32 %v115_v20 }
  0xdd   :  { %v131_v21 = vpop.eup %130 }
  0xde   :  { %v82_v22 = vadd.f32 1.0, %v131_v21 }
  0xe0   :  { %134 = vrcp.f32 %v82_v22 }
  0xe1   :  { %v133_v23 = vpop.eup %132 }
  0xe2   :  { %v83_v24 = vadd.f32 1.0, %v133_v23 }
  0xe4   :  { %136 = vrcp.f32 %v83_v24 }
  0xed   :  { %v135_v25 = vpop.eup %134 }
  0xee   :  { %v100_v26 = vsub.f32 1.0, %v135_v25 }
  0xf0   :  { %v102_v30 = vmul.f32 %v100_v26, %v15_v7 }
  0xf1   :  { %v137_v27 = vpop.eup %136 }
  0xf2   :  { %v101_v31 = vsub.f32 1.0, %v137_v27 }
  0xf4   :  { %v103_v35 = vmul.f32 %v101_v31, %v16_v8 }
 0x142   :  { %v93_v28 = vpop.permute.xlu0 %92 }
 0x143   :  { %v98_v29 = vmul.f32 %v135_v25, %v93_v28 }
 0x145   :  { %v104_v32 = vadd.f32 %v102_v30, %v98_v29 }
 0x146   :  { %v95_v33 = vpop.permute.xlu0 %94 }
 0x147   :  { %106 = vst.msk [vmem:[%s194_s3] sm:$0xff] %vm31_vm1, %v104_v32  ;;  %v99_v34 = vmul.f32 %v137_v27, %v95_v33 }
 0x149   :  { %v105_v36 = vadd.f32 %v103_v35, %v99_v34 }
 0x14b   :  { %107 = vst.msk [vmem:[%s194_s3 + $0x8] sm:$0xff] %vm31_vm1, %v105_v36 }

// kernel: docqa_forward.41
= control target key start
LH: loop header
LB: loop body
LE: loop exit
PB: predicated region body
PF: predicated region fallthrough
CT: control target
= control target key end

     0   :  { %v97_v0 = vmov 0.0   ;;  %vm98_vm0 = vmmov 0   ;;  %vm31_vm1 = vcmask 261120   ;;  %s146_s1 = inlined_call_operand.vmem [shape: f32[32,128], index: 1, kind: input, shape index: {}]   ;;  %s147_s0 = inlined_call_operand.vmem [shape: f32[16,32], index: 0, kind: input, shape index: {}]   ;;  %s148_s2 = inlined_call_operand.vmem [shape: f32[1,128], index: 2, kind: input, shape index: {}]   ;;  %s149_s3 = inlined_call_operand.vmem [shape: f32[16,128], index: 3, kind: output, shape index: {}]  }
   0x1   :  { %87 = vmatprep.subr.bf16.mxu0 %v97_v0  ;;  %v20_v1 = vld [vmem:[%s146_s1 + $0x10] sm:$0xff]  ;;  %v21_v2 = vld [vmem:[%s146_s1 + $0x18] sm:$0xff]  ;;  %v18_v3 = vld [vmem:[%s146_s1] sm:$0xff]  ;;  %91 = vmatprep.mubr.msk.bf16.mxu0 %vm98_vm0, %v97_v0 }
   0x2   :  { %v23_v4 = vpack.c.bf16 %v21_v2, %v20_v1  ;;  %v19_v5 = vld [vmem:[%s146_s1 + $0x8] sm:$0xff]  ;;  %v15_v7 = vld [vmem:[%s147_s0] sm:$0xff] }
   0x3   :  { %v22_v6 = vpack.c.bf16 %v19_v5, %v18_v3  ;;  %v16_v8 = vld [vmem:[%s147_s0 + $0x8] sm:$0xff]  ;;  %v82_v10 = vld [vmem:[%s148_s2] ss:$0 sm:$0xff] }
   0x4   :  { %88 = vmatpush3.bf16.msra.mxu0 %v23_v4  ;;  %v17_v9 = vpack.c.bf16 %v16_v8, %v15_v7 }
   0x5   :  { %89 = vmatprep.subr.bf16.mxu0 %v97_v0 }
   0x8   :  { %90 = vmatpush3.bf16.msra.mxu0 %v22_v6 }
   0xb   :  { %92 = vmatmul.mubr.msk.bf16.vlgmr.msra.gmra.mxu0 %vm31_vm1, %v17_v9 }
  0xcb   :  { %v69_v11 = vpop.f32.mrf.mxu0 }
  0xcc   :  { %v70_v12 = vadd.f32 %v82_v10, %v69_v11 }
  0xcd   :  { %v93_v13 = vpop.f32.mrf.mxu0 }
  0xce   :  { %76 = vst [vmem:[%s149_s3] sm:$0xff] %v70_v12 }
  0xcf   :  { %v72_v14 = vpop.f32.mrf.mxu0 }
  0xd0   :  { %v73_v15 = vadd.f32 %v82_v10, %v72_v14 }
  0xd1   :  { %v94_v16 = vpop.f32.mrf.mxu0 }
  0xd2   :  { %77 = vst [vmem:[%s149_s3 + $0x8] sm:$0xff] %v73_v15 }

// kernel: docqa_forward.43
= control target key start
LH: loop header
LB: loop body
LE: loop exit
PB: predicated region body
PF: predicated region fallthrough
CT: control target
= control target key end

     0   :  { %v517_v0 = vmov 0.0   ;;  %v519_v1 = vmov 0.0   ;;  %v521_v2 = vmov 0.0   ;;  %v523_v3 = vmov 0.0   ;;  %s525_s21 = smov 0   ;;  %s625_s0 = inlined_call_operand.vmem [shape: f32[8,2,128], index: 0, kind: input, shape index: {}]   ;;  %s626_s1 = inlined_call_operand.vmem [shape: f32[8,2,128], index: 1, kind: input, shape index: {}]   ;;  %s627_s2 = inlined_call_operand.vmem [shape: f32[8,2,1], index: 2, kind: input, shape index: {}]   ;;  %s628_s3 = inlined_call_operand.vmem [shape: f32[32,128], index: 3, kind: input, shape index: {}]   ;;  %s629_s4 = inlined_call_operand.vmem [shape: f32[32,128], index: 4, kind: input, shape index: {}]   ;;  %s630_s5 = inlined_call_operand.vmem [shape: f32[8,2,32], index: 5, kind: output, shape index: {0}]   ;;  %s631_s6 = inlined_call_operand.vmem [shape: f32[8,2,32], index: 6, kind: output, shape index: {1}]  }
   0x1 LB: > { %v46_v4 = vld [vmem:[%s628_s3 + $0x18] sm:$0xff]  ;;  %v477_v5 = vmov 0.0   ;;  %v45_v6 = vld [vmem:[%s628_s3 + $0x10] sm:$0xff]  ;;  %s478_s28 = smov 32   ;;  %v44_v8 = vld [vmem:[%s628_s3 + $0x8] sm:$0xff]  ;;  %vm479_vm0 = vmmov 0   ;;  %s475_s21 = sphi %s525_s21, %s27_s21   ;;  %v471_v3 = vphi %v523_v3, %v265_v3   ;;  %v467_v2 = vphi %v521_v2, %v268_v2   ;;  %v463_v1 = vphi %v519_v1, %v282_v1   ;;  %v459_v0 = vphi %v517_v0, %v285_v0  }
   0x2   : > { %352 = vmatprep.subr.mxu0 %v477_v5  ;;  %363 = vmatprep.subr.mxu1 %v477_v5  ;;  %v151_v7 = vld [vmem:[%s629_s4 + $0x18] sm:$0xff]  ;;  %v150_v9 = vld [vmem:[%s629_s4 + $0x10] sm:$0xff]  ;;  %v43_v10 = vld [vmem:[%s628_s3] sm:$0xff]  ;;  %vm50_vm1 = vcmask 261120   ;;  %s571_s15 = sshll.u32 %s475_s21, 1  ;;  %s32_s16 = ssub.s32 7, %s475_s21 }
   0x3   : > { %48 = vrot.lane.b32.xlu0 %v471_v3, %s478_s28  ;;  %353 = vmatpush3.msra.mxu0 %v46_v4  ;;  %v149_v11 = vld [vmem:[%s629_s4 + $0x8] sm:$0xff]  ;;  %v148_v12 = vld [vmem:[%s629_s4] sm:$0xff]  ;;  %s39_s19 = scalar_lea.vmem %s625_s0, %s571_s15  ;;  %s578_s20 = sshll.u32 %s32_s16, 1  ;;  %v480_v23 = vmov 0   ;;  %vm291_vm2 = vcmask 254976  }
   0x4   : > { %354 = vmatprep.subr.mxu0 %v477_v5  ;;  %364 = vmatpush3.msra.mxu1 %v151_v7  ;;  %v40_v15 = vld [vmem:[%s39_s19] sm:$0x3]  ;;  %s41_s24 = scalar_lea.vmem %s626_s1, %s578_s20  ;;  %s481_s25 = smov 64  }
   0x5   : > { %355 = vmatpush3.msra.mxu0 %v45_v6  ;;  %365 = vmatprep.subr.mxu1 %v477_v5  ;;  %v42_v19 = vld [vmem:[%s41_s24] sm:$0x3]  ;;  %s34_s29 = scalar_lea.vmem %s627_s2, %s571_s15  ;;  %s37_s8 = scalar_lea.vmem %s627_s2, %s578_s20 }
   0x6   : > { %356 = vmatprep.subr.mxu0 %v477_v5  ;;  %360 = vmatprep.mubr.msk.f32.mxu0 %vm479_vm0, %v477_v5  ;;  %v35_v37 = vld [vmem:[%s34_s29] sm:$0x3]  ;;  %s297_s13 = scalar_lea.vmem %s631_s6, %s578_s20  ;;  %s27_s21 = sadd.s32 1, %s475_s21  }
   0x7   : > { %153 = vrot.lane.b32.xlu0 %v463_v1, %s478_s28  ;;  %357 = vmatpush3.msra.mxu0 %v44_v8  ;;  %v38_v39 = vld [vmem:[%s37_s8] sm:$0x3]  ;;  %v258_v47 = vsub.f32 1.0, %v35_v37  ;;  %p24_p0 = scmp.ge.s32.totalorder %s27_s21, 8  }
   0x8   : > { %358 = vmatprep.subr.mxu0 %v477_v5  ;;  %366 = vmatpush3.msra.mxu1 %v150_v9  ;;  %v275_v49 = vsub.f32 1.0, %v38_v39 }
   0x9   : > { %359 = vmatpush3.msra.mxu0 %v43_v10  ;;  %367 = vmatprep.subr.mxu1 %v477_v5 }
   0xa   : > { %368 = vmatpush3.msra.mxu1 %v149_v11  ;;  %371 = vmatprep.mubr.msk.f32.mxu1 %vm479_vm0, %v477_v5 }
   0xb   : > { %369 = vmatprep.subr.mxu1 %v477_v5  ;;  %419 = vset.pattern.permute.xlu0 %v480_v23 }
   0xc   : > { %370 = vmatpush3.msra.mxu1 %v148_v12  ;;  %420 = vset.pattern.permute.xlu1 %v480_v23 }
  0x75   : > { %v49_v13 = vpop.permute.xlu0 %48 }
  0x76   : > { %361 = vmatmul.mubr.msk.f32.vlgmr.msra.gmra.mxu0 %vm50_vm1, %v49_v13 }
  0x79   : > { %v154_v14 = vpop.permute.xlu0 %153 }
  0x7a   : > { %372 = vmatmul.mubr.msk.f32.vlgmr.msra.gmra.mxu1 %vm50_vm1, %v154_v14 }
 0x136   : > { %v119_v16 = vpop.f32.mrf.mxu0 }
 0x137   : > { %v123_v17 = vadd.f32 %v119_v16, %v40_v15 }
 0x138   : > { %v362_v18 = vpop.f32.mrf.mxu0 }
 0x139   : > { %421 = vtanh.f32 %v123_v17  ;;  %v339_v26 = vmul.f32 -1.442695, %v123_v17 }
 0x13a   : > { %v223_v20 = vpop.f32.mrf.mxu1 }
 0x13b   : > { %v227_v21 = vadd.f32 %v223_v20, %v42_v19 }
 0x13c   : > { %v373_v22 = vpop.f32.mrf.mxu1 }
 0x13d   : > { %423 = vtanh.f32 %v227_v21  ;;  %v341_v27 = vmul.f32 -1.442695, %v227_v21 }
 0x13e   : > { %425 = vpow2.f32 %v339_v26 }
 0x13f   : > { %427 = vpow2.f32 %v341_v27 }
 0x146   : > { %v422_v24 = vpop.eup %421 }
 0x147   : > { %133 = vrot.lane.b32.xlu1 %v422_v24, %s481_s25 }
 0x14a   : > { %v424_v25 = vpop.eup %423 }
 0x14b   : > { %237 = vrot.lane.b32.xlu1 %v424_v25, %s481_s25  ;;  %v426_v28 = vpop.eup %425 }
 0x14c   : > { %v127_v29 = vadd.f32 1.0, %v426_v28  ;;  %v428_v30 = vpop.eup %427 }
 0x14d   : > { %v231_v31 = vadd.f32 1.0, %v428_v30 }
 0x14e   : > { %429 = vrcp.f32 %v127_v29 }
 0x14f   : > { %431 = vrcp.f32 %v231_v31 }
 0x15b   : > { %v430_v32 = vpop.eup %429 }
 0x15c   : > { %v432_v35 = vpop.eup %431  ;;  %v131_v40 = vmul.f32 %v467_v2, %v430_v32 }
 0x15d   : > { %v235_v43 = vmul.f32 %v459_v0, %v432_v35 }
 0x1b9   : > { %v134_v33 = vpop.permute.xlu1 %133 }
 0x1ba   : > { %v136_v34 = vmul.f32 %v430_v32, %v134_v33 }
 0x1bc   : > { %138 = vrot.lane.b32.xlu0 %v136_v34, %s478_s28 }
 0x1bd   : > { %v238_v36 = vpop.permute.xlu1 %237 }
 0x1be   : > { %v240_v38 = vmul.f32 %v432_v35, %v238_v36 }
 0x1c0   : > { %254 = vperm.xlu0 %419, %v35_v37   ;;  %242 = vrot.lane.b32.xlu1 %v240_v38, %s478_s28 }
 0x1c4   : > { %271 = vperm.xlu1 %420, %v38_v39  }
 0x22e   : > { %v139_v41 = vpop.permute.xlu0 %138 }
 0x22f   : > { %v141_v42 = vadd.f32 %v139_v41, %v131_v40 }
 0x231   : > { %433 = vtanh.f32 %v141_v42 }
 0x232   : > { %v243_v44 = vpop.permute.xlu1 %242 }
 0x233   : > { %v245_v45 = vadd.f32 %v243_v44, %v235_v43 }
 0x235   : > { %435 = vtanh.f32 %v245_v45 }
 0x23b   : > { %v255_v51 = vpop.permute.xlu0 %254 }
 0x23c   : > { %v266_v59 = vmul.f32 %v255_v51, %v141_v42 }
 0x23e   : > { %v434_v46 = vpop.eup %433 }
 0x23f   : > { %144 = vrot.lane.b32.xlu1 %v434_v46, %s481_s25  ;;  %v272_v50 = vpop.permute.xlu1 %271 }
 0x240   : > { %v283_v63 = vmul.f32 %v272_v50, %v245_v45 }
 0x242   : > { %v436_v48 = vpop.eup %435 }
 0x243   : > { %261 = vperm.xlu1 %420, %v258_v47   ;;  %248 = vrot.lane.b32.xlu0 %v436_v48, %s481_s25 }
 0x247   : > { %278 = vperm.xlu0 %419, %v275_v49  }
 0x2b1   : > { %v145_v52 = vpop.permute.xlu1 %144 }
 0x2b2   : > { %v147_v53 = vmul.f32 %v430_v32, %v145_v52 }
 0x2b4   : > { %v257_v54 = vmul.f32 %v255_v51, %v147_v53 }
 0x2b5   : > { %v249_v55 = vpop.permute.xlu0 %248 }
 0x2b6   : > { %v251_v56 = vmul.f32 %v432_v35, %v249_v55  ;;  %287 = vrot.lane.b32.xlu1 %v257_v54, %s478_s28 }
 0x2b8   : > { %v274_v57 = vmul.f32 %v272_v50, %v251_v56 }
 0x2ba   : > { %294 = vrot.lane.b32.xlu0 %v274_v57, %s478_s28  ;;  %s290_s28 = scalar_lea.vmem %s630_s5, %s571_s15 }
 0x2be   : > { %v262_v58 = vpop.permute.xlu1 %261 }
 0x2bf   : > { %v264_v60 = vmul.f32 %v471_v3, %v262_v58  ;;  %v267_v61 = vmul.f32 %v467_v2, %v262_v58 }
 0x2c1   : > { %v265_v3 = vadd.f32 %v264_v60, %v257_v54   ;;  %v268_v2 = vadd.f32 %v267_v61, %v266_v59  }
 0x2c2   : > { %v279_v62 = vpop.permute.xlu0 %278 }
 0x2c3   : > { %v281_v4 = vmul.f32 %v463_v1, %v279_v62  ;;  %v284_v5 = vmul.f32 %v459_v0, %v279_v62 }
 0x2c5   : > { %v282_v1 = vadd.f32 %v281_v4, %v274_v57   ;;  %v285_v0 = vadd.f32 %v284_v5, %v283_v63  }
 0x328   : > { %v288_v6 = vpop.permute.xlu1 %287 }
 0x329   : > { %292 = vst.msk [vmem:[%s290_s28] sm:$0x3] %vm291_vm2, %v288_v6  ;;  %26 = sbr.rel (!%p24_p0) target bundleno = 1 (0x1), region = 61 }
 0x32c   : > { %v295_v7 = vpop.permute.xlu0 %294 }
 0x32d   : > { %298 = vst.msk [vmem:[%s297_s13] sm:$0x3] %vm291_vm2, %v295_v7 }

// kernel: docqa_forward.45
= control target key start
LH: loop header
LB: loop body
LE: loop exit
PB: predicated region body
PF: predicated region fallthrough
CT: control target
= control target key end

     0   :  { %vm131_vm0 = vcmask 261120   ;;  %s340_s1 = inlined_call_operand.vmem [shape: f32[256,32], index: 1, kind: input, shape index: {}]   ;;  %s341_s0 = inlined_call_operand.vmem [shape: f32[32,256], index: 0, kind: input, shape index: {}]   ;;  %s342_s2 = inlined_call_operand.vmem [shape: f32[1,32], index: 2, kind: input, shape index: {}]   ;;  %s343_s3 = inlined_call_operand.vmem [shape: f32[32,32], index: 3, kind: output, shape index: {}]  }
   0x1   :  { %v57_v0 = vld [vmem:[%s340_s1 + $0xf0] sm:$0xff]  ;;  %v58_v1 = vld [vmem:[%s340_s1 + $0xf8] sm:$0xff]  ;;  %v55_v5 = vld [vmem:[%s340_s1 + $0xe0] sm:$0xff] }
   0x2   :  { %v41_v2 = vld [vmem:[%s340_s1 + $0x70] sm:$0xff]  ;;  %v74_v3 = vpack.c.bf16 %v58_v1, %v57_v0  ;;  %v42_v4 = vld [vmem:[%s340_s1 + $0x78] sm:$0xff]  ;;  %v56_v6 = vld [vmem:[%s340_s1 + $0xe8] sm:$0xff] }
   0x3   :  { %v66_v7 = vpack.c.bf16 %v42_v4, %v41_v2  ;;  %v73_v8 = vpack.c.bf16 %v56_v6, %v55_v5  ;;  %v39_v9 = vld [vmem:[%s340_s1 + $0x60] sm:$0xff]  ;;  %v40_v10 = vld [vmem:[%s340_s1 + $0x68] sm:$0xff]  ;;  %v53_v11 = vld [vmem:[%s340_s1 + $0xd0] sm:$0xff] }
   0x4   :  { %141 = vmatprep.subr.bf16.mxu0 %v74_v3  ;;  %169 = vmatprep.subr.bf16.mxu1 %v74_v3  ;;  %v54_v12 = vld [vmem:[%s340_s1 + $0xd8] sm:$0xff]  ;;  %v65_v13 = vpack.c.bf16 %v40_v10, %v39_v9  ;;  %v37_v15 = vld [vmem:[%s340_s1 + $0x50] sm:$0xff]  ;;  %v51_v17 = vld [vmem:[%s340_s1 + $0xc0] sm:$0xff] }
   0x5   :  { %142 = vmatpush3.bf16.msra.mxu0 %v66_v7  ;;  %177 = vmatpush3.bf16.msra.mxu1 %v66_v7  ;;  %v72_v14 = vpack.c.bf16 %v54_v12, %v53_v11  ;;  %v38_v16 = vld [vmem:[%s340_s1 + $0x58] sm:$0xff]  ;;  %v52_v18 = vld [vmem:[%s340_s1 + $0xc8] sm:$0xff]  ;;  %v35_v21 = vld [vmem:[%s340_s1 + $0x40] sm:$0xff] }
   0x6   :  { %143 = vmatprep.subr.bf16.mxu0 %v73_v8  ;;  %170 = vmatprep.subr.bf16.mxu1 %v73_v8  ;;  %v64_v19 = vpack.c.bf16 %v38_v16, %v37_v15  ;;  %v71_v20 = vpack.c.bf16 %v52_v18, %v51_v17  ;;  %v36_v22 = vld [vmem:[%s340_s1 + $0x48] sm:$0xff]  ;;  %v49_v23 = vld [vmem:[%s340_s1 + $0xb0] sm:$0xff]  ;;  %v50_v24 = vld [vmem:[%s340_s1 + $0xb8] sm:$0xff] }
   0x7   :  { %v16_v25 = vld [vmem:[%s341_s0 + $0x8] sm:$0xff]  ;;  %v18_v26 = vld [vmem:[%s341_s0 + $0x18] sm:$0xff]  ;;  %v63_v29 = vpack.c.bf16 %v36_v22, %v35_v21  ;;  %v70_v32 = vpack.c.bf16 %v50_v24, %v49_v23  ;;  %v33_v33 = vld [vmem:[%s340_s1 + $0x30] sm:$0xff] }
   0x8   :  { %v20_v27 = vld [vmem:[%s341_s0 + $0x28] sm:$0xff]  ;;  %v22_v28 = vld [vmem:[%s341_s0 + $0x38] sm:$0xff]  ;;  %v24_v30 = vpack.c.bf16 %v18_v26, %v16_v25  ;;  %v47_v35 = vld [vmem:[%s340_s1 + $0xa0] sm:$0xff] }
   0x9   :  { %144 = vmatpush3.bf16.msra.mxu0 %v65_v13  ;;  %178 = vmatpush3.bf16.msra.mxu1 %v65_v13  ;;  %v26_v31 = vpack.c.bf16 %v22_v28, %v20_v27  ;;  %v34_v34 = vld [vmem:[%s340_s1 + $0x38] sm:$0xff]  ;;  %v48_v36 = vld [vmem:[%s340_s1 + $0xa8] sm:$0xff]  ;;  %v31_v39 = vld [vmem:[%s340_s1 + $0x20] sm:$0xff] }
   0xa   :  { %145 = vmatprep.subr.bf16.mxu0 %v72_v14  ;;  %171 = vmatprep.subr.bf16.mxu1 %v72_v14  ;;  %v62_v37 = vpack.c.bf16 %v34_v34, %v33_v33  ;;  %v69_v38 = vpack.c.bf16 %v48_v36, %v47_v35  ;;  %v32_v40 = vld [vmem:[%s340_s1 + $0x28] sm:$0xff]  ;;  %v45_v41 = vld [vmem:[%s340_s1 + $0x90] sm:$0xff]  ;;  %v46_v42 = vld [vmem:[%s340_s1 + $0x98] sm:$0xff] }
   0xb   :  { %114 = vmatprep.mubr.bf16.mxu0 %v24_v30  ;;  %122 = vmatprep.mubr.bf16.mxu1 %v26_v31  ;;  %v61_v43 = vpack.c.bf16 %v32_v40, %v31_v39  ;;  %v68_v44 = vpack.c.bf16 %v46_v42, %v45_v41  ;;  %v29_v45 = vld [vmem:[%s340_s1 + $0x10] sm:$0xff]  ;;  %v30_v46 = vld [vmem:[%s340_s1 + $0x18] sm:$0xff]  ;;  %v43_v47 = vld [vmem:[%s340_s1 + $0x80] sm:$0xff] }
   0xc   :  { %v44_v48 = vld [vmem:[%s340_s1 + $0x88] sm:$0xff]  ;;  %v60_v49 = vpack.c.bf16 %v30_v46, %v29_v45  ;;  %v27_v51 = vld [vmem:[%s340_s1] sm:$0xff]  ;;  %v17_v55 = vld [vmem:[%s341_s0 + $0x10] sm:$0xff] }
   0xd   :  { %146 = vmatpush3.bf16.msra.mxu0 %v64_v19  ;;  %179 = vmatpush3.bf16.msra.mxu1 %v64_v19  ;;  %v67_v50 = vpack.c.bf16 %v44_v48, %v43_v47  ;;  %v28_v52 = vld [vmem:[%s340_s1 + $0x8] sm:$0xff]  ;;  %v15_v53 = vld [vmem:[%s341_s0] sm:$0xff]  ;;  %v21_v57 = vld [vmem:[%s341_s0 + $0x30] sm:$0xff] }
   0xe   :  { %147 = vmatprep.subr.bf16.mxu0 %v71_v20  ;;  %172 = vmatprep.subr.bf16.mxu1 %v71_v20  ;;  %v59_v54 = vpack.c.bf16 %v28_v52, %v27_v51  ;;  %v19_v56 = vld [vmem:[%s341_s0 + $0x20] sm:$0xff]  ;;  %v23_v58 = vpack.c.bf16 %v17_v55, %v15_v53 }
   0xf   :  { %v25_v59 = vpack.c.bf16 %v21_v57, %v19_v56  ;;  %v140_v62 = vld [vmem:[%s342_s2] ss:$0 sm:$0xff] }
  0x11   :  { %148 = vmatpush3.bf16.msra.mxu0 %v63_v29  ;;  %180 = vmatpush3.bf16.msra.mxu1 %v63_v29 }
  0x12   :  { %149 = vmatprep.subr.bf16.mxu0 %v70_v32  ;;  %173 = vmatprep.subr.bf16.mxu1 %v70_v32 }
  0x15   :  { %150 = vmatpush3.bf16.msra.mxu0 %v62_v37  ;;  %181 = vmatpush3.bf16.msra.mxu1 %v62_v37 }
  0x16   :  { %151 = vmatprep.subr.bf16.mxu0 %v69_v38  ;;  %174 = vmatprep.subr.bf16.mxu1 %v69_v38 }
  0x19   :  { %152 = vmatpush3.bf16.msra.mxu0 %v61_v43  ;;  %182 = vmatpush3.bf16.msra.mxu1 %v61_v43 }
  0x1a   :  { %153 = vmatprep.subr.bf16.mxu0 %v68_v44  ;;  %175 = vmatprep.subr.bf16.mxu1 %v68_v44 }
  0x1d   :  { %154 = vmatpush3.bf16.msra.mxu0 %v60_v49  ;;  %183 = vmatpush3.bf16.msra.mxu1 %v60_v49 }
  0x1e   :  { %155 = vmatprep.subr.bf16.mxu0 %v67_v50  ;;  %176 = vmatprep.subr.bf16.mxu1 %v67_v50 }
  0x21   :  { %156 = vmatpush3.bf16.msra.mxu0 %v59_v54  ;;  %184 = vmatpush3.bf16.msra.mxu1 %v59_v54 }
  0x24   :  { %115 = vmatmul.mubr.bf16.vlgmr.msra.gmra.mxu0 %v23_v58  ;;  %123 = vmatmul.mubr.bf16.vlgmr.msra.gmra.mxu1 %v25_v59 }
  0xe4   :  { %v157_v60 = vpop.f32.mrf.mxu0  ;;  %v163_v61 = vpop.f32.mrf.mxu1 }
  0xe6   :  { %v158_v63 = vpop.f32.mrf.mxu0  ;;  %v164_v0 = vpop.f32.mrf.mxu1 }
  0xe7   :  { %v159_v1 = vadd.f32 %v158_v63, %v157_v60  ;;  %v165_v2 = vadd.f32 %v164_v0, %v163_v61 }
  0xe8   :  { %v160_v3 = vpop.f32.mrf.mxu0  ;;  %v166_v4 = vpop.f32.mrf.mxu1 }
  0xe9   :  { %v117_v5 = vadd.f32 %v159_v1, %v140_v62  ;;  %v125_v6 = vadd.f32 %v165_v2, %v140_v62 }
  0xea   :  { %v161_v7 = vpop.f32.mrf.mxu0  ;;  %v167_v8 = vpop.f32.mrf.mxu1 }
  0xeb   :  { %132 = vst.msk [vmem:[%s343_s3] sm:$0xff] %vm131_vm0, %v117_v5  ;;  %134 = vst.msk [vmem:[%s343_s3 + $0x10] sm:$0xff] %vm131_vm0, %v125_v6  ;;  %v162_v9 = vadd.f32 %v161_v7, %v160_v3  ;;  %v168_v10 = vadd.f32 %v167_v8, %v166_v4 }
  0xed   :  { %v120_v11 = vadd.f32 %v162_v9, %v140_v62  ;;  %v128_v12 = vadd.f32 %v168_v10, %v140_v62 }
  0xef   :  { %133 = vst.msk [vmem:[%s343_s3 + $0x8] sm:$0xff] %vm131_vm0, %v120_v11  ;;  %135 = vst.msk [vmem:[%s343_s3 + $0x18] sm:$0xff] %vm131_vm0, %v128_v12 }

// kernel: docqa_forward.50
= control target key start
LH: loop header
LB: loop body
LE: loop exit
PB: predicated region body
PF: predicated region fallthrough
CT: control target
= control target key end

     0   :  { %vm40_vm0 = vcmask 523264   ;;  %s198_s1 = inlined_call_operand.vmem [shape: f32[64,128], index: 1, kind: input, shape index: {}]   ;;  %s199_s0 = inlined_call_operand.vmem [shape: f32[32,64], index: 0, kind: input, shape index: {}]   ;;  %s200_s2 = inlined_call_operand.vmem [shape: f32[1,128], index: 2, kind: input, shape index: {}]   ;;  %s201_s3 = inlined_call_operand.vmem [shape: f32[32,128], index: 3, kind: output, shape index: {}]  }
   0x1   :  { %v27_v0 = vld [vmem:[%s198_s1 + $0x30] sm:$0xff]  ;;  %v28_v1 = vld [vmem:[%s198_s1 + $0x38] sm:$0xff]  ;;  %v25_v2 = vld [vmem:[%s198_s1 + $0x20] sm:$0xff] }
   0x2   :  { %v32_v3 = vpack.c.bf16 %v28_v1, %v27_v0  ;;  %v26_v4 = vld [vmem:[%s198_s1 + $0x28] sm:$0xff]  ;;  %v23_v6 = vld [vmem:[%s198_s1 + $0x10] sm:$0xff]  ;;  %v24_v7 = vld [vmem:[%s198_s1 + $0x18] sm:$0xff] }
   0x3   :  { %v31_v5 = vpack.c.bf16 %v26_v4, %v25_v2  ;;  %v15_v8 = vld [vmem:[%s199_s0] sm:$0xff]  ;;  %v16_v9 = vld [vmem:[%s199_s0 + $0x8] sm:$0xff]  ;;  %v30_v11 = vpack.c.bf16 %v24_v7, %v23_v6  ;;  %v17_v15 = vld [vmem:[%s199_s0 + $0x10] sm:$0xff] }
   0x4   :  { %113 = vmatprep.subr.bf16.mxu0 %v32_v3  ;;  %v19_v10 = vpack.c.bf16 %v16_v9, %v15_v8  ;;  %v21_v12 = vld [vmem:[%s198_s1] sm:$0xff]  ;;  %v22_v13 = vld [vmem:[%s198_s1 + $0x8] sm:$0xff]  ;;  %v18_v16 = vld [vmem:[%s199_s0 + $0x18] sm:$0xff] }
   0x5   :  { %114 = vmatpush3.bf16.msra.mxu0 %v32_v3  ;;  %v29_v14 = vpack.c.bf16 %v22_v13, %v21_v12  ;;  %v20_v17 = vpack.c.bf16 %v18_v16, %v17_v15  ;;  %v104_v18 = vld [vmem:[%s200_s2] ss:$0 sm:$0xff] }
   0x6   :  { %115 = vmatprep.subr.bf16.mxu0 %v31_v5  ;;  %121 = vmatprep.mubr.msk.bf16.mxu0 %vm40_vm0, %v19_v10 }
   0x9   :  { %116 = vmatpush3.bf16.msra.mxu0 %v31_v5 }
   0xa   :  { %117 = vmatprep.subr.bf16.mxu0 %v30_v11 }
   0xd   :  { %118 = vmatpush3.bf16.msra.mxu0 %v30_v11 }
   0xe   :  { %119 = vmatprep.subr.bf16.mxu0 %v29_v14 }
  0x11   :  { %120 = vmatpush3.bf16.msra.mxu0 %v29_v14 }
  0x14   :  { %122 = vmatmul.mubr.msk.bf16.vlgmr.msra.gmra.mxu0 %vm40_vm0, %v20_v17 }
  0xd4   :  { %v123_v19 = vpop.f32.mrf.mxu0 }
  0xd5   :  { %v90_v20 = vadd.f32 %v123_v19, %v104_v18 }
  0xd6   :  { %v81_v21 = vpop.f32.mrf.mxu0 }
  0xd7   :  { %98 = vst [vmem:[%s201_s3 + $0x10] sm:$0xff] %v90_v20  ;;  %v82_v22 = vadd.f32 %v104_v18, %v81_v21 }
  0xd8   :  { %v124_v23 = vpop.f32.mrf.mxu0 }
  0xd9   :  { %96 = vst [vmem:[%s201_s3] sm:$0xff] %v82_v22  ;;  %v93_v24 = vadd.f32 %v124_v23, %v104_v18 }
  0xda   :  { %v84_v25 = vpop.f32.mrf.mxu0 }
  0xdb   :  { %99 = vst [vmem:[%s201_s3 + $0x18] sm:$0xff] %v93_v24  ;;  %v85_v26 = vadd.f32 %v104_v18, %v84_v25 }
  0xdd   :  { %97 = vst [vmem:[%s201_s3 + $0x8] sm:$0xff] %v85_v26 }

// kernel: docqa_forward.44
= control target key start
LH: loop header
LB: loop body
LE: loop exit
PB: predicated region body
PF: predicated region fallthrough
CT: control target
= control target key end

     0   :  { %s1045_s29 = smov 0   ;;  %s1147_s0 = inlined_call_operand.vmem [shape: f32[2,16,64], index: 0, kind: input, shape index: {}]   ;;  %s1148_s1 = inlined_call_operand.vmem [shape: f32[2,8,64], index: 1, kind: input, shape index: {}]   ;;  %s1149_s2 = inlined_call_operand.vmem [shape: f32[2,16,1], index: 2, kind: input, shape index: {}]   ;;  %s1150_s3 = inlined_call_operand.vmem [shape: f32[2,1,8], index: 3, kind: input, shape index: {}]   ;;  %s1151_s4 = inlined_call_operand.vmem [shape: f32[1,64], index: 4, kind: input, shape index: {}]   ;;  %s1152_s5 = inlined_call_operand.vmem [shape: f32[1,64], index: 5, kind: input, shape index: {}]   ;;  %s1153_s6 = inlined_call_operand.vmem [shape: f32[1,64], index: 6, kind: input, shape index: {}]   ;;  %s1154_s7 = inlined_call_operand.<no memory space> [shape: f32[1,1], index: 7, kind: input, shape index: {}]   ;;  %s1155_s8 = inlined_call_operand.vmem [shape: f32[2,16,256], index: 8, kind: output, shape index: {}]  }
   0x1   :  { %v13_v0 = vstv %s1154_s7 }
   0x2   :  { %14 = vst [vmem:[#allocation2] sm:$0x1] %v13_v0 }
   0x3 LB: > { %s890_s30 = sadd.s32 4294967295, %s991_s29   ;;  %p894_p0 = scmp.ge.s32.totalorder %s991_s29, 1  ;;  %s991_s29 = sphi %s1045_s29, %s20_s29  }
   0x4   : > { %p291_p1 = scmp.lt.s32.totalorder %s991_s29, 3 }
   0x6   : > { %p292_p2 = pnand %p894_p0, %p291_p1 }
   0x7   : > { %p337_p3 = scmp.lt.s32.totalorder (!%p292_p2), %s890_s30, 1 }
   0x8   : > { %295 = sbr.rel (%p292_p2) target bundleno = 1245 (0x4dd), region = 52 }
   0xd   : > { %s1157_s30 = smov (!%p337_p3, %s890_s30), 1  ;;  %v902_v3 = vld [vmem:[%s1151_s4] ss:$0 sm:$0xff]  ;;  %vm377_vm0 = vcmask 523264   ;;  %v993_v5 = vmov 0.0   ;;  %vm994_vm1 = vmmov 0   ;;  %v515_v33 = vlaneseq }
   0xe   : > { %s897_s7 = sshll.u32 %s1157_s30, 3  ;;  %s911_s12 = sshll.u32 %s1157_s30, 4  ;;  %925 = vmatprep.subr.bf16.mxu0 %v993_v5  ;;  %937 = vmatprep.subr.bf16.mxu1 %v993_v5  ;;  %v903_v10 = vld [vmem:[%s1152_s5] ss:$0 sm:$0xff]  ;;  %v995_v31 = vmov 0   ;;  %vm537_vm4 = vcmask 64512  }
   0xf   : > { %s345_s11 = scalar_lea.vmem %s1148_s1, %s897_s7  ;;  %s341_s15 = scalar_lea.vmem %s1147_s0, %s911_s12  ;;  %933 = vmatprep.mubr.msk.bf16.mxu0 %vm994_vm1, %v993_v5  ;;  %939 = vmatprep.mubr.msk.bf16.mxu1 %vm994_vm1, %v993_v5  ;;  %v523_v13 = vld [vmem:[#allocation2] sm:$0x1]  ;;  %v516_v34 = vshrl.u32 %v515_v33, 7  ;;  %vm606_vm9 = vcmask 1043456   ;;  %vm685_vm10 = vcmask 130048  }
  0x10   : > { %v1059_v1 = vld [vmem:[%s345_s11] sm:$0xff]  ;;  %v1077_v7 = vld [vmem:[%s341_s15 + $0x8] sm:$0xff]  ;;  %955 = vpush %v523_v13  ;;  %s353_s24 = scalar_lea.vmem %s1150_s3, %s1157_s30  ;;  %s350_s28 = scalar_lea.vmem %s1149_s2, %s911_s12 }
  0x11   : > { %403 = vxpose.xlu0.b32.start.end [1/1] (short) (narrow) %v1059_v1, 64  ;;  %v1068_v2 = vld [vmem:[%s341_s15] sm:$0xff]  ;;  %v376_v8 = vmul.f32 %v902_v3, %v1077_v7  ;;  %v390_v11 = vmul.f32 %v903_v10, %v1059_v1  ;;  %v517_v37 = vsub.s32 0, %v516_v34  ;;  %v364_v57 = vld [vmem:[%s350_s28 + $0x8] sm:$0xff]  ;;  %s996_s7 = smov 64   ;;  %s913_s9 = sshll.u32 %s1157_s30, 5 }
  0x12   : > { %v375_v4 = vmul.f32 %v902_v3, %v1068_v2  ;;  %v904_v24 = vld [vmem:[%s1153_s6] ss:$0 sm:$0xff]  ;;  %vm561_vm5 = vcmp.gt.f32.partialorder %v364_v57, 0.0  ;;  %s358_s12 = scalar_lea.vmem %s1155_s8, %s913_s9 }
  0x13   : > { %v381_v9 = vsel %vm377_vm0, %v376_v8, 0.0  ;;  %v391_v12 = vsel %vm377_vm0, %v390_v11, 0.0  ;;  %v400_v26 = vmul.f32 %v904_v24, %v1068_v2  ;;  %v401_v27 = vmul.f32 %v904_v24, %v1077_v7  ;;  %v365_v36 = vld [vmem:[%s353_s24] sm:$0x1] }
  0x14   : > { %v378_v6 = vsel %vm377_vm0, %v375_v4, 0.0  ;;  %vm528_vm2 = vcmp.gt.f32.partialorder %v365_v36, 0.0  ;;  %v563_v58 = vsel %vm561_vm5, 1, %v995_v31  ;;  %v363_v59 = vld [vmem:[%s350_s28] sm:$0xff] }
  0x15   : > { %379 = vadd.xlane.f32.xlu1 %v378_v6  ;;  %v402_v29 = vpack.c.bf16 %v401_v27, %v400_v26  ;;  %v529_v40 = vsel %vm528_vm2, 1, %v995_v31  ;;  %vm560_vm6 = vcmp.gt.f32.partialorder %v363_v59, 0.0 }
  0x16   : > { %v533_v41 = vrot.slane %v529_v40, %v517_v37  ;;  %v562_v60 = vsel %vm560_vm6, 1, %v995_v31 }
  0x18   : > { %vm534_vm3 = vcmp.eq.s32.totalorder %v533_v41, 1 }
  0x19   : > { %382 = vadd.xlane.f32.xlu1 %v381_v9 }
  0x3a   : > { %969 = vset.pattern.permute.xlu0 %v995_v31 }
  0x41   : > { %s956_s25 = spop %955 }
  0x42   : > { %v525_v44 = vstv %s956_s25 }
  0x5a   : > { %392 = vadd.xlane.f32.xlu0 %v391_v12 }
  0x8d   : > { %v419_v14 = vpop.trf.xlu0 }
  0x91   : > { %v420_v15 = vpop.trf.xlu0 }
  0x92   : > { %v435_v28 = vpack.c.bf16 %v420_v15, %v419_v14 }
  0x95   : > { %v421_v16 = vpop.trf.xlu0 }
  0x99   : > { %v422_v17 = vpop.trf.xlu0 }
  0x9a   : > { %v436_v25 = vpack.c.bf16 %v422_v17, %v421_v16 }
  0x9d   : > { %v423_v18 = vpop.trf.xlu0 }
  0x9e   : > { %v380_v32 = vpop.xlane.xlu1 %379 }
  0xa1   : > { %v424_v19 = vpop.trf.xlu0 }
  0xa2   : > { %v437_v23 = vpack.c.bf16 %v424_v19, %v423_v18  ;;  %v383_v35 = vpop.xlane.xlu1 %382 }
  0xa5   : > { %v425_v20 = vpop.trf.xlu0 }
  0xa9   : > { %v426_v21 = vpop.trf.xlu0 }
  0xaa   : > { %v438_v22 = vpack.c.bf16 %v426_v21, %v425_v20 }
  0xac   : > { %926 = vmatpush3.bf16.msra.mxu0 %v438_v22 }
  0xad   : > { %927 = vmatprep.subr.bf16.mxu0 %v993_v5 }
  0xb0   : > { %928 = vmatpush3.bf16.msra.mxu0 %v437_v23 }
  0xb1   : > { %929 = vmatprep.subr.bf16.mxu0 %v993_v5 }
  0xb4   : > { %930 = vmatpush3.bf16.msra.mxu0 %v436_v25 }
  0xb5   : > { %931 = vmatprep.subr.bf16.mxu0 %v993_v5 }
  0xb8   : > { %932 = vmatpush3.bf16.msra.mxu0 %v435_v28  ;;  %v602_v28 = vpack.c.bf16 %v1059_v1, %v1059_v1 }
  0xbb   : > { %934 = vmatmul.mubr.msk.bf16.vlgmr.msra.gmra.mxu0 %vm377_vm0, %v402_v29  ;;  %v608_v29 = vsel %vm606_vm9, %v602_v28, 0 }
  0xbc   : > { %938 = vmatpush3.bf16.msra.mxu1 %v608_v29 }
  0xbd   : > { %943 = vmatprep.subr.bf16.mxu1 %v993_v5 }
  0xe3   : > { %v393_v30 = vpop.xlane.xlu0 %392 }
  0xe4   : > { %483 = vxpose.xlu1.b32.start.end [1/1] (short) (narrow) %v393_v30, 8 }
 0x102   : > { %970 = vset.pattern.permute.xlu1 %v995_v31 }
 0x160   : > { %v499_v38 = vpop.trf.xlu1 }
 0x161   : > { %v518_v39 = vrot.slane %v499_v38, %v517_v37 }
 0x163   : > { %v519_v42 = vadd.f32 %v518_v39, %v380_v32  ;;  %v520_v48 = vadd.f32 %v518_v39, %v383_v35 }
 0x17b   : > { %v476_v43 = vpop.f32.mrf.mxu0 }
 0x17c   : > { %v521_v45 = vadd.f32 %v519_v42, %v476_v43 }
 0x17d   : > { %v935_v46 = vpop.f32.mrf.mxu0 }
 0x17e   : > { %v526_v47 = vadd.f32 %v525_v44, %v521_v45 }
 0x17f   : > { %v479_v49 = vpop.f32.mrf.mxu0 }
 0x180   : > { %v522_v50 = vadd.f32 %v520_v48, %v479_v49  ;;  %v535_v51 = vsel %vm534_vm3, %v526_v47, -1e+30  ;;  %v684_v49 = vpack.c.bf16 %v1077_v7, %v1068_v2 }
 0x181   : > { %v936_v52 = vpop.f32.mrf.mxu0  ;;  %v538_v53 = vsel %vm537_vm4, %v535_v51, -inf }
 0x182   : > { %v527_v54 = vadd.f32 %v525_v44, %v522_v50  ;;  %539 = vmax.xlane.f32.xlu1 %v538_v53 }
 0x184   : > { %v536_v55 = vsel %vm534_vm3, %v527_v54, -1e+30 }
 0x185   : > { %v541_v56 = vsel %vm537_vm4, %v536_v55, -inf }
 0x186   : > { %542 = vmax.xlane.f32.xlu0 %v541_v56 }
 0x193   : > { %568 = vperm.xlu1 %970, %v563_v58  }
 0x19c   : > { %565 = vperm.xlu0 %969, %v562_v60  }
 0x20b   : > { %v540_v61 = vpop.xlane.xlu1 %539 }
 0x20c   : > { %v544_v62 = vsub.f32 %v535_v51, %v540_v61 }
 0x20e   : > { %v546_v63 = vmul.f32 1.442695, %v544_v62 }
 0x20f   : > { %v543_v0 = vpop.xlane.xlu0 %542  ;;  %v569_v4 = vpop.permute.xlu1 %568 }
 0x210   : > { %971 = vpow2.f32 %v546_v63  ;;  %v545_v3 = vsub.f32 %v536_v55, %v543_v0  ;;  %vm571_vm7 = vcmp.eq.s32.totalorder %v569_v4, 1 }
 0x211   : > { %v573_v8 = vsel %vm571_vm7, %v527_v54, -1e+30 }
 0x212   : > { %v548_v6 = vmul.f32 1.442695, %v545_v3  ;;  %v575_v11 = vsel %vm537_vm4, %v573_v8, -inf }
 0x214   : > { %973 = vpow2.f32 %v548_v6 }
 0x217   : > { %v566_v9 = vpop.permute.xlu0 %565 }
 0x218   : > { %vm570_vm8 = vcmp.eq.s32.totalorder %v566_v9, 1 }
 0x219   : > { %v572_v10 = vsel %vm570_vm8, %v526_v47, -1e+30 }
 0x21a   : > { %v574_v12 = vsel %vm537_vm4, %v572_v10, -inf }
 0x21b   : > { %v576_v13 = vmax.f32 %v574_v12, %v575_v11 }
 0x21d   : > { %v972_v14 = vpop.eup %971  ;;  %v577_v15 = vrot.slane %v576_v13, 4 }
 0x21e   : > { %v550_v16 = vsel %vm537_vm4, %v972_v14, 0.0 }
 0x21f   : > { %v578_v17 = vmax.f32 %v576_v13, %v577_v15  ;;  %551 = vadd.xlane.f32.xlu1 %v550_v16 }
 0x221   : > { %v974_v18 = vpop.eup %973  ;;  %v579_v19 = vrot.slane %v578_v17, 2 }
 0x222   : > { %v553_v20 = vsel %vm537_vm4, %v974_v18, 0.0 }
 0x223   : > { %v580_v21 = vmax.f32 %v578_v17, %v579_v19  ;;  %554 = vadd.xlane.f32.xlu0 %v553_v20 }
 0x225   : > { %v581_v22 = vrot.slane %v580_v21, 1 }
 0x227   : > { %v582_v23 = vmax.f32 %v580_v21, %v581_v22 }
 0x229   : > { %v583_v24 = vsub.f32 %v572_v10, %v582_v23  ;;  %v584_v25 = vsub.f32 %v573_v8, %v582_v23 }
 0x22b   : > { %v585_v26 = vmul.f32 1.442695, %v583_v24  ;;  %v587_v27 = vmul.f32 1.442695, %v584_v25 }
 0x22d   : > { %975 = vpow2.f32 %v585_v26 }
 0x22e   : > { %977 = vpow2.f32 %v587_v27 }
 0x23a   : > { %v976_v30 = vpop.eup %975 }
 0x23b   : > { %v978_v31 = vpop.eup %977  ;;  %v589_v32 = vsel %vm537_vm4, %v976_v30, 0.0 }
 0x23c   : > { %v590_v33 = vsel %vm537_vm4, %v978_v31, 0.0 }
 0x23d   : > { %v591_v34 = vadd.f32 %v590_v33, %v589_v32 }
 0x23f   : > { %v592_v35 = vrot.slane %v591_v34, 4 }
 0x241   : > { %v593_v36 = vadd.f32 %v592_v35, %v591_v34 }
 0x243   : > { %v594_v37 = vrot.slane %v593_v36, 2 }
 0x245   : > { %v595_v38 = vadd.f32 %v594_v37, %v593_v36 }
 0x247   : > { %v596_v39 = vrot.slane %v595_v38, 1 }
 0x249   : > { %v597_v1 = vadd.f32 %v596_v39, %v595_v38 }
 0x24b   : > { %979 = vrcp.f32 %v597_v1 }
 0x258   : > { %v980_v40 = vpop.eup %979 }
 0x259   : > { %v599_v41 = vmul.f32 %v980_v40, %v976_v30  ;;  %v600_v42 = vmul.f32 %v980_v40, %v978_v31 }
 0x25b   : > { %651 = vxpose.xlu1.b32.start [1/2] (short) (narrow) %v599_v41, 8 }
 0x25f   : > { %652 = vxpose.xlu1.b32.end [2/2] (short) (narrow) %v600_v42, 8 }
 0x2a8   : > { %v552_v43 = vpop.xlane.xlu1 %551 }
 0x2a9   : > { %981 = vrcp.f32 %v552_v43 }
 0x2ac   : > { %v555_v44 = vpop.xlane.xlu0 %554 }
 0x2ad   : > { %983 = vrcp.f32 %v555_v44 }
 0x2b6   : > { %v982_v45 = vpop.eup %981 }
 0x2b7   : > { %v558_v47 = vmul.f32 %v982_v45, %v972_v14 }
 0x2ba   : > { %v984_v46 = vpop.eup %983 }
 0x2bb   : > { %v559_v48 = vmul.f32 %v984_v46, %v974_v18 }
 0x2bd   : > { %v601_v50 = vpack.c.bf16 %v559_v48, %v558_v47 }
 0x2bf   : > { %940 = vmatmul.mubr.msk.bf16.vlgmr.msra.gmra.mxu1 %vm537_vm4, %v601_v50 }
 0x2c0   : > { %944 = vmatpush3.bf16.msra.mxu1 %v684_v49  ;;  %945 = vmatprep.mubr.msk.bf16.mxu1 %vm994_vm1, %v993_v5 }
 0x2c1   : > { %949 = vmatprep.subr.bf16.mxu1 %v993_v5 }
 0x2d7   : > { %v667_v51 = vpop.trf.xlu1 }
 0x2d8   : > { %v683_v52 = vpack.c.bf16 %v667_v51, %v667_v51 }
 0x2da   : > { %946 = vmatmul.mubr.msk.bf16.vlgmr.msra.gmra.mxu1 %vm685_vm10, %v683_v52 }
 0x2db   : > { %951 = vmatprep.mubr.msk.bf16.mxu1 %vm994_vm1, %v993_v5 }
 0x37f   : > { %v644_v53 = vpop.f32.mrf.mxu1 }
 0x380   : > { %780 = vrot.lane.b32.xlu0 %v644_v53, %s996_s7  ;;  %v774_v12 = vmul.f32 %v644_v53, %v1068_v2 }
 0x381   : > { %v941_v54 = vpop.f32.mrf.mxu1 }
 0x383   : > { %v647_v55 = vpop.f32.mrf.mxu1 }
 0x384   : > { %782 = vrot.lane.b32.xlu0 %v647_v55, %s996_s7  ;;  %v775_v15 = vmul.f32 %v647_v55, %v1077_v7 }
 0x385   : > { %v942_v56 = vpop.f32.mrf.mxu1 }
 0x39a   : > { %v723_v57 = vpop.f32.mrf.mxu1 }
 0x39b   : > { %v729_v58 = vpack.c.bf16 %v723_v57, %v723_v57 }
 0x39c   : > { %v947_v59 = vpop.f32.mrf.mxu1 }
 0x39d   : > { %v731_v60 = vsel %vm606_vm9, %v729_v58, 0 }
 0x39e   : > { %v726_v61 = vpop.f32.mrf.mxu1  ;;  %950 = vmatpush3.bf16.msra.mxu1 %v731_v60 }
 0x3a0   : > { %v948_v62 = vpop.f32.mrf.mxu1 }
 0x3a1   : > { %952 = vmatmul.mubr.msk.bf16.vlgmr.msra.gmra.mxu1 %vm537_vm4, %v601_v50 }
 0x3f2   : > { %v781_v5 = vpop.permute.xlu0 %780 }
 0x3f3   : > { %v794_v63 = vsel %vm377_vm0, %v1068_v2, %v781_v5 }
 0x3f4   : > { %798 = vst [vmem:[%s358_s12] sm:$0xff] %v794_v63 }
 0x3f6   : > { %v783_v0 = vpop.permute.xlu0 %782 }
 0x3f7   : > { %v795_v3 = vsel %vm377_vm0, %v1077_v7, %v783_v0 }
 0x3f8   : > { %800 = vst [vmem:[%s358_s12 + $0x10] sm:$0xff] %v795_v3 }
 0x461   : > { %v767_v4 = vpop.f32.mrf.mxu1 }
 0x462   : > { %v776_v6 = vmul.f32 %v767_v4, %v1068_v2 }
 0x463   : > { %v953_v8 = vpop.f32.mrf.mxu1 }
 0x464   : > { %788 = vrot.lane.b32.xlu0 %v776_v6, %s996_s7 }
 0x465   : > { %v770_v9 = vpop.f32.mrf.mxu1 }
 0x466   : > { %v777_v10 = vmul.f32 %v770_v9, %v1077_v7 }
 0x467   : > { %v954_v11 = vpop.f32.mrf.mxu1 }
 0x468   : > { %790 = vrot.lane.b32.xlu0 %v777_v10, %s996_s7 }
 0x4d6   : > { %v789_v13 = vpop.permute.xlu0 %788 }
 0x4d7   : > { %v796_v14 = vsel %vm377_vm0, %v774_v12, %v789_v13 }
 0x4d8   : > { %799 = vst [vmem:[%s358_s12 + $0x8] sm:$0xff] %v796_v14 }
 0x4da   : > { %v791_v16 = vpop.permute.xlu0 %790 }
 0x4db   : > { %v797_v17 = vsel %vm377_vm0, %v775_v15, %v791_v16 }
 0x4dc   : > { %801 = vst [vmem:[%s358_s12 + $0x18] sm:$0xff] %v797_v17 }
 0x4dd PF: > { %s20_s29 = sadd.s32 1, %s991_s29  }
 0x4de   : > { %p17_p4 = scmp.ge.s32.totalorder %s20_s29, 4  }
 0x4e0   :  { %19 = sbr.rel (!%p17_p4) target bundleno = 3 (0x3), region = 91 }

// kernel: docqa_forward.59
= control target key start
LH: loop header
LB: loop body
LE: loop exit
PB: predicated region body
PF: predicated region fallthrough
CT: control target
= control target key end

     0   :  { %vm46_vm0 = vcmask 785408   ;;  %s222_s1 = inlined_call_operand.vmem [shape: f32[96,128], index: 1, kind: input, shape index: {}]   ;;  %s223_s0 = inlined_call_operand.vmem [shape: f32[32,96], index: 0, kind: input, shape index: {}]   ;;  %s224_s2 = inlined_call_operand.vmem [shape: f32[1,128], index: 2, kind: input, shape index: {}]   ;;  %s225_s3 = inlined_call_operand.vmem [shape: f32[32,128], index: 3, kind: output, shape index: {}]  }
   0x1   :  { %v31_v0 = vld [vmem:[%s222_s1 + $0x50] sm:$0xff]  ;;  %v32_v1 = vld [vmem:[%s222_s1 + $0x58] sm:$0xff]  ;;  %v29_v2 = vld [vmem:[%s222_s1 + $0x40] sm:$0xff] }
   0x2   :  { %v38_v3 = vpack.c.bf16 %v32_v1, %v31_v0  ;;  %v30_v4 = vld [vmem:[%s222_s1 + $0x48] sm:$0xff]  ;;  %v27_v6 = vld [vmem:[%s222_s1 + $0x30] sm:$0xff]  ;;  %v28_v7 = vld [vmem:[%s222_s1 + $0x38] sm:$0xff] }
   0x3   :  { %v37_v5 = vpack.c.bf16 %v30_v4, %v29_v2  ;;  %v15_v8 = vld [vmem:[%s223_s0] sm:$0xff]  ;;  %v16_v9 = vld [vmem:[%s223_s0 + $0x8] sm:$0xff]  ;;  %v36_v10 = vpack.c.bf16 %v28_v7, %v27_v6  ;;  %v23_v15 = vld [vmem:[%s222_s1 + $0x10] sm:$0xff] }
   0x4   :  { %121 = vmatprep.subr.bf16.mxu0 %v38_v3  ;;  %v19_v11 = vpack.c.bf16 %v16_v9, %v15_v8  ;;  %v25_v12 = vld [vmem:[%s222_s1 + $0x20] sm:$0xff]  ;;  %v26_v13 = vld [vmem:[%s222_s1 + $0x28] sm:$0xff]  ;;  %v24_v16 = vld [vmem:[%s222_s1 + $0x18] sm:$0xff] }
   0x5   :  { %122 = vmatpush3.bf16.msra.mxu0 %v38_v3  ;;  %v35_v14 = vpack.c.bf16 %v26_v13, %v25_v12  ;;  %v34_v17 = vpack.c.bf16 %v24_v16, %v23_v15  ;;  %v21_v18 = vld [vmem:[%s222_s1] sm:$0xff]  ;;  %v22_v19 = vld [vmem:[%s222_s1 + $0x8] sm:$0xff]  ;;  %v17_v21 = vld [vmem:[%s223_s0 + $0x10] sm:$0xff] }
   0x6   :  { %123 = vmatprep.subr.bf16.mxu0 %v37_v5  ;;  %133 = vmatprep.mubr.msk.bf16.mxu0 %vm46_vm0, %v19_v11  ;;  %v33_v20 = vpack.c.bf16 %v22_v19, %v21_v18  ;;  %v18_v22 = vld [vmem:[%s223_s0 + $0x18] sm:$0xff]  ;;  %v110_v24 = vld [vmem:[%s224_s2] ss:$0 sm:$0xff] }
   0x7   :  { %v20_v23 = vpack.c.bf16 %v18_v22, %v17_v21 }
   0x9   :  { %124 = vmatpush3.bf16.msra.mxu0 %v37_v5 }
   0xa   :  { %125 = vmatprep.subr.bf16.mxu0 %v36_v10 }
   0xd   :  { %126 = vmatpush3.bf16.msra.mxu0 %v36_v10 }
   0xe   :  { %127 = vmatprep.subr.bf16.mxu0 %v35_v14 }
  0x11   :  { %128 = vmatpush3.bf16.msra.mxu0 %v35_v14 }
  0x12   :  { %129 = vmatprep.subr.bf16.mxu0 %v34_v17 }
  0x15   :  { %130 = vmatpush3.bf16.msra.mxu0 %v34_v17 }
  0x16   :  { %131 = vmatprep.subr.bf16.mxu0 %v33_v20 }
  0x19   :  { %132 = vmatpush3.bf16.msra.mxu0 %v33_v20 }
  0x1c   :  { %134 = vmatmul.mubr.msk.bf16.vlgmr.msra.gmra.mxu0 %vm46_vm0, %v20_v23 }
  0xdc   :  { %v135_v25 = vpop.f32.mrf.mxu0 }
  0xdd   :  { %v96_v26 = vadd.f32 %v135_v25, %v110_v24 }
  0xde   :  { %v87_v27 = vpop.f32.mrf.mxu0 }
  0xdf   :  { %104 = vst [vmem:[%s225_s3 + $0x10] sm:$0xff] %v96_v26  ;;  %v88_v28 = vadd.f32 %v110_v24, %v87_v27 }
  0xe0   :  { %v136_v29 = vpop.f32.mrf.mxu0 }
  0xe1   :  { %102 = vst [vmem:[%s225_s3] sm:$0xff] %v88_v28  ;;  %v99_v30 = vadd.f32 %v136_v29, %v110_v24 }
  0xe2   :  { %v90_v31 = vpop.f32.mrf.mxu0 }
  0xe3   :  { %105 = vst [vmem:[%s225_s3 + $0x18] sm:$0xff] %v99_v30  ;;  %v91_v32 = vadd.f32 %v110_v24, %v90_v31 }
  0xe5   :  { %103 = vst [vmem:[%s225_s3 + $0x8] sm:$0xff] %v91_v32 }

// kernel: docqa_forward.52
= control target key start
LH: loop header
LB: loop body
LE: loop exit
PB: predicated region body
PF: predicated region fallthrough
CT: control target
= control target key end

     0   :  { %s732_s23 = smov 0   ;;  %s802_s0 = inlined_call_operand.vmem [shape: f32[2,16,64], index: 0, kind: input, shape index: {}]   ;;  %s803_s1 = inlined_call_operand.vmem [shape: f32[2,1,16], index: 1, kind: input, shape index: {}]   ;;  %s804_s2 = inlined_call_operand.vmem [shape: f32[1,64], index: 2, kind: input, shape index: {}]   ;;  %s805_s3 = inlined_call_operand.vmem [shape: f32[1,64], index: 3, kind: input, shape index: {}]   ;;  %s806_s4 = inlined_call_operand.vmem [shape: f32[1,64], index: 4, kind: input, shape index: {}]   ;;  %s807_s5 = inlined_call_operand.<no memory space> [shape: f32[1,1], index: 5, kind: input, shape index: {}]   ;;  %s808_s6 = inlined_call_operand.vmem [shape: f32[2,16,256], index: 6, kind: output, shape index: {}]  }
   0x1   :  { %v11_v0 = vstv %s807_s5 }
   0x2   :  { %12 = vst [vmem:[#allocation2] sm:$0x1] %v11_v0 }
   0x3 LB: > { %s617_s24 = sadd.s32 4294967295, %s688_s23   ;;  %p621_p0 = scmp.ge.s32.totalorder %s688_s23, 1  ;;  %s688_s23 = sphi %s732_s23, %s18_s23  }
   0x4   : > { %p222_p1 = scmp.lt.s32.totalorder %s688_s23, 3 }
   0x6   : > { %p223_p2 = pnand %p621_p0, %p222_p1 }
   0x7   : > { %p255_p3 = scmp.lt.s32.totalorder (!%p223_p2), %s617_s24, 1  ;;  %s693_s14 = smov (!%p223_p2), 64  }
   0x8   : > { %226 = sbr.rel (%p223_p2) target bundleno = 1021 (0x3fd), region = 44 }
   0xd   : > { %s810_s24 = smov (!%p255_p3, %s617_s24), 1  ;;  %v627_v1 = vld [vmem:[%s805_s3] ss:$0 sm:$0xff]  ;;  %vm283_vm0 = vcmask 523264   ;;  %v690_v11 = vmov 0.0   ;;  %vm691_vm1 = vmmov 0   ;;  %v425_v33 = vlaneseq }
   0xe   : > { %s633_s5 = sshll.u32 %s810_s24, 4  ;;  %v626_v8 = vld [vmem:[%s804_s2] ss:$0 sm:$0xff]  ;;  %642 = vmatprep.subr.bf16.mxu0 %v690_v11  ;;  %654 = vmatprep.subr.bf16.mxu1 %v690_v11  ;;  %s262_s12 = scalar_lea.vmem %s803_s1, %s810_s24  ;;  %v692_v39 = vmov 0   ;;  %vm456_vm6 = vcmask 130048  }
   0xf   : > { %s259_s29 = scalar_lea.vmem %s802_s0, %s633_s5  ;;  %650 = vmatprep.mubr.msk.bf16.mxu0 %vm691_vm1, %v690_v11  ;;  %656 = vmatprep.mubr.msk.bf16.mxu1 %vm691_vm1, %v690_v11  ;;  %v433_v12 = vld [vmem:[#allocation2] sm:$0x1]  ;;  %v426_v36 = vshrl.u32 %v425_v33, 7  ;;  %v442_v43 = vand.u32 127, %v425_v33  ;;  %s634_s15 = sshll.u32 %s810_s24, 5 }
  0x10   : > { %v749_v2 = vld [vmem:[%s259_s29] sm:$0xff]  ;;  %v751_v3 = vld [vmem:[%s259_s29 + $0x8] sm:$0xff]  ;;  %660 = vpush %v433_v12  ;;  %s267_s18 = scalar_lea.vmem %s808_s6, %s634_s15 }
  0x11   : > { %313 = vxpose.xlu0.b32.start [1/2] (short) (narrow) %v749_v2, 64  ;;  %v296_v4 = vmul.f32 %v627_v1, %v749_v2  ;;  %v297_v5 = vmul.f32 %v627_v1, %v751_v3  ;;  %v282_v9 = vmul.f32 %v626_v8, %v751_v3  ;;  %v281_v13 = vmul.f32 %v626_v8, %v749_v2  ;;  %v628_v27 = vld [vmem:[%s806_s4] ss:$0 sm:$0xff] }
  0x12   : > { %v310_v29 = vmul.f32 %v628_v27, %v749_v2  ;;  %v311_v30 = vmul.f32 %v628_v27, %v751_v3  ;;  %v271_v35 = vld [vmem:[%s262_s12] sm:$0x1]  ;;  %v427_v37 = vsub.s32 0, %v426_v36  ;;  %vm444_vm3 = vcmp.ne.s32.totalorder %v426_v36, %v442_v43 }
  0x13   : > { %v298_v6 = vsel %vm283_vm0, %v296_v4, 0.0  ;;  %v301_v7 = vsel %vm283_vm0, %v297_v5, 0.0  ;;  %v287_v10 = vsel %vm283_vm0, %v282_v9, 0.0  ;;  %v284_v14 = vsel %vm283_vm0, %v281_v13, 0.0 }
  0x14   : > { %299 = vadd.xlane.f32.xlu1 %v298_v6  ;;  %v312_v32 = vpack.c.bf16 %v311_v30, %v310_v29  ;;  %vm443_vm2 = vcmp.gt.f32.partialorder %v271_v35, 0.0  ;;  %v440_v46 = vadd.s32 8, %v426_v36  ;;  %v480_v9 = vpack.c.bf16 %v751_v3, %v749_v2 }
  0x15   : > { %314 = vxpose.xlu0.b32.end [2/2] (short) (narrow) %v751_v3, 64  ;;  %v446_v40 = vsel %vm443_vm2, 1, %v692_v39 }
  0x16   : > { %v450_v44 = vrot.slane %v446_v40, %v427_v37  ;;  %vm445_vm7 = vcmp.ne.s32.totalorder %v440_v46, %v442_v43  ;;  %655 = vmatpush3.bf16.msra.mxu1 %v480_v9 }
  0x18   : > { %302 = vadd.xlane.f32.xlu1 %v301_v7  ;;  %vm451_vm4 = vcmp.eq.s32.totalorder %v450_v44, 1 }
  0x19   : > { %vm452_vm5 = vmand %vm451_vm4, %vm444_vm3 }
  0x1a   : > { %vm453_vm8 = vmand %vm451_vm4, %vm445_vm7 }
  0x1c   : > { %288 = vadd.xlane.f32.xlu1 %v287_v10 }
  0x41   : > { %s661_s13 = spop %660 }
  0x42   : > { %v435_v48 = vstv %s661_s13 }
  0x5a   : > { %285 = vadd.xlane.f32.xlu0 %v284_v14 }
  0x8d   : > { %v329_v15 = vpop.trf.xlu0 }
  0x91   : > { %v330_v16 = vpop.trf.xlu0 }
  0x92   : > { %v345_v31 = vpack.c.bf16 %v330_v16, %v329_v15 }
  0x95   : > { %v331_v17 = vpop.trf.xlu0 }
  0x99   : > { %v332_v18 = vpop.trf.xlu0 }
  0x9a   : > { %v346_v28 = vpack.c.bf16 %v332_v18, %v331_v17 }
  0x9d   : > { %v333_v19 = vpop.trf.xlu0  ;;  %v300_v20 = vpop.xlane.xlu1 %299 }
  0x9e   : > { %393 = vxpose.xlu1.b32.start [1/2] (short) (narrow) %v300_v20, 8 }
  0xa1   : > { %v334_v21 = vpop.trf.xlu0  ;;  %v303_v22 = vpop.xlane.xlu1 %302 }
  0xa2   : > { %394 = vxpose.xlu1.b32.end [2/2] (short) (narrow) %v303_v22, 8  ;;  %v347_v26 = vpack.c.bf16 %v334_v21, %v333_v19 }
  0xa5   : > { %v335_v23 = vpop.trf.xlu0  ;;  %v289_v34 = vpop.xlane.xlu1 %288 }
  0xa9   : > { %v336_v24 = vpop.trf.xlu0 }
  0xaa   : > { %v348_v25 = vpack.c.bf16 %v336_v24, %v335_v23 }
  0xac   : > { %643 = vmatpush3.bf16.msra.mxu0 %v348_v25 }
  0xad   : > { %644 = vmatprep.subr.bf16.mxu0 %v690_v11 }
  0xb0   : > { %645 = vmatpush3.bf16.msra.mxu0 %v347_v26 }
  0xb1   : > { %646 = vmatprep.subr.bf16.mxu0 %v690_v11 }
  0xb4   : > { %647 = vmatpush3.bf16.msra.mxu0 %v346_v28 }
  0xb5   : > { %648 = vmatprep.subr.bf16.mxu0 %v690_v11 }
  0xb8   : > { %649 = vmatpush3.bf16.msra.mxu0 %v345_v31 }
  0xbb   : > { %651 = vmatmul.mubr.msk.bf16.vlgmr.msra.gmra.mxu0 %vm283_vm0, %v312_v32 }
  0xe3   : > { %v286_v41 = vpop.xlane.xlu0 %285 }
 0x11a   : > { %v409_v38 = vpop.trf.xlu1 }
 0x11b   : > { %v428_v42 = vrot.slane %v409_v38, %v427_v37 }
 0x11d   : > { %v429_v45 = vadd.f32 %v428_v42, %v286_v41  ;;  %v430_v52 = vadd.f32 %v428_v42, %v289_v34 }
 0x17b   : > { %v386_v47 = vpop.f32.mrf.mxu0 }
 0x17c   : > { %v431_v49 = vadd.f32 %v429_v45, %v386_v47 }
 0x17d   : > { %v652_v50 = vpop.f32.mrf.mxu0 }
 0x17e   : > { %v436_v51 = vadd.f32 %v435_v48, %v431_v49 }
 0x17f   : > { %v389_v53 = vpop.f32.mrf.mxu0 }
 0x180   : > { %v432_v54 = vadd.f32 %v430_v52, %v389_v53  ;;  %v454_v55 = vsel %vm452_vm5, %v436_v51, -1e+30 }
 0x181   : > { %v653_v56 = vpop.f32.mrf.mxu0  ;;  %v457_v57 = vsel %vm456_vm6, %v454_v55, -inf }
 0x182   : > { %v437_v58 = vadd.f32 %v435_v48, %v432_v54  ;;  %458 = vmax.xlane.f32.xlu1 %v457_v57 }
 0x184   : > { %v455_v59 = vsel %vm453_vm8, %v437_v58, -1e+30 }
 0x185   : > { %v460_v60 = vsel %vm456_vm6, %v455_v59, -inf }
 0x186   : > { %461 = vmax.xlane.f32.xlu0 %v460_v60 }
 0x20b   : > { %v459_v61 = vpop.xlane.xlu1 %458 }
 0x20c   : > { %v463_v62 = vsub.f32 %v454_v55, %v459_v61 }
 0x20e   : > { %v465_v63 = vmul.f32 1.442695, %v463_v62 }
 0x20f   : > { %v462_v0 = vpop.xlane.xlu0 %461 }
 0x210   : > { %674 = vpow2.f32 %v465_v63  ;;  %v464_v1 = vsub.f32 %v455_v59, %v462_v0 }
 0x212   : > { %v467_v4 = vmul.f32 1.442695, %v464_v1 }
 0x214   : > { %676 = vpow2.f32 %v467_v4 }
 0x21d   : > { %v675_v5 = vpop.eup %674 }
 0x21e   : > { %v469_v6 = vsel %vm456_vm6, %v675_v5, 0.0 }
 0x21f   : > { %470 = vadd.xlane.f32.xlu0 %v469_v6 }
 0x221   : > { %v677_v7 = vpop.eup %676 }
 0x222   : > { %v472_v8 = vsel %vm456_vm6, %v677_v7, 0.0 }
 0x223   : > { %473 = vadd.xlane.f32.xlu0 %v472_v8 }
 0x2a8   : > { %v471_v10 = vpop.xlane.xlu0 %470 }
 0x2a9   : > { %678 = vrcp.f32 %v471_v10 }
 0x2ac   : > { %v474_v11 = vpop.xlane.xlu0 %473 }
 0x2ad   : > { %680 = vrcp.f32 %v474_v11 }
 0x2b6   : > { %v679_v12 = vpop.eup %678 }
 0x2b7   : > { %v477_v14 = vmul.f32 %v679_v12, %v675_v5 }
 0x2ba   : > { %v681_v13 = vpop.eup %680 }
 0x2bb   : > { %v478_v15 = vmul.f32 %v681_v13, %v677_v7 }
 0x2bd   : > { %v479_v16 = vpack.c.bf16 %v478_v15, %v477_v14 }
 0x2bf   : > { %657 = vmatmul.mubr.msk.bf16.vlgmr.msra.gmra.mxu1 %vm456_vm6, %v479_v16 }
 0x37f   : > { %v518_v17 = vpop.f32.mrf.mxu1 }
 0x380   : > { %531 = vrot.lane.b32.xlu0 %v518_v17, %s693_s14  ;;  %v527_v19 = vsub.f32 %v749_v2, %v518_v17  ;;  %v525_v25 = vmul.f32 %v518_v17, %v749_v2 }
 0x381   : > { %v658_v18 = vpop.f32.mrf.mxu1 }
 0x383   : > { %v521_v20 = vpop.f32.mrf.mxu1 }
 0x384   : > { %539 = vrot.lane.b32.xlu0 %v527_v19, %s693_s14  ;;  %533 = vrot.lane.b32.xlu1 %v521_v20, %s693_s14  ;;  %v528_v22 = vsub.f32 %v751_v3, %v521_v20  ;;  %v526_v30 = vmul.f32 %v521_v20, %v751_v3 }
 0x385   : > { %v659_v21 = vpop.f32.mrf.mxu1 }
 0x388   : > { %541 = vrot.lane.b32.xlu0 %v528_v22, %s693_s14 }
 0x3f2   : > { %v532_v23 = vpop.permute.xlu0 %531 }
 0x3f3   : > { %v545_v24 = vsel %vm283_vm0, %v749_v2, %v532_v23 }
 0x3f4   : > { %549 = vst [vmem:[%s267_s18] sm:$0xff] %v545_v24 }
 0x3f6   : > { %v540_v26 = vpop.permute.xlu0 %539  ;;  %v534_v27 = vpop.permute.xlu1 %533 }
 0x3f7   : > { %v547_v28 = vsel %vm283_vm0, %v525_v25, %v540_v26  ;;  %v546_v29 = vsel %vm283_vm0, %v751_v3, %v534_v27 }
 0x3f8   : > { %550 = vst [vmem:[%s267_s18 + $0x8] sm:$0xff] %v547_v28  ;;  %551 = vst [vmem:[%s267_s18 + $0x10] sm:$0xff] %v546_v29 }
 0x3fa   : > { %v542_v31 = vpop.permute.xlu0 %541 }
 0x3fb   : > { %v548_v32 = vsel %vm283_vm0, %v526_v30, %v542_v31 }
 0x3fc   : > { %552 = vst [vmem:[%s267_s18 + $0x18] sm:$0xff] %v548_v32 }
 0x3fd PF: > { %s18_s23 = sadd.s32 1, %s688_s23  }
 0x3fe   : > { %p15_p4 = scmp.ge.s32.totalorder %s18_s23, 4  }
 0x400   :  { %17 = sbr.rel (!%p15_p4) target bundleno = 3 (0x3), region = 77 }

</bundles_post_ra>
